<compile_context>
chip_gen: v6e
topology: v6e:2x2x1
jax: 0.10.0
libtpu: 0.0.40
codegen_flags: <defaults>
</compile_context>

<pallas_src>
import functools

import jax
import jax.numpy as jnp
from jax.experimental import pallas as pl
from jax.experimental.pallas import tpu as pltpu


# ----------------------------- kernel ----------------------------------------
def _double_conv_kernel(x_ref, w1_ref, b1_ref, w2_ref, b2_ref, o_ref, *, img_h):
    """One (batch, row-block) tile per grid step.

    x_ref : (Cin, TH+4, W+4) bf16  halo'd, zero-padded NCHW input window
    w1_ref: (9, Cmid, Cin)   bf16  conv1 per-tap weights, BN1 scale folded in
    b1_ref: (Cmid, 1)        f32   folded BN1 shift (incl. conv1 bias)
    w2_ref: (Cout, 9*Cmid)   bf16  conv2 weights (tap-major K), BN2 scale folded in
    b2_ref: (Cout, 1)        f32   folded BN2 shift
    o_ref : (Cout, TH*W)     bf16  output tile; lanes = flattened (row, col)
    """
    cin, thp, wp = x_ref.shape
    th = thp - 4
    wdim = wp - 4
    th2 = th + 2
    wd2 = wdim + 2
    cmid = b1_ref.shape[0]

    rb = pl.program_id(1)
    xp = x_ref[...]                                          # (Cin, TH+4, W+4)

    # ---- conv1 (+ folded BN1, ReLU) ------------------------------------------
    # 9 accumulating K=Cin matmuls straight off the padded window (no im2col
    # scratch; K is tiny so patch materialization costs more than it saves).
    # The result covers the (TH+2) x (W+2) intermediate halo that conv2 needs
    # (recompute halo -> no cross-row-block communication).
    sp1 = th2 * wd2
    acc1 = jnp.zeros((cmid, sp1), jnp.float32)
    for dy in range(3):
        for dx in range(3):
            xs = xp[:, dy:dy + th2, dx:dx + wd2].reshape(cin, sp1)
            acc1 = acc1 + jnp.dot(w1_ref[dy * 3 + dx], xs,
                                  preferred_element_type=jnp.float32)
    h = jnp.maximum(acc1 + b1_ref[...], 0.0)                 # (Cmid, (TH+2)*(W+2)) f32

    # Un-flatten for conv2's spatial taps; this is the single cross-lane relayout
    # left in the kernel (the output store below needs none).
    hpad = h.reshape(cmid, th2, wd2)

    # conv2 must see the intermediate zero-padded at the *image* boundary but real
    # conv1 values at interior row-block boundaries.  One fused VPU select does all
    # halo zeroing (no masked stores; correct however the parallel grid is split).
    li = jax.lax.broadcasted_iota(jnp.int32, (1, th2, wd2), 1)     # local row
    lj = jax.lax.broadcasted_iota(jnp.int32, (1, th2, wd2), 2)     # local col
    gr = rb * th - 1 + li                                          # global row
    valid = (gr >= 0) & (gr < img_h) & (lj >= 1) & (lj <= wdim)
    # bf16 intermediate between the convs (bf16-inference choice, mirrored in the ref).
    hpad = jnp.where(valid, hpad, 0.0).astype(jnp.bfloat16)

    # ---- conv2 (+ folded BN2, ReLU): one fused K = 9*Cmid MXU matmul -----------
    # Patch rows are (tap, channel)-major, so every concatenated piece is a full
    # (Cmid x TH*W) sublane tile; spatial stays flattened on the lane axis so the
    # (Cout, TH*W) result is stored lane-dense with NO reshape (TH*W is kept a
    # multiple of 128 by the wrapper's row-block choice).
    sp2 = th * wdim
    p2 = jnp.concatenate(
        [hpad[:, dy:dy + th, dx:dx + wdim].reshape(cmid, sp2)
         for dy in range(3) for dx in range(3)],
        axis=0)                                              # (9*Cmid, TH*W) bf16
    acc2 = jnp.dot(w2_ref[...], p2, preferred_element_type=jnp.float32)
    out = jnp.maximum(acc2 + b2_ref[...], 0.0)               # (Cout, TH*W) f32
    o_ref[...] = out.astype(o_ref.dtype)


# ----------------------------- wrapper ----------------------------------------
def _fold_bn(conv_bias, gamma, beta, mean, var, eps=1e-5):
    scale = gamma / jnp.sqrt(var + eps)
    shift = beta + scale * (conv_bias - mean)
    return scale, shift


def _vmem_limit_bytes():
    """Generation-aware VMEM budget: ~85% of capacity, capped at 112 MiB
    (v5e/v6e ~108 MiB, v7x ~54 MiB); conservative fallback if the query fails."""
    try:
        cap = int(pltpu.get_tpu_info().vmem_capacity_bytes)
        if cap <= 0:
            raise ValueError("bad vmem capacity")
    except Exception:  # pragma: no cover - query unavailable on some stacks
        cap = 64 * 1024 * 1024
    return int(min(cap * 0.85, 112 * 1024 * 1024))


def _pick_row_block(H, W, cin, cmid, cout, vmem_budget):
    """Largest row block TH (divisor of H, TH*W lane-aligned) whose per-step working
    set fits comfortably in the generation's VMEM budget.  v7x's smaller VMEM
    automatically yields a smaller TH than v5e/v6e."""
    def footprint(th):
        inp = 2 * cin * (th + 4) * (W + 4) * 2       # double-buffered bf16 input window
        mid = cmid * (th + 2) * (W + 2) * (4 + 2)    # f32 acc1 + bf16 hpad values
        p2 = 9 * cmid * th * W * 2                   # bf16 conv2 im2col value
        acc = cout * th * W * (4 + 2 * 2)            # f32 acc2 + double-buffered bf16 out
        return inp + mid + p2 + acc

    budget = vmem_budget // 2                        # headroom: weights, temps, regalloc
    cands = [d for d in range(H, 0, -1)
             if H % d == 0 and ((d * W) % 128 == 0 or d == H)]
    for th in cands:
        if footprint(th) <= budget:
            return th
    return cands[-1]


@functools.partial(jax.jit, static_argnames=("row_block",))
def in_conv_pallas(x_nchw, w1, b1, bn1, w2, b2, bn2, *, row_block=None):
    """x_nchw: (N, Cin, H, W) float32.  Returns (N, Cout, H, W) bfloat16."""
    N, Cin, H, W = x_nchw.shape
    Cmid = w1.shape[0]
    Cout = w2.shape[0]

    vmem_limit = _vmem_limit_bytes()
    TH = row_block if row_block is not None else _pick_row_block(
        H, W, Cin, Cmid, Cout, vmem_limit)
    assert H % TH == 0, (H, TH)
    assert (TH * W) % 128 == 0 or TH == H, (TH, W)   # lane-dense output blocks
    NB = H // TH

    s1, sh1 = _fold_bn(b1, *bn1)
    s2, sh2 = _fold_bn(b2, *bn2)

    # conv1 weights: (Cmid, Cin, 3, 3) -> (9, Cmid, Cin), BN1 scale folded in.
    w1t = (jnp.transpose(w1, (2, 3, 0, 1)).reshape(9, Cmid, Cin)
           * s1[None, :, None]).astype(jnp.bfloat16)
    # conv2 weights: (Cout, Cmid, 3, 3) -> (Cout, 9*Cmid) tap-major K, BN2 scale folded.
    w2m = (jnp.transpose(w2, (0, 2, 3, 1)).reshape(Cout, 9 * Cmid)
           * s2[:, None]).astype(jnp.bfloat16)
    sh1 = sh1.reshape(Cmid, 1).astype(jnp.float32)
    sh2 = sh2.reshape(Cout, 1).astype(jnp.float32)

    # Input stays NCHW end-to-end (no NHWC transpose pass).  One fused cast+pad+window
    # gather builds the per-row-block halo'd input windows:
    #   (N, NB, Cin, TH+4, W+4); halo = 2 rows/cols (double-conv recompute halo).
    xq = x_nchw.astype(jnp.bfloat16)
    xpad = jnp.pad(xq, ((0, 0), (0, 0), (2, 2), (2, 2)))
    xwin = jnp.stack(
        [xpad[:, :, rb * TH: rb * TH + TH + 4, :] for rb in range(NB)], axis=1)

    kernel = functools.partial(_double_conv_kernel, img_h=H)

    out = pl.pallas_call(
        kernel,
        out_shape=jax.ShapeDtypeStruct((N, Cout, H * W), jnp.bfloat16),
        grid_spec=pltpu.PrefetchScalarGridSpec(
            num_scalar_prefetch=0,
            grid=(N, NB),
            in_specs=[
                pl.BlockSpec((None, None, Cin, TH + 4, W + 4),
                             lambda n, rb: (n, rb, 0, 0, 0)),
                # Weights / shifts are grid-invariant -> kept resident in VMEM.
                pl.BlockSpec((9, Cmid, Cin), lambda n, rb: (0, 0, 0)),
                pl.BlockSpec((Cmid, 1), lambda n, rb: (0, 0)),
                pl.BlockSpec((Cout, 9 * Cmid), lambda n, rb: (0, 0)),
                pl.BlockSpec((Cout, 1), lambda n, rb: (0, 0)),
            ],
            out_specs=pl.BlockSpec((None, Cout, TH * W), lambda n, rb: (n, 0, rb)),
        ),
        compiler_params=pltpu.CompilerParams(
            dimension_semantics=("parallel", "parallel"),
            vmem_limit_bytes=vmem_limit,
        ),
    )(xwin, w1t, sh1, w2m, sh2)

    # Free reshape ((NB, TH) rows are already contiguous); output stays bf16.
    return out.reshape(N, Cout, H, W)


# ----------------------------- references -------------------------------------
def _reference_f32(x, w1, b1, bn1, w2, b2, bn2):
    """Full-precision reference (NCHW) matching the PyTorch module."""
    def conv_bn_relu(h, w, b, bn):
        g, be, m, v = bn
        z = jax.lax.conv_general_dilated(
            h, w, (1, 1), "SAME",
            dimension_numbers=("NCHW", "OIHW", "NCHW"),
            precision=jax.lax.Precision.HIGHEST)
        z = z + b[None, :, None, None]
        z = g[None, :, None, None] * (z - m[None, :, None, None]) / jnp.sqrt(
            v[None, :, None, None] + 1e-5) + be[None, :, None, None]
        return jnp.maximum(z, 0.0)
    return conv_bn_relu(conv_bn_relu(x, w1, b1, bn1), w2, b2, bn2)


def _reference_bf16_mirror(x, w1, b1, bn1, w2, b2, bn2):
    """Reference applying the SAME bf16 quantization as the kernel (tight check)."""
    s1, sh1 = _fold_bn(b1, *bn1)
    s2, sh2 = _fold_bn(b2, *bn2)
    w1q = (w1 * s1[:, None, None, None]).astype(jnp.bfloat16).astype(jnp.float32)
    w2q = (w2 * s2[:, None, None, None]).astype(jnp.bfloat16).astype(jnp.float32)
    xq = x.astype(jnp.bfloat16).astype(jnp.float32)

    def conv(a, w):
        return jax.lax.conv_general_dilated(
            a, w, (1, 1), "SAME",
            dimension_numbers=("NCHW", "OIHW", "NCHW"),
            precision=jax.lax.Precision.HIGHEST)

    h = jnp.maximum(conv(xq, w1q) + sh1[None, :, None, None], 0.0)
    h = h.astype(jnp.bfloat16).astype(jnp.float32)
    o = jnp.maximum(conv(h, w2q) + sh2[None, :, None, None], 0.0)
    return o.astype(jnp.bfloat16).astype(jnp.float32)


if __name__ == "__main__":
    key = jax.random.PRNGKey(0)
    N, Cin, Cout, H, W = 2, 4, 8, 16, 16

    k = jax.random.split(key, 12)
    x = jax.random.normal(k[0], (N, Cin, H, W), jnp.float32)

    # Deterministic synthetic parameters (PyTorch shapes: OIHW weights).
    w1 = jax.random.normal(k[1], (Cout, Cin, 3, 3), jnp.float32) * 0.2
    b1 = jax.random.normal(k[2], (Cout,), jnp.float32) * 0.1
    bn1 = (jnp.abs(jax.random.normal(k[3], (Cout,))) + 0.5,   # gamma
           jax.random.normal(k[4], (Cout,)) * 0.1,            # beta
           jax.random.normal(k[5], (Cout,)) * 0.1,            # running_mean
           jnp.abs(jax.random.normal(k[6], (Cout,))) + 0.5)   # running_var

    w2 = jax.random.normal(k[7], (Cout, Cout, 3, 3), jnp.float32) * 0.2
    b2 = jax.random.normal(k[8], (Cout,), jnp.float32) * 0.1
    bn2 = (jnp.abs(jax.random.normal(k[9], (Cout,))) + 0.5,
           jax.random.normal(k[10], (Cout,)) * 0.1,
           jax.random.normal(k[11], (Cout,)) * 0.1,
           jnp.ones((Cout,), jnp.float32))

    # row_block=8 -> grid (N, 2): exercises the halo'd row-block path at toy size
    # (and keeps TH*W = 128 lane-dense).  row_block=None auto-picks from VMEM budget.
    out = jax.block_until_ready(
        in_conv_pallas(x, w1, b1, bn1, w2, b2, bn2, row_block=8))
    assert out.shape == (N, Cout, H, W), out.shape
    assert out.dtype == jnp.bfloat16, out.dtype
    out_f32 = out.astype(jnp.float32)

    # Tight check against a reference with identical bf16 quantization
    # (tolerance covers a few bf16 ulps from accumulation-order differences).
    ref_q = _reference_bf16_mirror(x, w1, b1, bn1, w2, b2, bn2)
    assert jnp.allclose(out_f32, ref_q, atol=5e-2, rtol=2e-2), \
        float(jnp.max(jnp.abs(out_f32 - ref_q)))

    # Loose sanity check against the full-f32 module semantics (bf16 noise only).
    ref = _reference_f32(x, w1, b1, bn1, w2, b2, bn2)
    max_err = float(jnp.max(jnp.abs(out_f32 - ref)))
    assert max_err < 1.0, max_err

    # Also cover the auto-tiled path (TH == H here) and check it agrees.
    out2 = jax.block_until_ready(in_conv_pallas(x, w1, b1, bn1, w2, b2, bn2))
    assert jnp.allclose(out2.astype(jnp.float32), out_f32, atol=5e-2, rtol=2e-2)

    print("KERNEL_OK")
</pallas_src>

<mosaic_0001>
module attributes {stable_mosaic.version = 11 : i64} {
  func.func @_double_conv_kernel(%arg0: i32, %arg1: i32, %arg2: memref<1x1x4x12x20xbf16, #tpu.memory_space<vmem>>, %arg3: memref<9x8x4xbf16, #tpu.memory_space<vmem>>, %arg4: memref<8x1xf32, #tpu.memory_space<vmem>>, %arg5: memref<8x72xbf16, #tpu.memory_space<vmem>>, %arg6: memref<8x1xf32, #tpu.memory_space<vmem>>, %arg7: memref<1x8x128xbf16, #tpu.memory_space<vmem>>) attributes {dimension_semantics = [#tpu.dimension_semantics<parallel>, #tpu.dimension_semantics<parallel>], iteration_bounds = array<i64: 2, 2>, scalar_prefetch = 0 : i64, scratch_operands = 0 : i64, tpu.core_type = #tpu.core_type<tc>, window_params = [{transform_indices = @transform_0, window_bounds = array<i64: 1, 1, 4, 12, 20>}, {pipeline_mode = #tpu.pipeline_mode<synchronous>, transform_indices = @transform_1, window_bounds = array<i64: 9, 8, 4>}, {pipeline_mode = #tpu.pipeline_mode<synchronous>, transform_indices = @transform_2, window_bounds = array<i64: 8, 1>}, {pipeline_mode = #tpu.pipeline_mode<synchronous>, transform_indices = @transform_3, window_bounds = array<i64: 8, 72>}, {pipeline_mode = #tpu.pipeline_mode<synchronous>, transform_indices = @transform_4, window_bounds = array<i64: 8, 1>}, {transform_indices = @transform_5, window_bounds = array<i64: 1, 8, 128>}]} {
    %c0 = arith.constant 0 : index
    %c0_0 = arith.constant 0 : index
    %c0_1 = arith.constant 0 : index
    %c0_2 = arith.constant 0 : index
    %c0_3 = arith.constant 0 : index
    %0 = vector.load %arg2[%c0, %c0_0, %c0_1, %c0_2, %c0_3] : memref<1x1x4x12x20xbf16, #tpu.memory_space<vmem>>, vector<1x1x4x12x20xbf16>
    %1 = vector.shape_cast %0 : vector<1x1x4x12x20xbf16> to vector<4x12x20xbf16>
    %cst = arith.constant 0.000000e+00 : f32
    %2 = vector.broadcast %cst : f32 to vector<8x180xf32>
    %3 = vector.extract_strided_slice %1 {offsets = [0, 0, 0], sizes = [4, 10, 18], strides = [1, 1, 1]} : vector<4x12x20xbf16> to vector<4x10x18xbf16>
    %4 = vector.shape_cast %3 : vector<4x10x18xbf16> to vector<4x180xbf16>
    %c0_4 = arith.constant 0 : index
    %c0_5 = arith.constant 0 : index
    %c0_6 = arith.constant 0 : index
    %5 = vector.load %arg3[%c0_4, %c0_5, %c0_6] : memref<9x8x4xbf16, #tpu.memory_space<vmem>>, vector<1x8x4xbf16>
    %6 = vector.shape_cast %5 : vector<1x8x4xbf16> to vector<8x4xbf16>
    %cst_7 = arith.constant dense<0.000000e+00> : vector<8x180xf32>
    %7 = tpu.matmul %6, %4, %cst_7 {dimension_numbers = #tpu.dot_dimension_numbers<[1], [0], [0], [1], [0, 0, 1, 1], [], []>} : vector<8x4xbf16>, vector<4x180xbf16>, vector<8x180xf32> -> vector<8x180xf32>
    %8 = arith.addf %2, %7 : vector<8x180xf32>
    %9 = vector.extract_strided_slice %1 {offsets = [0, 0, 1], sizes = [4, 10, 18], strides = [1, 1, 1]} : vector<4x12x20xbf16> to vector<4x10x18xbf16>
    %10 = vector.shape_cast %9 : vector<4x10x18xbf16> to vector<4x180xbf16>
    %c1 = arith.constant 1 : index
    %c0_8 = arith.constant 0 : index
    %c0_9 = arith.constant 0 : index
    %11 = vector.load %arg3[%c1, %c0_8, %c0_9] : memref<9x8x4xbf16, #tpu.memory_space<vmem>>, vector<1x8x4xbf16>
    %12 = vector.shape_cast %11 : vector<1x8x4xbf16> to vector<8x4xbf16>
    %cst_10 = arith.constant dense<0.000000e+00> : vector<8x180xf32>
    %13 = tpu.matmul %12, %10, %cst_10 {dimension_numbers = #tpu.dot_dimension_numbers<[1], [0], [0], [1], [0, 0, 1, 1], [], []>} : vector<8x4xbf16>, vector<4x180xbf16>, vector<8x180xf32> -> vector<8x180xf32>
    %14 = arith.addf %8, %13 : vector<8x180xf32>
    %15 = vector.extract_strided_slice %1 {offsets = [0, 0, 2], sizes = [4, 10, 18], strides = [1, 1, 1]} : vector<4x12x20xbf16> to vector<4x10x18xbf16>
    %16 = vector.shape_cast %15 : vector<4x10x18xbf16> to vector<4x180xbf16>
    %c2 = arith.constant 2 : index
    %c0_11 = arith.constant 0 : index
    %c0_12 = arith.constant 0 : index
    %17 = vector.load %arg3[%c2, %c0_11, %c0_12] : memref<9x8x4xbf16, #tpu.memory_space<vmem>>, vector<1x8x4xbf16>
    %18 = vector.shape_cast %17 : vector<1x8x4xbf16> to vector<8x4xbf16>
    %cst_13 = arith.constant dense<0.000000e+00> : vector<8x180xf32>
    %19 = tpu.matmul %18, %16, %cst_13 {dimension_numbers = #tpu.dot_dimension_numbers<[1], [0], [0], [1], [0, 0, 1, 1], [], []>} : vector<8x4xbf16>, vector<4x180xbf16>, vector<8x180xf32> -> vector<8x180xf32>
    %20 = arith.addf %14, %19 : vector<8x180xf32>
    %21 = vector.extract_strided_slice %1 {offsets = [0, 1, 0], sizes = [4, 10, 18], strides = [1, 1, 1]} : vector<4x12x20xbf16> to vector<4x10x18xbf16>
    %22 = vector.shape_cast %21 : vector<4x10x18xbf16> to vector<4x180xbf16>
    %c3 = arith.constant 3 : index
    %c0_14 = arith.constant 0 : index
    %c0_15 = arith.constant 0 : index
    %23 = vector.load %arg3[%c3, %c0_14, %c0_15] : memref<9x8x4xbf16, #tpu.memory_space<vmem>>, vector<1x8x4xbf16>
    %24 = vector.shape_cast %23 : vector<1x8x4xbf16> to vector<8x4xbf16>
    %cst_16 = arith.constant dense<0.000000e+00> : vector<8x180xf32>
    %25 = tpu.matmul %24, %22, %cst_16 {dimension_numbers = #tpu.dot_dimension_numbers<[1], [0], [0], [1], [0, 0, 1, 1], [], []>} : vector<8x4xbf16>, vector<4x180xbf16>, vector<8x180xf32> -> vector<8x180xf32>
    %26 = arith.addf %20, %25 : vector<8x180xf32>
    %27 = vector.extract_strided_slice %1 {offsets = [0, 1, 1], sizes = [4, 10, 18], strides = [1, 1, 1]} : vector<4x12x20xbf16> to vector<4x10x18xbf16>
    %28 = vector.shape_cast %27 : vector<4x10x18xbf16> to vector<4x180xbf16>
    %c4 = arith.constant 4 : index
    %c0_17 = arith.constant 0 : index
    %c0_18 = arith.constant 0 : index
    %29 = vector.load %arg3[%c4, %c0_17, %c0_18] : memref<9x8x4xbf16, #tpu.memory_space<vmem>>, vector<1x8x4xbf16>
    %30 = vector.shape_cast %29 : vector<1x8x4xbf16> to vector<8x4xbf16>
    %cst_19 = arith.constant dense<0.000000e+00> : vector<8x180xf32>
    %31 = tpu.matmul %30, %28, %cst_19 {dimension_numbers = #tpu.dot_dimension_numbers<[1], [0], [0], [1], [0, 0, 1, 1], [], []>} : vector<8x4xbf16>, vector<4x180xbf16>, vector<8x180xf32> -> vector<8x180xf32>
    %32 = arith.addf %26, %31 : vector<8x180xf32>
    %33 = vector.extract_strided_slice %1 {offsets = [0, 1, 2], sizes = [4, 10, 18], strides = [1, 1, 1]} : vector<4x12x20xbf16> to vector<4x10x18xbf16>
    %34 = vector.shape_cast %33 : vector<4x10x18xbf16> to vector<4x180xbf16>
    %c5 = arith.constant 5 : index
    %c0_20 = arith.constant 0 : index
    %c0_21 = arith.constant 0 : index
    %35 = vector.load %arg3[%c5, %c0_20, %c0_21] : memref<9x8x4xbf16, #tpu.memory_space<vmem>>, vector<1x8x4xbf16>
    %36 = vector.shape_cast %35 : vector<1x8x4xbf16> to vector<8x4xbf16>
    %cst_22 = arith.constant dense<0.000000e+00> : vector<8x180xf32>
    %37 = tpu.matmul %36, %34, %cst_22 {dimension_numbers = #tpu.dot_dimension_numbers<[1], [0], [0], [1], [0, 0, 1, 1], [], []>} : vector<8x4xbf16>, vector<4x180xbf16>, vector<8x180xf32> -> vector<8x180xf32>
    %38 = arith.addf %32, %37 : vector<8x180xf32>
    %39 = vector.extract_strided_slice %1 {offsets = [0, 2, 0], sizes = [4, 10, 18], strides = [1, 1, 1]} : vector<4x12x20xbf16> to vector<4x10x18xbf16>
    %40 = vector.shape_cast %39 : vector<4x10x18xbf16> to vector<4x180xbf16>
    %c6 = arith.constant 6 : index
    %c0_23 = arith.constant 0 : index
    %c0_24 = arith.constant 0 : index
    %41 = vector.load %arg3[%c6, %c0_23, %c0_24] : memref<9x8x4xbf16, #tpu.memory_space<vmem>>, vector<1x8x4xbf16>
    %42 = vector.shape_cast %41 : vector<1x8x4xbf16> to vector<8x4xbf16>
    %cst_25 = arith.constant dense<0.000000e+00> : vector<8x180xf32>
    %43 = tpu.matmul %42, %40, %cst_25 {dimension_numbers = #tpu.dot_dimension_numbers<[1], [0], [0], [1], [0, 0, 1, 1], [], []>} : vector<8x4xbf16>, vector<4x180xbf16>, vector<8x180xf32> -> vector<8x180xf32>
    %44 = arith.addf %38, %43 : vector<8x180xf32>
    %45 = vector.extract_strided_slice %1 {offsets = [0, 2, 1], sizes = [4, 10, 18], strides = [1, 1, 1]} : vector<4x12x20xbf16> to vector<4x10x18xbf16>
    %46 = vector.shape_cast %45 : vector<4x10x18xbf16> to vector<4x180xbf16>
    %c7 = arith.constant 7 : index
    %c0_26 = arith.constant 0 : index
    %c0_27 = arith.constant 0 : index
    %47 = vector.load %arg3[%c7, %c0_26, %c0_27] : memref<9x8x4xbf16, #tpu.memory_space<vmem>>, vector<1x8x4xbf16>
    %48 = vector.shape_cast %47 : vector<1x8x4xbf16> to vector<8x4xbf16>
    %cst_28 = arith.constant dense<0.000000e+00> : vector<8x180xf32>
    %49 = tpu.matmul %48, %46, %cst_28 {dimension_numbers = #tpu.dot_dimension_numbers<[1], [0], [0], [1], [0, 0, 1, 1], [], []>} : vector<8x4xbf16>, vector<4x180xbf16>, vector<8x180xf32> -> vector<8x180xf32>
    %50 = arith.addf %44, %49 : vector<8x180xf32>
    %51 = vector.extract_strided_slice %1 {offsets = [0, 2, 2], sizes = [4, 10, 18], strides = [1, 1, 1]} : vector<4x12x20xbf16> to vector<4x10x18xbf16>
    %52 = vector.shape_cast %51 : vector<4x10x18xbf16> to vector<4x180xbf16>
    %c8 = arith.constant 8 : index
    %c0_29 = arith.constant 0 : index
    %c0_30 = arith.constant 0 : index
    %53 = vector.load %arg3[%c8, %c0_29, %c0_30] : memref<9x8x4xbf16, #tpu.memory_space<vmem>>, vector<1x8x4xbf16>
    %54 = vector.shape_cast %53 : vector<1x8x4xbf16> to vector<8x4xbf16>
    %cst_31 = arith.constant dense<0.000000e+00> : vector<8x180xf32>
    %55 = tpu.matmul %54, %52, %cst_31 {dimension_numbers = #tpu.dot_dimension_numbers<[1], [0], [0], [1], [0, 0, 1, 1], [], []>} : vector<8x4xbf16>, vector<4x180xbf16>, vector<8x180xf32> -> vector<8x180xf32>
    %56 = arith.addf %50, %55 : vector<8x180xf32>
    %c0_32 = arith.constant 0 : index
    %c0_33 = arith.constant 0 : index
    %57 = vector.load %arg4[%c0_32, %c0_33] : memref<8x1xf32, #tpu.memory_space<vmem>>, vector<8x1xf32>
    %58 = vector.broadcast %57 : vector<8x1xf32> to vector<8x180xf32>
    %59 = arith.addf %56, %58 : vector<8x180xf32>
    %cst_34 = arith.constant 0.000000e+00 : f32
    %60 = vector.broadcast %cst_34 : f32 to vector<8x180xf32>
    %61 = arith.maximumf %59, %60 : vector<8x180xf32>
    %62 = vector.shape_cast %61 : vector<8x180xf32> to vector<8x10x18xf32>
    %63 = tpu.iota {dimensions = array<i32: 1>} : vector<1x10x18xi32>
    %64 = tpu.iota {dimensions = array<i32: 2>} : vector<1x10x18xi32>
    %c8_i32 = arith.constant 8 : i32
    %65 = arith.muli %arg1, %c8_i32 : i32
    %c1_i32 = arith.constant 1 : i32
    %66 = arith.subi %65, %c1_i32 : i32
    %67 = vector.broadcast %66 : i32 to vector<1x10x18xi32>
    %68 = arith.addi %67, %63 : vector<1x10x18xi32>
    %c0_i32 = arith.constant 0 : i32
    %69 = vector.broadcast %c0_i32 : i32 to vector<1x10x18xi32>
    %70 = arith.cmpi sge, %68, %69 : vector<1x10x18xi32>
    %c16_i32 = arith.constant 16 : i32
    %71 = vector.broadcast %c16_i32 : i32 to vector<1x10x18xi32>
    %72 = arith.cmpi slt, %68, %71 : vector<1x10x18xi32>
    %73 = arith.andi %70, %72 : vector<1x10x18xi1>
    %c1_i32_35 = arith.constant 1 : i32
    %74 = vector.broadcast %c1_i32_35 : i32 to vector<1x10x18xi32>
    %75 = arith.cmpi sge, %64, %74 : vector<1x10x18xi32>
    %76 = arith.andi %73, %75 : vector<1x10x18xi1>
    %c16_i32_36 = arith.constant 16 : i32
    %77 = vector.broadcast %c16_i32_36 : i32 to vector<1x10x18xi32>
    %78 = arith.cmpi sle, %64, %77 : vector<1x10x18xi32>
    %79 = arith.andi %76, %78 : vector<1x10x18xi1>
    %cst_37 = arith.constant 0.000000e+00 : f32
    %80 = vector.shape_cast %79 : vector<1x10x18xi1> to vector<1x10x18xi1>
    %81 = vector.broadcast %80 : vector<1x10x18xi1> to vector<8x10x18xi1>
    %82 = vector.broadcast %cst_37 : f32 to vector<8x10x18xf32>
    %83 = arith.select %81, %62, %82 : vector<8x10x18xi1>, vector<8x10x18xf32>
    %84 = arith.truncf %83 : vector<8x10x18xf32> to vector<8x10x18xbf16>
    %85 = vector.extract_strided_slice %84 {offsets = [0, 0, 0], sizes = [8, 8, 16], strides = [1, 1, 1]} : vector<8x10x18xbf16> to vector<8x8x16xbf16>
    %86 = vector.shape_cast %85 : vector<8x8x16xbf16> to vector<8x128xbf16>
    %87 = vector.extract_strided_slice %84 {offsets = [0, 0, 1], sizes = [8, 8, 16], strides = [1, 1, 1]} : vector<8x10x18xbf16> to vector<8x8x16xbf16>
    %88 = vector.shape_cast %87 : vector<8x8x16xbf16> to vector<8x128xbf16>
    %89 = vector.extract_strided_slice %84 {offsets = [0, 0, 2], sizes = [8, 8, 16], strides = [1, 1, 1]} : vector<8x10x18xbf16> to vector<8x8x16xbf16>
    %90 = vector.shape_cast %89 : vector<8x8x16xbf16> to vector<8x128xbf16>
    %91 = vector.extract_strided_slice %84 {offsets = [0, 1, 0], sizes = [8, 8, 16], strides = [1, 1, 1]} : vector<8x10x18xbf16> to vector<8x8x16xbf16>
    %92 = vector.shape_cast %91 : vector<8x8x16xbf16> to vector<8x128xbf16>
    %93 = vector.extract_strided_slice %84 {offsets = [0, 1, 1], sizes = [8, 8, 16], strides = [1, 1, 1]} : vector<8x10x18xbf16> to vector<8x8x16xbf16>
    %94 = vector.shape_cast %93 : vector<8x8x16xbf16> to vector<8x128xbf16>
    %95 = vector.extract_strided_slice %84 {offsets = [0, 1, 2], sizes = [8, 8, 16], strides = [1, 1, 1]} : vector<8x10x18xbf16> to vector<8x8x16xbf16>
    %96 = vector.shape_cast %95 : vector<8x8x16xbf16> to vector<8x128xbf16>
    %97 = vector.extract_strided_slice %84 {offsets = [0, 2, 0], sizes = [8, 8, 16], strides = [1, 1, 1]} : vector<8x10x18xbf16> to vector<8x8x16xbf16>
    %98 = vector.shape_cast %97 : vector<8x8x16xbf16> to vector<8x128xbf16>
    %99 = vector.extract_strided_slice %84 {offsets = [0, 2, 1], sizes = [8, 8, 16], strides = [1, 1, 1]} : vector<8x10x18xbf16> to vector<8x8x16xbf16>
    %100 = vector.shape_cast %99 : vector<8x8x16xbf16> to vector<8x128xbf16>
    %101 = vector.extract_strided_slice %84 {offsets = [0, 2, 2], sizes = [8, 8, 16], strides = [1, 1, 1]} : vector<8x10x18xbf16> to vector<8x8x16xbf16>
    %102 = vector.shape_cast %101 : vector<8x8x16xbf16> to vector<8x128xbf16>
    %103 = tpu.concatenate %86, %88, %90, %92, %94, %96, %98, %100, %102 in 0 : vector<8x128xbf16>, vector<8x128xbf16>, vector<8x128xbf16>, vector<8x128xbf16>, vector<8x128xbf16>, vector<8x128xbf16>, vector<8x128xbf16>, vector<8x128xbf16>, vector<8x128xbf16> -> vector<72x128xbf16>
    %c0_38 = arith.constant 0 : index
    %c0_39 = arith.constant 0 : index
    %104 = vector.load %arg5[%c0_38, %c0_39] : memref<8x72xbf16, #tpu.memory_space<vmem>>, vector<8x72xbf16>
    %cst_40 = arith.constant dense<0.000000e+00> : vector<8x128xf32>
    %105 = tpu.matmul %104, %103, %cst_40 {dimension_numbers = #tpu.dot_dimension_numbers<[1], [0], [0], [1], [0, 0, 1, 1], [], []>} : vector<8x72xbf16>, vector<72x128xbf16>, vector<8x128xf32> -> vector<8x128xf32>
    %c0_41 = arith.constant 0 : index
    %c0_42 = arith.constant 0 : index
    %106 = vector.load %arg6[%c0_41, %c0_42] : memref<8x1xf32, #tpu.memory_space<vmem>>, vector<8x1xf32>
    %107 = vector.broadcast %106 : vector<8x1xf32> to vector<8x128xf32>
    %108 = arith.addf %105, %107 : vector<8x128xf32>
    %cst_43 = arith.constant 0.000000e+00 : f32
    %109 = vector.broadcast %cst_43 : f32 to vector<8x128xf32>
    %110 = arith.maximumf %108, %109 : vector<8x128xf32>
    %111 = arith.truncf %110 : vector<8x128xf32> to vector<8x128xbf16>
    %c0_44 = arith.constant 0 : index
    %c0_45 = arith.constant 0 : index
    %c0_46 = arith.constant 0 : index
    %112 = vector.load %arg7[%c0_44, %c0_45, %c0_46] : memref<1x8x128xbf16, #tpu.memory_space<vmem>>, vector<1x8x128xbf16>
    %113 = vector.shape_cast %112 : vector<1x8x128xbf16> to vector<8x128xbf16>
    %114 = vector.shape_cast %111 : vector<8x128xbf16> to vector<1x8x128xbf16>
    tpu.vector_store %arg7[%c0_44, %c0_45, %c0_46], %114 {strides = array<i32>} : memref<1x8x128xbf16, #tpu.memory_space<vmem>>, vector<1x8x128xbf16>,
    return
  }
  func.func @transform_0(%arg0: i32, %arg1: i32) -> (i32, i32, i32, i32, i32) {
    %c0_i32 = arith.constant 0 : i32
    %c0_i32_0 = arith.constant 0 : i32
    %c0_i32_1 = arith.constant 0 : i32
    %c0_i32_2 = arith.constant 0 : i32
    return %arg0, %arg1, %c0_i32, %c0_i32_0, %c0_i32_1 : i32, i32, i32, i32, i32
  }
  func.func @transform_1(%arg0: i32, %arg1: i32) -> (i32, i32, i32) {
    %c0_i32 = arith.constant 0 : i32
    %c0_i32_0 = arith.constant 0 : i32
    %c0_i32_1 = arith.constant 0 : i32
    %c0_i32_2 = arith.constant 0 : i32
    return %c0_i32, %c0_i32_0, %c0_i32_1 : i32, i32, i32
  }
  func.func @transform_2(%arg0: i32, %arg1: i32) -> (i32, i32) {
    %c0_i32 = arith.constant 0 : i32
    %c0_i32_0 = arith.constant 0 : i32
    %c0_i32_1 = arith.constant 0 : i32
    return %c0_i32, %c0_i32_0 : i32, i32
  }
  func.func @transform_3(%arg0: i32, %arg1: i32) -> (i32, i32) {
    %c0_i32 = arith.constant 0 : i32
    %c0_i32_0 = arith.constant 0 : i32
    %c0_i32_1 = arith.constant 0 : i32
    return %c0_i32, %c0_i32_0 : i32, i32
  }
  func.func @transform_4(%arg0: i32, %arg1: i32) -> (i32, i32) {
    %c0_i32 = arith.constant 0 : i32
    %c0_i32_0 = arith.constant 0 : i32
    %c0_i32_1 = arith.constant 0 : i32
    return %c0_i32, %c0_i32_0 : i32, i32
  }
  func.func @transform_5(%arg0: i32, %arg1: i32) -> (i32, i32, i32) {
    %c0_i32 = arith.constant 0 : i32
    %c0_i32_0 = arith.constant 0 : i32
    return %arg0, %c0_i32, %arg1 : i32, i32, i32
  }
}

</mosaic_0001>

<bundles_post_ra>
// kernel: in_conv_pallas.1
= control target key start
LH: loop header
LB: loop body
LE: loop exit
PB: predicated region body
PF: predicated region fallthrough
CT: control target
= control target key end

     0   :  { %s4606_s18 = smov 0   ;;  %s4608_s19 = smov 0   ;;  %s6549_s0 = inlined_call_operand.vmem [shape: bf16[2,2,4,12,20], index: 0, kind: input, shape index: {}]   ;;  %s6550_s1 = inlined_call_operand.vmem [shape: bf16[9,8,4], index: 1, kind: input, shape index: {}]   ;;  %s6551_s2 = inlined_call_operand.vmem [shape: f32[8,1], index: 2, kind: input, shape index: {}]   ;;  %s6552_s3 = inlined_call_operand.vmem [shape: bf16[8,72], index: 3, kind: input, shape index: {}]   ;;  %s6553_s4 = inlined_call_operand.vmem [shape: f32[8,1], index: 4, kind: input, shape index: {}]   ;;  %s6554_s5 = inlined_call_operand.vmem [shape: bf16[2,8,256], index: 5, kind: output, shape index: {}]  }
   0x1   :  { %s4610_s20 = smov 0   ;;  %s4612_s21 = smov 0  }
   0x2   :  { %s4614_s22 = smov 0  }
   0x3 LB: > { %s24_s23 = sadd.s32 1, %s4537_s20  ;;  %s27_s24 = sadd.s32 1, %s4541_s21  ;;  %s4545_s22 = sphi %s4614_s22, %s15_s22   ;;  %s4541_s21 = sphi %s4612_s21, %s6610_s21   ;;  %s4537_s20 = sphi %s4610_s20, %s6609_s20   ;;  %s4533_s19 = sphi %s4608_s19, %s6608_s19   ;;  %s4529_s18 = sphi %s4606_s18, %s6607_s18  }
   0x4   : > { %p25_p0 = scmp.ge.s32.totalorder %s24_s23, 2  ;;  %p4288_p1 = scmp.ge.s32.totalorder %s4545_s22, 1 }
   0x5   : > { %p207_p2 = scmp.lt.s32.totalorder %s4545_s22, 5 }
   0x6   : > { %s6612_s23 = smov (%p25_p0, %s24_s23), 0  ;;  %s6614_s24 = smov (!%p25_p0, %s27_s24), %s4541_s21 }
   0x7   : > { %p208_p3 = pnand %p4288_p1, %p207_p2  ;;  %p29_p4 = scmp.ge.s32.totalorder %s6614_s24, 2 }
   0x9   : > { %s6616_s24 = smov (%p29_p4, %s6614_s24), 0  ;;  %211 = sbr.rel (%p208_p3) target bundleno = 1361 (0x551), region = 40 }
   0xe   : > { %p242_p5 = scmp.lt.s32.totalorder %s4533_s19, 1  ;;  %p244_p6 = scmp.lt.s32.totalorder %s4529_s18, 1  ;;  %v6556_v0 = vmov 0   ;;  %v6555_v3 = vlaneseq  ;;  %vm981_vm0 = vsmask.f32 3328  ;;  %vm1767_vm3 = vcmask 1042432  }
   0xf   : > { %683 = vmatprep.mubr.bf16.mxu0 %v6556_v0  ;;  %1274 = vmatprep.mubr.bf16.mxu1 %v6556_v0  ;;  %s4548_s8 = smov 127   ;;  %vm982_vm1 = vsmask.f32 7440  ;;  %v4549_v9 = vmov 1983009808   ;;  %vm1768_vm4 = vcmask 1046532  }
  0x10   : > { %s6618_s19 = smov (!%p242_p5, %s4533_s19), 1  ;;  %4503 = vset.pattern.permute.xlu1 %v6556_v0  ;;  %4504 = vset.pattern.permute.xlu0 %v6556_v0  ;;  %v269_v10 = vunpack.c.l.s4 %v4549_v9  ;;  %v4693_v21 = vshrl.u32 %v6555_v3, 7  ;;  %vm4705_vm2 = vmor %vm981_vm0, %vm982_vm1  ;;  %v4550_v60 = vmov 1934713408   ;;  %s4551_s9 = smov 126   ;;  %vm414_vm6 = vcmask 146432  }
  0x11   : > { %s4642_s25 = scalar_select %p244_p6, %s4529_s18, 1  ;;  %vm4765_vm5 = vmor %vm1767_vm3, %vm1768_vm4  ;;  %v285_v61 = vunpack.c.l.s4 %v4550_v60  ;;  %vm418_vm7 = vcmask 293888   ;;  %vm421_vm8 = vcmask 441344   ;;  %vm424_vm9 = vcmask 588800  }
  0x12   : > { %s4290_s26 = sshll.u32 %s6618_s19, 4  ;;  %6567 = vst [vmem:[#allocation2_spill] sm:$0xff] %v4693_v21  ;;  %v270_v25 = vunpack.c.0.s8 %v269_v10  ;;  %s4552_s10 = smov 18   ;;  %vm427_vm10 = vcmask 736256   ;;  %vm430_vm11 = vcmask 883712   ;;  %vm433_vm12 = vcmask 1031168  }
  0x13   : > { %s4289_s27 = sshll.u32 %s4642_s25, 3  ;;  %s4553_s11 = smov 36   ;;  %vm436_vm13 = vcmask 130048   ;;  %vm646_vm14 = vcmask 1041408   ;;  %vm439_vm15 = vcmask 277504   ;;  %vm642_vm0 = vcmask 31744  }
  0x14   : > { %s248_s28 = sadd.s32 %s4290_s26, %s4289_s27  ;;  %v4719_v43 = vsub.s32 %v270_v25, %v4693_v21  ;;  %s4554_s12 = smov 54   ;;  %vm2531_vm1 = vcmask 15360  }
  0x15   : > { %s4291_s29 = sshll.u32 %s248_s28, 2  ;;  %s4555_s13 = smov 72  }
  0x16   : > { %s4653_s7 = scalar_lea.vmem %s6549_s0, %s4291_s29  ;;  %6570 = vst [vmem:[#allocation3_spill] sm:$0xff] %v4719_v43  ;;  %s4556_s14 = smov 90  }
  0x17   : > { %v4656_v1 = vld [vmem:[%s4653_s7 + $0x10] sm:$0xf]  ;;  %v4659_v2 = vld [vmem:[%s4653_s7] sm:$0xf]  ;;  %v4668_v6 = vld [vmem:[%s4653_s7 + $0x18] sm:$0xf] }
  0x18   : > { %459 = vrot.lane.b32.xlu1 %v4656_v1, %s4548_s8  ;;  %451 = vrot.lane.b32.xlu0 %v4659_v2, %s4548_s8  ;;  %v985_v4 = vshrl.u32 %v4659_v2, 16  ;;  %v988_v5 = vshll.u32 %v4659_v2, 16  ;;  %v4671_v7 = vld [vmem:[%s4653_s7 + $0x8] sm:$0xf]  ;;  %v4674_v8 = vld [vmem:[%s4653_s7 + $0xc] sm:$0x3] }
  0x19   : > { %v4677_v11 = vld [vmem:[%s4653_s7 + $0x4] sm:$0x3]  ;;  %v1004_v12 = vshrl.u32 %v4671_v7, 16  ;;  %v1007_v13 = vshll.u32 %v4671_v7, 16  ;;  %v1013_v14 = vshll.u32 %v4674_v8, 16  ;;  %v1042_v19 = vshrl.u32 %v4668_v6, 16 }
  0x1a   : > { %v987_v15 = vrot.slane %v985_v4, 4  ;;  %v4683_v16 = vld [vmem:[%s4653_s7 + $0x1c] sm:$0x3]  ;;  %v990_v17 = vrot.slane %v988_v5, 5  ;;  %v994_v18 = vshll.u32 %v4677_v11, 16  ;;  %v1045_v20 = vshll.u32 %v4668_v6, 16 }
  0x1b   : > { %v1006_v22 = vrot.slane %v1004_v12, 4  ;;  %v1009_v23 = vrot.slane %v1007_v13, 5  ;;  %v1051_v24 = vshll.u32 %v4683_v16, 16  ;;  %v1044_v27 = vrot.slane %v1042_v19, 4  ;;  %v4697_v29 = vld [vmem:[%s4653_s7 + $0x14] sm:$0x3] }
  0x1c   : > { %463 = vrot.lane.b32.xlu1 %v4668_v6, %s4548_s8  ;;  %455 = vrot.lane.b32.xlu0 %v4671_v7, %s4548_s8  ;;  %v991_v26 = vor.u32 %v990_v17, %v987_v15  ;;  %v1047_v28 = vrot.slane %v1045_v20, 5  ;;  %v4699_v31 = vrot.slane %v1013_v14, 5  ;;  %v1023_v32 = vshrl.u32 %v4656_v1, 16  ;;  %s4557_s15 = smov 108   ;;  %s4558_s16 = smov 16  }
  0x1d   : > { %v1010_v30 = vor.u32 %v1009_v23, %v1006_v22  ;;  %v1026_v33 = vshll.u32 %v4656_v1, 16  ;;  %v4709_v35 = vrot.slane %v994_v18, 5  ;;  %v4711_v37 = vrot.slane %v1051_v24, 5  ;;  %s4559_s17 = smov 34   ;;  %s4560_s7 = smov 92  }
  0x1e   : > { %v1048_v36 = vor.u32 %v1047_v28, %v1044_v27  ;;  %v1032_v38 = vshll.u32 %v4697_v29, 16  ;;  %v992_v40 = vrot.slane %v991_v26, 4  ;;  %v1025_v41 = vrot.slane %v1023_v32, 4  ;;  %s4569_s26 = smov 94   ;;  %s4405_s27 = sshll.u32 %s4529_s18, 3 }
  0x1f   : > { %v1011_v39 = vrot.slane %v1010_v30, 4  ;;  %v1028_v42 = vrot.slane %v1026_v33, 5  ;;  %v4366_v54 = vrot.slane %v4671_v7, 9  ;;  %v1777_v55 = vrot.slane %v4674_v8, 5  ;;  %s4406_s28 = sadd.s32 4294967295, %s4405_s27  ;;  %s4570_s18 = smov 48  }
  0x20   : > { %457 = vrot.lane.b32.xlu1 %v4674_v8, %s4548_s8  ;;  %453 = vrot.lane.b32.xlu0 %v4677_v11, %s4548_s8  ;;  %v1049_v44 = vrot.slane %v1048_v36, 4  ;;  %v4726_v47 = vrot.slane %v1032_v38, 5  ;;  %v4744_v50 = vsel %vm4705_vm2, %v992_v40, %v4709_v35  ;;  %v4365_v63 = vrot.slane %v4659_v2, 9  ;;  %s4573_s29 = smov 80   ;;  %s4574_s30 = smov 96  }
  0x21   : > { %v4724_v45 = vsel %vm4705_vm2, %v1011_v39, %v4699_v31  ;;  %v1029_v46 = vor.u32 %v1028_v42, %v1025_v41  ;;  %v4752_v53 = vrot.slane %v4744_v50, %v4719_v43  ;;  %v4780_v4 = vrot.slane %v4659_v2, %v4719_v43 }
  0x22   : > { %v4730_v48 = vrot.slane %v4724_v45, %v4719_v43  ;;  %v4735_v49 = vsel %vm4705_vm2, %v1049_v44, %v4711_v37  ;;  %v4784_v5 = vrot.slane %v4656_v1, %v4719_v43  ;;  %v4788_v9 = vrot.slane %v4671_v7, %v4719_v43 }
  0x23   : > { %v4748_v51 = vrot.slane %v4735_v49, %v4719_v43  ;;  %v1030_v52 = vrot.slane %v1029_v46, 4  ;;  %v4802_v13 = vrot.slane %v4668_v6, %v4719_v43  ;;  %v1772_v14 = vrot.slane %v4677_v11, 5 }
  0x24   : > { %465 = vrot.lane.b32.xlu1 %v4683_v16, %s4548_s8  ;;  %461 = vrot.lane.b32.xlu0 %v4697_v29, %s4548_s8  ;;  %v1787_v15 = vrot.slane %v4683_v16, 5  ;;  %v4367_v17 = vrot.slane %v4656_v1, 9  ;;  %v1782_v19 = vrot.slane %v4697_v29, 5  ;;  %v286_v20 = vunpack.c.0.s8 %v285_v61 }
  0x25   : > { %v1110_v56 = vcombine.low %v4730_v48, %v4748_v51  ;;  %v1111_v57 = vcombine.high %v4730_v48, %v4748_v51  ;;  %v4763_v58 = vsel %vm4705_vm2, %v1030_v52, %v4726_v47  ;;  %v4821_v22 = vsel %vm4765_vm5, %v4365_v63, %v1772_v14 }
  0x26   : > { %v4771_v62 = vrot.slane %v4763_v58, %v4719_v43  ;;  %v4831_v24 = vrot.slane %v4821_v22, %v4719_v43  ;;  %v282_v26 = vcombine.low %v4780_v4, %v4784_v5  ;;  %v314_v27 = vcombine.low %v4788_v9, %v4802_v13 }
  0x27   : > { %v283_v32 = vcombine.high %v4780_v4, %v4784_v5  ;;  %v4862_v33 = vsub.s32 %v286_v20, %v4693_v21  ;;  %v315_v39 = vcombine.high %v4788_v9, %v4802_v13  ;;  %v332_v44 = vcombine.low %v4677_v11, %v4697_v29 }
  0x28   : > { %744 = vrot.lane.b32.xlu1 %v4671_v7, %s4551_s9  ;;  %740 = vrot.lane.b32.xlu0 %v4659_v2, %s4551_s9  ;;  %v1076_v10 = vcombine.low %v4752_v53, %v4771_v62  ;;  %v1077_v12 = vcombine.high %v4752_v53, %v4771_v62  ;;  %v4798_v2 = vsel %vm4765_vm5, %v4366_v54, %v1777_v55  ;;  %v4368_v7 = vrot.slane %v4668_v6, 9 }
  0x29   : > { %v4810_v18 = vrot.slane %v4798_v2, %v4719_v43  ;;  %v297_v38 = vrot.slane %v283_v32, %v4862_v33  ;;  %v329_v40 = vrot.slane %v315_v39, %v4862_v33  ;;  %v1017_v60 = vshrl.u32 %v4674_v8, 16 }
  0x2a   : > { %v4827_v23 = vsel %vm4765_vm5, %v4368_v7, %v1787_v15  ;;  %v339_v61 = vrot.slane %v332_v44, %v4862_v33  ;;  %v998_v63 = vshrl.u32 %v4677_v11, 16  ;;  %v340_v32 = vcombine.low %v4674_v8, %v4683_v16 }
  0x2b   : > { %v363_v41 = vshrl.u32 %v297_v38, 16  ;;  %v299_v42 = vcombine.high %v297_v38, %v6556_v0  ;;  %v4879_v46 = vpack.i.b16 %v329_v40, %v297_v38  ;;  %v364_v52 = vshrl.u32 %v329_v40, 16 }
  0x2c   : > { %752 = vrot.lane.b32.xlu1 %v4668_v6, %s4551_s9  ;;  %748 = vrot.lane.b32.xlu0 %v4656_v1, %s4551_s9  ;;  %v4835_v1 = vrot.slane %v4827_v23, %v4719_v43  ;;  %v4841_v6 = vsel %vm4765_vm5, %v4367_v17, %v1782_v19  ;;  %v331_v54 = vcombine.high %v329_v40, %v6556_v0  ;;  %v375_v40 = vshrl.u32 %v339_v61, 16 }
  0x2d   : > { %v4845_v25 = vrot.slane %v4841_v6, %v4719_v43  ;;  %v369_v59 = vshrl.u32 %v299_v42, 16  ;;  %v4889_v7 = vpack.i.b16 %v364_v52, %v363_v41  ;;  %v347_v39 = vrot.slane %v340_v32, %v4862_v33 }
  0x2e   : > { %v1841_v30 = vcombine.high %v4810_v18, %v4835_v1  ;;  %v4891_v17 = vpack.i.b16 %v331_v54, %v299_v42  ;;  %v370_v20 = vshrl.u32 %v331_v54, 16  ;;  %v1019_v44 = vrot.slane %v1017_v60, 4 }
  0x2f   : > { %v1807_v36 = vcombine.high %v4831_v24, %v4845_v25  ;;  %v1000_v41 = vrot.slane %v998_v63, 4  ;;  %v1055_v42 = vshrl.u32 %v4683_v16, 16  ;;  %v1036_v52 = vshrl.u32 %v4697_v29, 16 }
  0x30   : > { %746 = vrot.lane.b32.xlu1 %v4674_v8, %s4551_s9  ;;  %742 = vrot.lane.b32.xlu0 %v4677_v11, %s4551_s9  ;;  %v4895_v38 = vpack.i.b16 %v370_v20, %v369_v59  ;;  %v376_v54 = vshrl.u32 %v347_v39, 16  ;;  %v4904_v3 = vpack.i.b16 %v347_v39, %v339_v61  ;;  %v1020_v20 = vor.u32 %v1019_v44, %v4699_v31 }
  0x31   : > { %v1001_v60 = vor.u32 %v1000_v41, %v4709_v35  ;;  %v1057_v63 = vrot.slane %v1055_v42, 4  ;;  %v1038_v32 = vrot.slane %v1036_v52, 4  ;;  %v1125_v61 = vrot.slane %v1111_v57, %v4862_v33 }
  0x32   : > { %v4906_v59 = vpack.i.b16 %v376_v54, %v375_v40  ;;  %v1091_v39 = vrot.slane %v1077_v12, %v4862_v33  ;;  %v1021_v31 = vrot.slane %v1020_v20, 4  ;;  %v4992_v8 = vrot.slane %v282_v26, %v4862_v33 }
  0x33   : > { %v1002_v35 = vrot.slane %v1001_v60, 4  ;;  %v1164_v41 = vshrl.u32 %v1125_v61, 16  ;;  %v4998_v11 = vrot.slane %v314_v27, %v4862_v33  ;;  %v4297_v26 = vcombine.low %v4879_v46, %v4879_v46 }
  0x34   : > { %754 = vrot.lane.b32.xlu1 %v4683_v16, %s4551_s9  ;;  %750 = vrot.lane.b32.xlu0 %v4697_v29, %s4551_s9  ;;  %v4928_v40 = vpack.i.b16 %v1125_v61, %v1091_v39  ;;  %v1163_v44 = vshrl.u32 %v1091_v39, 16  ;;  %v351_v16 = vshrl.u32 %v4992_v8, 16  ;;  %v1855_v27 = vrot.slane %v1841_v30, %v4862_v33 }
  0x35   : > { %v352_v29 = vshrl.u32 %v4998_v11, 16  ;;  %v330_v4 = vcombine.high %v4998_v11, %v6556_v0  ;;  %v4299_v46 = vcombine.low %v4891_v17, %v4891_v17  ;;  %v4302_v17 = vcombine.low %v4906_v59, %v4906_v59 }
  0x36   : > { %v1857_v30 = vcombine.high %v1855_v27, %v6556_v0 }
  0x37   : > { %v353_v5 = vpack.i.b16 %v352_v29, %v351_v16 }
  0x38   : > { %1289 = vrot.lane.b32.xlu1 %v4724_v45, %s4548_s8  ;;  %1285 = vrot.lane.b32.xlu0 %v4744_v50, %s4548_s8 }
  0x3c   : > { %1297 = vrot.lane.b32.xlu1 %v4735_v49, %s4548_s8  ;;  %1293 = vrot.lane.b32.xlu0 %v4763_v58, %s4548_s8 }
  0x40   : > { %1530 = vrot.lane.b32.xlu1 %v4724_v45, %s4551_s9  ;;  %1526 = vrot.lane.b32.xlu0 %v4744_v50, %s4551_s9  ;;  %v1058_v45 = vor.u32 %v1057_v63, %v4711_v37  ;;  %v1039_v50 = vor.u32 %v1038_v32, %v4726_v47  ;;  %v1093_v37 = vcombine.high %v1091_v39, %v6556_v0 }
  0x41   : > { %v1127_v47 = vcombine.high %v1125_v61, %v6556_v0 }
  0x42   : > { %v1059_v57 = vrot.slane %v1058_v45, 4  ;;  %v1040_v12 = vrot.slane %v1039_v50, 4  ;;  %v1169_v39 = vshrl.u32 %v1093_v37, 16  ;;  %v4970_v45 = vrot.slane %v1777_v55, 4 }
  0x43   : > { %v4974_v50 = vrot.slane %v1772_v14, 4  ;;  %v298_v55 = vcombine.high %v4992_v8, %v6556_v0  ;;  %v358_v14 = vshrl.u32 %v330_v4, 16 }
  0x44   : > { %1538 = vrot.lane.b32.xlu1 %v4735_v49, %s4551_s9  ;;  %1534 = vrot.lane.b32.xlu0 %v4763_v58, %s4551_s9  ;;  %v4932_v49 = vpack.i.b16 %v1164_v41, %v1163_v44  ;;  %v4938_v58 = vpack.i.b16 %v1127_v47, %v1093_v37  ;;  %v1130_v42 = vcombine.low %v1002_v35, %v1040_v12 }
  0x45   : > { %v1140_v52 = vcombine.low %v1021_v31, %v1059_v57  ;;  %v356_v9 = vpack.i.b16 %v330_v4, %v298_v55  ;;  %v357_v13 = vshrl.u32 %v298_v55, 16 }
  0x46   : > { %v1137_v54 = vrot.slane %v1130_v42, %v4862_v33  ;;  %v1894_v42 = vshrl.u32 %v1855_v27, 16 }
  0x47   : > { %v1147_v20 = vrot.slane %v1140_v52, %v4862_v33 }
  0x48   : > { %1291 = vrot.lane.b32.xlu1 %v1021_v31, %s4548_s8  ;;  %1287 = vrot.lane.b32.xlu0 %v1002_v35, %s4548_s8  ;;  %v1175_v63 = vshrl.u32 %v1137_v54, 16 }
  0x49   : > { %v4946_v60 = vpack.i.b16 %v1147_v20, %v1137_v54  ;;  %v1176_v32 = vshrl.u32 %v1147_v20, 16  ;;  %v1900_v54 = vshrl.u32 %v1857_v30, 16 }
  0x4b   : > { %v4948_v61 = vpack.i.b16 %v1176_v32, %v1175_v63 }
  0x4c   : > { %1299 = vrot.lane.b32.xlu1 %v1059_v57, %s4548_s8  ;;  %1295 = vrot.lane.b32.xlu0 %v1040_v12, %s4548_s8 }
  0x50   : > { %1532 = vrot.lane.b32.xlu1 %v1021_v31, %s4551_s9  ;;  %1528 = vrot.lane.b32.xlu0 %v1002_v35, %s4551_s9  ;;  %v1170_v31 = vshrl.u32 %v1127_v47, 16 }
  0x52   : > { %v4954_v35 = vpack.i.b16 %v1170_v31, %v1169_v39 }
  0x54   : > { %1540 = vrot.lane.b32.xlu1 %v1059_v57, %s4551_s9  ;;  %1536 = vrot.lane.b32.xlu0 %v1040_v12, %s4551_s9  ;;  %v1821_v57 = vrot.slane %v1807_v36, %v4862_v33  ;;  %v4298_v12 = vcombine.low %v4889_v7, %v4889_v7  ;;  %v4300_v36 = vcombine.low %v4895_v38, %v4895_v38 }
  0x55   : > { %v4301_v7 = vcombine.low %v4904_v3, %v4904_v3 }
  0x56   : > { %v1823_v44 = vcombine.high %v1821_v57, %v6556_v0  ;;  %v5046_v37 = vpack.i.b16 %v1855_v27, %v1821_v57  ;;  %v1893_v47 = vshrl.u32 %v1821_v57, 16 }
  0x58   : > { %2019 = vrot.lane.b32.xlu1 %v4798_v2, %s4548_s8  ;;  %2015 = vrot.lane.b32.xlu0 %v4821_v22, %s4548_s8  ;;  %v5038_v41 = vpack.i.b16 %v1857_v30, %v1823_v44  ;;  %v5052_v52 = vpack.i.b16 %v1894_v42, %v1893_v47  ;;  %v1899_v38 = vshrl.u32 %v1823_v44, 16 }
  0x5a   : > { %v5055_v63 = vpack.i.b16 %v1900_v54, %v1899_v38 }
  0x5c   : > { %2027 = vrot.lane.b32.xlu1 %v4827_v23, %s4548_s8  ;;  %2023 = vrot.lane.b32.xlu0 %v4841_v6, %s4548_s8 }
  0x60   : > { %2260 = vrot.lane.b32.xlu1 %v4798_v2, %s4551_s9  ;;  %2256 = vrot.lane.b32.xlu0 %v4821_v22, %s4551_s9  ;;  %v4982_v2 = vrot.slane %v1787_v15, 4  ;;  %v4986_v22 = vrot.slane %v1782_v19, 4  ;;  %v4294_v15 = vcombine.low %v353_v5, %v353_v5  ;;  %v4295_v19 = vcombine.low %v356_v9, %v356_v9 }
  0x64   : > { %2268 = vrot.lane.b32.xlu1 %v4827_v23, %s4551_s9  ;;  %2264 = vrot.lane.b32.xlu0 %v4841_v6, %s4551_s9  ;;  %v359_v23 = vpack.i.b16 %v358_v14, %v357_v13 }
  0x66   : > { %v4296_v6 = vcombine.low %v359_v23, %v359_v23 }
  0x68   : > { %2021 = vrot.lane.b32.xlu1 %v4970_v45, %s4548_s8  ;;  %2017 = vrot.lane.b32.xlu0 %v4974_v50, %s4548_s8 }
  0x6c   : > { %2029 = vrot.lane.b32.xlu1 %v4982_v2, %s4548_s8  ;;  %2025 = vrot.lane.b32.xlu0 %v4986_v22, %s4548_s8 }
  0x70   : > { %2262 = vrot.lane.b32.xlu1 %v4970_v45, %s4551_s9  ;;  %2258 = vrot.lane.b32.xlu0 %v4974_v50, %s4551_s9 }
  0x74   : > { %2270 = vrot.lane.b32.xlu1 %v4982_v2, %s4551_s9  ;;  %2266 = vrot.lane.b32.xlu0 %v4986_v22, %s4551_s9 }
  0x78   : > { %380 = vrot.lane.b32.xlu1 %v4294_v15, %s4552_s10  ;;  %384 = vrot.lane.b32.xlu0 %v4295_v19, %s4553_s11 }
  0x7c   : > { %388 = vrot.lane.b32.xlu1 %v4296_v6, %s4554_s12  ;;  %392 = vrot.lane.b32.xlu0 %v4297_v26, %s4555_s13 }
  0x80   : > { %396 = vrot.lane.b32.xlu1 %v4298_v12, %s4556_s14  ;;  %400 = vrot.lane.b32.xlu0 %v4299_v46, %s4557_s15 }
  0x84   : > { %404 = vrot.lane.b32.xlu1 %v4300_v36, %s4551_s9  ;;  %408 = vrot.lane.b32.xlu0 %v4301_v7, %s4558_s16 }
  0x88   : > { %412 = vrot.lane.b32.xlu1 %v4302_v17, %s4559_s17 }
  0x8a   : > { %v460_v3 = vpop.permute.xlu1 %459  ;;  %v452_v20 = vpop.permute.xlu0 %451 }
  0x8b   : > { %v482_v32 = vrot.slane %v460_v3, %v4719_v43  ;;  %v474_v59 = vrot.slane %v452_v20, %v4719_v43 }
  0x8d   : > { %v483_v55 = vcombine.low %v474_v59, %v482_v32  ;;  %v484_v26 = vcombine.high %v474_v59, %v482_v32 }
  0x8e   : > { %v464_v39 = vpop.permute.xlu1 %463  ;;  %v456_v31 = vpop.permute.xlu0 %455 }
  0x8f   : > { %v516_v16 = vrot.slane %v464_v39, %v4719_v43  ;;  %v508_v29 = vrot.slane %v456_v31, %v4719_v43  ;;  %v5065_v14 = vrot.slane %v483_v55, %v4862_v33  ;;  %v498_v17 = vrot.slane %v484_v26, %v4862_v33 }
  0x91   : > { %v517_v4 = vcombine.low %v508_v29, %v516_v16  ;;  %v518_v15 = vcombine.high %v508_v29, %v516_v16  ;;  %v558_v54 = vshrl.u32 %v5065_v14, 16 }
  0x92   : > { %v458_v5 = vpop.permute.xlu1 %457  ;;  %v454_v9 = vpop.permute.xlu0 %453 }
  0x93   : > { %v5062_v13 = vrot.slane %v517_v4, %v4862_v33  ;;  %v532_v12 = vrot.slane %v518_v15, %v4862_v33  ;;  %v570_v15 = vshrl.u32 %v498_v17, 16 }
  0x95   : > { %v559_v7 = vshrl.u32 %v5062_v13, 16  ;;  %v569_v20 = vpack.i.b16 %v532_v12, %v498_v17  ;;  %v571_v29 = vshrl.u32 %v532_v12, 16 }
  0x96   : > { %v466_v19 = vpop.permute.xlu1 %465  ;;  %v462_v23 = vpop.permute.xlu0 %461 }
  0x97   : > { %v547_v27 = vcombine.low %v458_v5, %v466_v19  ;;  %v537_v57 = vcombine.low %v454_v9, %v462_v23  ;;  %v560_v16 = vpack.i.b16 %v559_v7, %v558_v54 }
  0x99   : > { %v554_v46 = vrot.slane %v547_v27, %v4862_v33  ;;  %v544_v44 = vrot.slane %v537_v57, %v4862_v33  ;;  %v4306_v57 = vcombine.low %v569_v20, %v569_v20 }
  0x9a   : > { %v745_v30 = vpop.permute.xlu1 %744  ;;  %v741_v36 = vpop.permute.xlu0 %740 }
  0x9b   : > { %v583_v47 = vshrl.u32 %v554_v46, 16  ;;  %v582_v42 = vshrl.u32 %v544_v44, 16  ;;  %v581_v38 = vpack.i.b16 %v554_v46, %v544_v44  ;;  %v797_v32 = vrot.slane %v745_v30, %v4719_v43 }
  0x9c   : > { %v763_v55 = vrot.slane %v741_v36, %v4719_v43  ;;  %v4303_v46 = vcombine.low %v560_v16, %v560_v16  ;;  %v572_v44 = vpack.i.b16 %v571_v29, %v570_v15  ;;  %v533_v30 = vcombine.high %v5062_v13, %v6556_v0 }
  0x9d   : > { %v584_v3 = vpack.i.b16 %v583_v47, %v582_v42  ;;  %v4310_v31 = vcombine.low %v581_v38, %v581_v38  ;;  %v500_v15 = vcombine.high %v498_v17, %v6556_v0 }
  0x9e   : > { %v753_v59 = vpop.permute.xlu1 %752  ;;  %v749_v39 = vpop.permute.xlu0 %748 }
  0x9f   : > { %v805_v4 = vrot.slane %v753_v59, %v4719_v43  ;;  %v771_v5 = vrot.slane %v749_v39, %v4719_v43  ;;  %v4311_v9 = vcombine.low %v584_v3, %v584_v3  ;;  %615 = vrot.lane.b32.xlu1 %v4310_v31, %s4558_s16  ;;  %v499_v3 = vcombine.high %v5065_v14, %v6556_v0 }
  0xa0   : > { %v534_v31 = vcombine.high %v532_v12, %v6556_v0 }
  0xa1   : > { %v806_v19 = vcombine.low %v797_v32, %v805_v4  ;;  %v807_v23 = vcombine.high %v797_v32, %v805_v4  ;;  %v772_v26 = vcombine.low %v763_v55, %v771_v5  ;;  %v773_v27 = vcombine.high %v763_v55, %v771_v5  ;;  %619 = vrot.lane.b32.xlu0 %v4311_v9, %s4559_s17 }
  0xa2   : > { %v747_v36 = vpop.permute.xlu1 %746  ;;  %v743_v7 = vpop.permute.xlu0 %742  ;;  %v563_v39 = vpack.i.b16 %v533_v30, %v499_v3  ;;  %v4307_v4 = vcombine.low %v572_v44, %v572_v44  ;;  %v565_v9 = vshrl.u32 %v533_v30, 16  ;;  %v577_v30 = vshrl.u32 %v534_v31, 16 }
  0xa3   : > { %v5084_v47 = vrot.slane %v806_v19, %v4862_v33  ;;  %v5087_v42 = vrot.slane %v807_v23, %v4862_v33  ;;  %v5090_v38 = vrot.slane %v772_v26, %v4862_v33  ;;  %v5093_v54 = vrot.slane %v773_v27, %v4862_v33  ;;  %599 = vrot.lane.b32.xlu1 %v4306_v57, %s4555_s13 }
  0xa4   : > { %v564_v19 = vshrl.u32 %v499_v3, 16  ;;  %v575_v23 = vpack.i.b16 %v534_v31, %v500_v15 }
  0xa5   : > { %587 = vrot.lane.b32.xlu0 %v4303_v46, %s4552_s10  ;;  %v858_v20 = vpack.i.b16 %v5087_v42, %v5093_v54  ;;  %v847_v32 = vshrl.u32 %v5090_v38, 16  ;;  %v848_v59 = vshrl.u32 %v5084_v47, 16  ;;  %v788_v26 = vcombine.high %v5090_v38, %v6556_v0 }
  0xa6   : > { %v755_v16 = vpop.permute.xlu1 %754  ;;  %v751_v29 = vpop.permute.xlu0 %750  ;;  %v822_v12 = vcombine.high %v5084_v47, %v6556_v0  ;;  %v4304_v46 = vcombine.low %v563_v39, %v563_v39  ;;  %v5113_v17 = vcombine.high %v5093_v54, %v6556_v0  ;;  %v5117_v3 = vcombine.high %v5087_v42, %v6556_v0 }
  0xa7   : > { %v4320_v55 = vcombine.low %v858_v20, %v858_v20  ;;  %v849_v5 = vpack.i.b16 %v848_v59, %v847_v32  ;;  %v566_v20 = vpack.i.b16 %v565_v9, %v564_v19  ;;  %v836_v32 = vcombine.low %v747_v36, %v755_v16 }
  0xa8   : > { %v826_v59 = vcombine.low %v743_v7, %v751_v29  ;;  %v854_v31 = vshrl.u32 %v822_v12, 16  ;;  %v4308_v19 = vcombine.low %v575_v23, %v575_v23  ;;  %v852_v34 = vpack.i.b16 %v822_v12, %v788_v26 }
  0xa9   : > { %888 = vrot.lane.b32.xlu1 %v4320_v55, %s4555_s13  ;;  %603 = vrot.lane.b32.xlu0 %v4307_v4, %s4556_s14  ;;  %v4317_v44 = vcombine.low %v849_v5, %v849_v5  ;;  %v576_v55 = vshrl.u32 %v500_v15, 16  ;;  %v853_v4 = vshrl.u32 %v788_v26, 16  ;;  %v4305_v6 = vcombine.low %v566_v20, %v566_v20 }
  0xaa   : > { %v1290_v27 = vpop.permute.xlu1 %1289  ;;  %v1286_v57 = vpop.permute.xlu0 %1285  ;;  %v5133_v36 = vrot.slane %v1076_v10, %v4862_v33  ;;  %v843_v7 = vrot.slane %v836_v32, %v4862_v33  ;;  %v833_v16 = vrot.slane %v826_v59, %v4862_v33  ;;  %v864_v29 = vpack.i.b16 %v5117_v3, %v5113_v17 }
  0xab   : > { %v578_v28 = vpack.i.b16 %v577_v30, %v576_v55  ;;  %v855_v48 = vpack.i.b16 %v854_v31, %v853_v4  ;;  %v4318_v15 = vcombine.low %v852_v34, %v852_v34  ;;  %v859_v53 = vshrl.u32 %v5093_v54, 16 }
  0xac   : > { %v860_v62 = vshrl.u32 %v5087_v42, 16  ;;  %v1151_v10 = vshrl.u32 %v5133_v36, 16  ;;  %v1092_v26 = vcombine.high %v5133_v36, %v6556_v0  ;;  %v4322_v12 = vcombine.low %v864_v29, %v864_v29 }
  0xad   : > { %591 = vrot.lane.b32.xlu1 %v4304_v46, %s4553_s11  ;;  %876 = vrot.lane.b32.xlu0 %v4317_v44, %s4552_s10  ;;  %v5127_v46 = vrot.slane %v1110_v56, %v4862_v33  ;;  %v4309_v23 = vcombine.low %v578_v28, %v578_v28  ;;  %v870_v44 = vpack.i.b16 %v843_v7, %v833_v16  ;;  %v865_v20 = vshrl.u32 %v5113_v17, 16 }
  0xae   : > { %v1298_v5 = vpop.permute.xlu1 %1297  ;;  %v1294_v9 = vpop.permute.xlu0 %1293  ;;  %v5152_v34 = vrot.slane %v1290_v27, %v4719_v43  ;;  %v5155_v42 = vrot.slane %v1286_v57, %v4719_v43  ;;  %v4319_v54 = vcombine.low %v855_v48, %v855_v48  ;;  %v861_v4 = vpack.i.b16 %v860_v62, %v859_v53 }
  0xaf   : > { %v1126_v28 = vcombine.high %v5127_v46, %v6556_v0  ;;  %v5159_v59 = vrot.slane %v1298_v5, %v4719_v43  ;;  %v5162_v55 = vrot.slane %v1294_v9, %v4719_v43  ;;  %v866_v31 = vshrl.u32 %v5117_v3, 16 }
  0xb0   : > { %v1157_v27 = vshrl.u32 %v1092_v26, 16  ;;  %v872_v29 = vshrl.u32 %v843_v7, 16  ;;  %v4324_v57 = vcombine.low %v870_v44, %v870_v44  ;;  %v4321_v53 = vcombine.low %v861_v4, %v861_v4 }
  0xb1   : > { %607 = vrot.lane.b32.xlu1 %v4308_v19, %s4557_s15  ;;  %595 = vrot.lane.b32.xlu0 %v4305_v6, %s4554_s12  ;;  %v1152_v6 = vshrl.u32 %v5127_v46, 16  ;;  %v1158_v17 = vshrl.u32 %v1126_v28, 16  ;;  %v867_v62 = vpack.i.b16 %v866_v31, %v865_v20 }
  0xb2   : > { %v1531_v51 = vpop.permute.xlu1 %1530  ;;  %v1527_v56 = vpop.permute.xlu0 %1526 }
  0xb3   : > { %v1153_v19 = vpack.i.b16 %v1152_v6, %v1151_v10  ;;  %v5168_v48 = vrot.slane %v1531_v51, %v4719_v43  ;;  %v5171_v5 = vrot.slane %v1527_v56, %v4719_v43  ;;  %v1317_v51 = vcombine.low %v5155_v42, %v5162_v55 }
  0xb4   : > { %v1159_v10 = vpack.i.b16 %v1158_v17, %v1157_v27 }
  0xb5   : > { %880 = vrot.lane.b32.xlu1 %v4318_v15, %s4553_s11  ;;  %611 = vrot.lane.b32.xlu0 %v4309_v23, %s4551_s9  ;;  %v871_v15 = vshrl.u32 %v833_v16, 16  ;;  %v1351_v23 = vcombine.low %v5152_v34, %v5159_v59  ;;  %v4329_v56 = vcombine.low %v1153_v19, %v1153_v19  ;;  %v5201_v20 = vrot.slane %v1317_v51, %v4862_v33 }
  0xb6   : > { %v1539_v30 = vpop.permute.xlu1 %1538  ;;  %v1535_v32 = vpop.permute.xlu0 %1534  ;;  %v4331_v31 = vcombine.low %v1159_v10, %v1159_v10  ;;  %v1156_v19 = vpack.i.b16 %v1126_v28, %v1092_v26  ;;  %v4332_v26 = vcombine.low %v4928_v40, %v4928_v40  ;;  %v4333_v40 = vcombine.low %v4932_v49, %v4932_v49 }
  0xb7   : > { %v5174_v9 = vrot.slane %v1539_v30, %v4719_v43  ;;  %v5177_v3 = vrot.slane %v1535_v32, %v4719_v43  ;;  %v5198_v30 = vrot.slane %v1351_v23, %v4862_v33  ;;  %6573 = vst [vmem:[#allocation4_spill] sm:$0xff] %v5201_v20  ;;  %v4323_v32 = vcombine.low %v867_v62, %v867_v62 }
  0xb8   : > { %v873_v4 = vpack.i.b16 %v872_v29, %v871_v15  ;;  %v4330_v28 = vcombine.low %v1156_v19, %v1156_v19 }
  0xb9   : > { %896 = vrot.lane.b32.xlu1 %v4322_v12, %s4557_s15  ;;  %884 = vrot.lane.b32.xlu0 %v4319_v54, %s4554_s12  ;;  %v1592_v6 = vcombine.low %v5168_v48, %v5174_v9  ;;  %v1558_v12 = vcombine.low %v5171_v5, %v5177_v3  ;;  %v1393_v29 = vshrl.u32 %v5198_v30, 16 }
  0xba   : > { %v5179_v7 = vpop.permute.xlu1 %1291  ;;  %v5181_v16 = vpop.permute.xlu0 %1287  ;;  %v4325_v51 = vcombine.low %v873_v4, %v873_v4  ;;  %v1352_v4 = vcombine.high %v5152_v34, %v5159_v59 }
  0xbb   : > { %v5206_v27 = vrot.slane %v1592_v6, %v4862_v33 }
  0xbc   : > { %v1366_v59 = vrot.slane %v1352_v4, %v4862_v33 }
  0xbd   : > { %904 = vrot.lane.b32.xlu1 %v4324_v57, %s4558_s16  ;;  %892 = vrot.lane.b32.xlu0 %v4321_v53, %s4556_s14  ;;  %6574 = vst [vmem:[#allocation5_spill] sm:$0xff] %v5206_v27  ;;  %v5209_v57 = vrot.slane %v1558_v12, %v4862_v33  ;;  %v1392_v53 = vshrl.u32 %v5201_v20, 16  ;;  %v1333_v12 = vcombine.high %v5201_v20, %v6556_v0 }
  0xbe   : > { %v5193_v44 = vpop.permute.xlu1 %1299  ;;  %v5195_v54 = vpop.permute.xlu0 %1295 }
  0xbf   : > { %6575 = vst [vmem:[#allocation6_spill] sm:$0xff] %v5209_v57  ;;  %v1394_v6 = vpack.i.b16 %v1393_v29, %v1392_v53  ;;  %v1398_v10 = vshrl.u32 %v1333_v12, 16 }
  0xc1   : > { %1180 = vrot.lane.b32.xlu1 %v4329_v56, %s4552_s10  ;;  %900 = vrot.lane.b32.xlu0 %v4323_v32, %s4551_s9  ;;  %v1367_v32 = vcombine.high %v5198_v30, %v6556_v0  ;;  %v4341_v53 = vcombine.low %v1394_v6, %v1394_v6 }
  0xc2   : > { %v5211_v17 = vpop.permute.xlu1 %1532  ;;  %v5213_v23 = vpop.permute.xlu0 %1528 }
  0xc3   : > { %v1397_v29 = vpack.i.b16 %v1367_v32, %v1333_v12  ;;  %v1399_v15 = vshrl.u32 %v1367_v32, 16 }
  0xc5   : > { %1188 = vrot.lane.b32.xlu1 %v4331_v31, %s4554_s12  ;;  %908 = vrot.lane.b32.xlu0 %v4325_v51, %s4559_s17  ;;  %v1318_v31 = vcombine.high %v5155_v42, %v5162_v55  ;;  %v4342_v42 = vcombine.low %v1397_v29, %v1397_v29  ;;  %v1400_v55 = vpack.i.b16 %v1399_v15, %v1398_v10 }
  0xc6   : > { %v5223_v62 = vpop.permute.xlu1 %1540  ;;  %v5225_v56 = vpop.permute.xlu0 %1536 }
  0xc7   : > { %v1332_v49 = vrot.slane %v1318_v31, %v4862_v33  ;;  %v1381_v31 = vcombine.low %v5179_v7, %v5193_v44  ;;  %v4337_v7 = vcombine.low %v4948_v61, %v4948_v61  ;;  %v1633_v61 = vshrl.u32 %v5209_v57, 16 }
  0xc9   : > { %1192 = vrot.lane.b32.xlu1 %v4332_v26, %s4555_s13  ;;  %1184 = vrot.lane.b32.xlu0 %v4330_v28, %s4553_s11  ;;  %v4334_v26 = vcombine.low %v4938_v58, %v4938_v58  ;;  %v4336_v58 = vcombine.low %v4946_v60, %v4946_v60  ;;  %v1334_v15 = vcombine.high %v1332_v49, %v6556_v0 }
  0xca   : > { %v2020_v19 = vpop.permute.xlu1 %2019  ;;  %v2016_v51 = vpop.permute.xlu0 %2015 }
  0xcb   : > { %v5248_v6 = vrot.slane %v2020_v19, %v4719_v43  ;;  %v5251_v12 = vrot.slane %v2016_v51, %v4719_v43  ;;  %v1371_v19 = vcombine.low %v5181_v16, %v5195_v54  ;;  %v4343_v51 = vcombine.low %v1400_v55, %v1400_v55 }
  0xcc   : > { %v4335_v16 = vcombine.low %v4954_v35, %v4954_v35  ;;  %v1388_v54 = vrot.slane %v1381_v31, %v4862_v33  ;;  %v1403_v55 = vpack.i.b16 %v1366_v59, %v1332_v49  ;;  %v1410_v21 = vshrl.u32 %v1334_v15, 16 }
  0xcd   : > { %1196 = vrot.lane.b32.xlu1 %v4333_v40, %s4556_s14  ;;  %1421 = vrot.lane.b32.xlu0 %v4341_v53, %s4552_s10  ;;  %v1368_v53 = vcombine.high %v1366_v59, %v6556_v0  ;;  %v1634_v35 = vshrl.u32 %v5206_v27, 16 }
  0xce   : > { %v2028_v28 = vpop.permute.xlu1 %2027  ;;  %v2024_v34 = vpop.permute.xlu0 %2023 }
  0xcf   : > { %v5254_v32 = vrot.slane %v2028_v28, %v4719_v43  ;;  %v5257_v40 = vrot.slane %v2024_v34, %v4719_v43  ;;  %v1405_v28 = vshrl.u32 %v1366_v59, 16  ;;  %v1378_v34 = vrot.slane %v1371_v19, %v4862_v33 }
  0xd0   : > { %v1411_v31 = vshrl.u32 %v1368_v53, 16  ;;  %v6576_v19 = vmov 0  }
  0xd1   : > { %1200 = vrot.lane.b32.xlu1 %v4334_v26, %s4557_s15  ;;  %1425 = vrot.lane.b32.xlu0 %v4342_v42, %s4553_s11  ;;  %v2081_v29 = vcombine.low %v5248_v6, %v5254_v32  ;;  %v1404_v26 = vshrl.u32 %v1332_v49, 16  ;;  %v2047_v60 = vcombine.low %v5251_v12, %v5257_v40  ;;  %v1409_v42 = vpack.i.b16 %v1368_v53, %v1334_v15 }
  0xd2   : > { %v2261_v10 = vpop.permute.xlu1 %2260  ;;  %v2257_v4 = vpop.permute.xlu0 %2256  ;;  %v1574_v49 = vcombine.high %v5209_v57, %v6576_v19  ;;  %v1608_v53 = vcombine.high %v5206_v27, %v6576_v19  ;;  %v1416_v27 = vshrl.u32 %v1378_v34, 16 }
  0xd3   : > { %v5282_v0 = vrot.slane %v2081_v29, %v4862_v33  ;;  %v5294_v59 = vrot.slane %v2261_v10, %v4719_v43  ;;  %v5297_v29 = vrot.slane %v2257_v4, %v4719_v43 }
  0xd4   : > { %v1639_v57 = vshrl.u32 %v1574_v49, 16  ;;  %v1640_v20 = vshrl.u32 %v1608_v53, 16 }
  0xd5   : > { %1208 = vrot.lane.b32.xlu1 %v4336_v58, %s4558_s16  ;;  %1429 = vrot.lane.b32.xlu0 %v4343_v51, %s4554_s12  ;;  %v1406_v58 = vpack.i.b16 %v1405_v28, %v1404_v26  ;;  %v5285_v51 = vrot.slane %v2047_v60, %v4862_v33  ;;  %v4346_v28 = vcombine.low %v1409_v42, %v1409_v42 }
  0xd6   : > { %v2269_v44 = vpop.permute.xlu1 %2268  ;;  %v2265_v39 = vpop.permute.xlu0 %2264  ;;  %v4344_v60 = vcombine.low %v1403_v55, %v1403_v55  ;;  %v1635_v42 = vpack.i.b16 %v1634_v35, %v1633_v61  ;;  %v1412_v55 = vpack.i.b16 %v1411_v31, %v1410_v21  ;;  %v6578_v21 = vcombine.low %v4831_v24, %v4845_v25 }
  0xd7   : > { %v5300_v15 = vrot.slane %v2269_v44, %v4719_v43  ;;  %v5303_v26 = vrot.slane %v2265_v39, %v4719_v43  ;;  %v1559_v44 = vcombine.high %v5171_v5, %v5177_v3  ;;  %v4345_v39 = vcombine.low %v1406_v58, %v1406_v58 }
  0xd8   : > { %v6577_v5 = vcombine.low %v4810_v18, %v4835_v1  ;;  %v5331_v58 = vrot.slane %v6578_v21, %v4862_v33  ;;  %v4353_v35 = vcombine.low %v1635_v42, %v1635_v42  ;;  %v4347_v24 = vcombine.low %v1412_v55, %v1412_v55 }
  0xd9   : > { %1212 = vrot.lane.b32.xlu1 %v4337_v7, %s4559_s17  ;;  %1204 = vrot.lane.b32.xlu0 %v4335_v16, %s4551_s9  ;;  %v1415_v7 = vpack.i.b16 %v1388_v54, %v1378_v34  ;;  %v1593_v16 = vcombine.high %v5168_v48, %v5174_v9  ;;  %v2322_v43 = vcombine.low %v5294_v59, %v5300_v15  ;;  %v1417_v9 = vshrl.u32 %v1388_v54, 16 }
  0xda   : > { %v5309_v10 = vpop.permute.xlu1 %2021  ;;  %v2288_v48 = vcombine.low %v5297_v29, %v5303_v26  ;;  %v5325_v3 = vrot.slane %v6577_v5, %v4862_v33  ;;  %v1573_v34 = vrot.slane %v1559_v44, %v4862_v33  ;;  %v1641_v25 = vpack.i.b16 %v1640_v20, %v1639_v57 }
  0xdb   : > { %v4348_v4 = vcombine.low %v1415_v7, %v1415_v7  ;;  %v1607_v54 = vrot.slane %v1593_v16, %v4862_v33  ;;  %v5338_v61 = vrot.slane %v2322_v43, %v4862_v33  ;;  %v1418_v31 = vpack.i.b16 %v1417_v9, %v1416_v27 }
  0xdc   : > { %v5341_v18 = vrot.slane %v2288_v48, %v4862_v33  ;;  %v1882_v43 = vshrl.u32 %v5325_v3, 16  ;;  %v1638_v16 = vpack.i.b16 %v1608_v53, %v1574_v49  ;;  %v4355_v44 = vcombine.low %v1641_v25, %v1641_v25 }
  0xdd   : > { %1441 = vrot.lane.b32.xlu1 %v4346_v28, %s4557_s15  ;;  %1433 = vrot.lane.b32.xlu0 %v4344_v60, %s4555_s13  ;;  %v5347_v28 = vpop.permute.xlu0 %2017  ;;  %v1881_v60 = vshrl.u32 %v5331_v58, 16  ;;  %v1644_v7 = vpack.i.b16 %v1607_v54, %v1573_v34  ;;  %v1645_v42 = vshrl.u32 %v1573_v34, 16  ;;  %v1646_v20 = vshrl.u32 %v1607_v54, 16 }
  0xde   : > { %v5343_v1 = vpop.permute.xlu1 %2029  ;;  %v1822_v55 = vcombine.high %v5331_v58, %v6576_v19  ;;  %v1856_v49 = vcombine.high %v5325_v3, %v6576_v19  ;;  %v4354_v48 = vcombine.low %v1638_v16, %v1638_v16  ;;  %v1575_v9 = vcombine.high %v1573_v34, %v6576_v19 }
  0xdf   : > { %v1883_v57 = vpack.i.b16 %v1882_v43, %v1881_v60  ;;  %v4356_v53 = vcombine.low %v1644_v7, %v1644_v7  ;;  %v1622_v5 = vcombine.low %v5211_v17, %v5223_v62  ;;  %v1612_v21 = vcombine.low %v5213_v23, %v5225_v56 }
  0xe0   : > { %v1609_v25 = vcombine.high %v1607_v54, %v6576_v19  ;;  %v1886_v60 = vpack.i.b16 %v1856_v49, %v1822_v55  ;;  %v1887_v43 = vshrl.u32 %v1822_v55, 16  ;;  %v1888_v7 = vshrl.u32 %v1856_v49, 16 }
  0xe1   : > { %1449 = vrot.lane.b32.xlu1 %v4348_v4, %s4558_s16  ;;  %1437 = vrot.lane.b32.xlu0 %v4345_v39, %s4556_s14  ;;  %v2362_v4 = vpack.i.b16 %v5338_v61, %v5341_v18  ;;  %v4349_v39 = vcombine.low %v1418_v31, %v1418_v31  ;;  %v4369_v31 = vcombine.low %v1883_v57, %v1883_v57 }
  0xe2   : > { %v5353_v27 = vpop.permute.xlu1 %2262  ;;  %v1629_v17 = vrot.slane %v1622_v5, %v4862_v33  ;;  %v1619_v62 = vrot.slane %v1612_v21, %v4862_v33  ;;  %v1650_v56 = vpack.i.b16 %v1609_v25, %v1575_v9  ;;  %v4370_v54 = vcombine.low %v1886_v60, %v1886_v60 }
  0xe4   : > { %v1656_v57 = vpack.i.b16 %v1629_v17, %v1619_v62  ;;  %v1657_v55 = vshrl.u32 %v1619_v62, 16  ;;  %v4358_v49 = vcombine.low %v1650_v56, %v1650_v56  ;;  %v4372_v62 = vcombine.low %v5046_v37, %v5046_v37 }
  0xe5   : > { %1662 = vrot.lane.b32.xlu1 %v4353_v35, %s4552_s10  ;;  %1445 = vrot.lane.b32.xlu0 %v4347_v24, %s4551_s9  ;;  %v1647_v35 = vpack.i.b16 %v1646_v20, %v1645_v42  ;;  %v5366_v24 = vpop.permute.xlu0 %2025  ;;  %v1652_v42 = vshrl.u32 %v1609_v25, 16  ;;  %v1658_v20 = vshrl.u32 %v1629_v17, 16  ;;  %v4374_v17 = vcombine.low %v5038_v41, %v5038_v41 }
  0xe6   : > { %v5371_v34 = vpop.permute.xlu1 %2270  ;;  %v2063_v56 = vcombine.high %v5285_v51, %v6576_v19  ;;  %v2082_v41 = vcombine.high %v5248_v6, %v5254_v32  ;;  %v2048_v37 = vcombine.high %v5251_v12, %v5257_v40 }
  0xe7   : > { %v4357_v23 = vcombine.low %v1647_v35, %v1647_v35  ;;  %v1659_v35 = vpack.i.b16 %v1658_v20, %v1657_v55  ;;  %v4373_v20 = vcombine.low %v5052_v52, %v5052_v52  ;;  %v4375_v52 = vcombine.low %v5055_v63, %v5055_v63 }
  0xe8   : > { %v2062_v6 = vrot.slane %v2048_v37, %v4862_v33 }
  0xe9   : > { %1670 = vrot.lane.b32.xlu1 %v4355_v44, %s4554_s12  ;;  %1453 = vrot.lane.b32.xlu0 %v4349_v39, %s4559_s17  ;;  %v5377_v16 = vpop.permute.xlu0 %2258  ;;  %v1889_v44 = vpack.i.b16 %v1888_v7, %v1887_v43  ;;  %v1651_v39 = vshrl.u32 %v1575_v9, 16  ;;  %v4360_v9 = vcombine.low %v1656_v57, %v1656_v57 }
  0xea   : > { %v5383_v5 = vpop.permute.xlu1 %380 }
  0xeb   : > { %v4371_v21 = vcombine.low %v1889_v44, %v1889_v44  ;;  %v2123_v44 = vshrl.u32 %v5282_v0, 16 }
  0xed   : > { %1674 = vrot.lane.b32.xlu1 %v4356_v53, %s4555_s13  ;;  %1666 = vrot.lane.b32.xlu0 %v4354_v48, %s4553_s11  ;;  %v1870_v53 = vcombine.low %v4970_v45, %v4982_v2  ;;  %v1860_v48 = vcombine.low %v4974_v50, %v4986_v22  ;;  %v5387_v25 = vpop.permute.xlu0 %2266  ;;  %v4361_v50 = vcombine.low %v1659_v35, %v1659_v35 }
  0xee   : > { %v5393_v45 = vpop.permute.xlu1 %388  ;;  %v2096_v35 = vrot.slane %v2082_v41, %v4862_v33 }
  0xef   : > { %v1867_v60 = vrot.slane %v1860_v48, %v4862_v33  ;;  %v1877_v43 = vrot.slane %v1870_v53, %v4862_v33  ;;  %v2128_v48 = vshrl.u32 %v2063_v56, 16 }
  0xf0   : > { %v2098_v37 = vcombine.high %v2096_v35, %v6576_v19 }
  0xf1   : > { %1678 = vrot.lane.b32.xlu1 %v4357_v23, %s4556_s14  ;;  %1910 = vrot.lane.b32.xlu0 %v4369_v31, %s4552_s10  ;;  %v1653_v31 = vpack.i.b16 %v1652_v42, %v1651_v39  ;;  %v1904_v22 = vpack.i.b16 %v1877_v43, %v1867_v60  ;;  %v5397_v7 = vpop.permute.xlu0 %384  ;;  %v2097_v23 = vcombine.high %v5282_v0, %v6576_v19  ;;  %v1905_v57 = vshrl.u32 %v1867_v60, 16 }
  0xf2   : > { %v5409_v39 = vpop.permute.xlu1 %396  ;;  %v1906_v55 = vshrl.u32 %v1877_v43, 16  ;;  %v2133_v60 = vpack.i.b16 %v2096_v35, %v2062_v6  ;;  %v2134_v43 = vshrl.u32 %v2062_v6, 16 }
  0xf3   : > { %v4359_v2 = vcombine.low %v1653_v31, %v1653_v31  ;;  %v4376_v42 = vcombine.low %v1904_v22, %v1904_v22  ;;  %v2127_v22 = vpack.i.b16 %v2097_v23, %v2063_v56  ;;  %v2338_v56 = vcombine.high %v5338_v61, %v6576_v19 }
  0xf4   : > { %v1907_v12 = vpack.i.b16 %v1906_v55, %v1905_v57  ;;  %v2111_v57 = vcombine.low %v5309_v10, %v5343_v1  ;;  %v2101_v55 = vcombine.low %v5347_v28, %v5366_v24 }
  0xf5   : > { %1682 = vrot.lane.b32.xlu1 %v4358_v49, %s4557_s15  ;;  %1914 = vrot.lane.b32.xlu0 %v4370_v54, %s4553_s11  ;;  %v2122_v54 = vshrl.u32 %v5285_v51, 16  ;;  %v5419_v49 = vpop.permute.xlu0 %392  ;;  %v2370_v1 = vshrl.u32 %v2338_v56, 16 }
  0xf6   : > { %v5427_v32 = vpop.permute.xlu1 %404  ;;  %v4377_v63 = vcombine.low %v1907_v12, %v1907_v12  ;;  %v2118_v28 = vrot.slane %v2111_v57, %v4862_v33  ;;  %v2108_v24 = vrot.slane %v2101_v55, %v4862_v33  ;;  %v2352_v55 = vcombine.low %v5353_v27, %v5371_v34 }
  0xf7   : > { %v2124_v53 = vpack.i.b16 %v2123_v44, %v2122_v54 }
  0xf8   : > { %v2359_v34 = vrot.slane %v2352_v55, %v4862_v33 }
  0xf9   : > { %1690 = vrot.lane.b32.xlu1 %v4360_v9, %s4558_s16  ;;  %1918 = vrot.lane.b32.xlu0 %v4371_v21, %s4554_s12  ;;  %v2129_v21 = vshrl.u32 %v2097_v23, 16  ;;  %v4381_v40 = vcombine.low %v2124_v53, %v2124_v53  ;;  %v5429_v31 = vpop.permute.xlu0 %400  ;;  %v2304_v23 = vcombine.high %v5341_v18, %v6576_v19  ;;  %v4382_v53 = vcombine.low %v2127_v22, %v2127_v22 }
  0xfa   : > { %v5435_v54 = vpop.permute.xlu1 %412  ;;  %v2145_v22 = vpack.i.b16 %v2118_v28, %v2108_v24 }
  0xfb   : > { %v2130_v9 = vpack.i.b16 %v2129_v21, %v2128_v48  ;;  %v2323_v21 = vcombine.high %v5294_v59, %v5300_v15  ;;  %v2369_v10 = vshrl.u32 %v2304_v23, 16  ;;  %v2368_v15 = vpack.i.b16 %v2338_v56, %v2304_v23 }
  0xfc   : > { %v4388_v57 = vcombine.low %v2145_v22, %v2145_v22 }
  0xfd   : > { %1694 = vrot.lane.b32.xlu1 %v4361_v50, %s4559_s17  ;;  %1686 = vrot.lane.b32.xlu0 %v4359_v2, %s4551_s9  ;;  %v2135_v50 = vshrl.u32 %v2096_v35, 16  ;;  %v4383_v2 = vcombine.low %v2130_v9, %v2130_v9  ;;  %v5439_v44 = vpop.permute.xlu0 %408 }
  0xff   : > { %v2136_v41 = vpack.i.b16 %v2135_v50, %v2134_v43  ;;  %v2371_v43 = vpack.i.b16 %v2370_v1, %v2369_v10  ;;  %v2141_v50 = vshrl.u32 %v2098_v37, 16 }
 0x101   : > { %1930 = vrot.lane.b32.xlu1 %v4374_v17, %s4557_s15  ;;  %1922 = vrot.lane.b32.xlu0 %v4372_v62, %s4555_s13  ;;  %v2363_v17 = vshrl.u32 %v5341_v18, 16  ;;  %v2364_v62 = vshrl.u32 %v5338_v61, 16 }
 0x103   : > { %v2365_v48 = vpack.i.b16 %v2364_v62, %v2363_v17  ;;  %v2146_v17 = vshrl.u32 %v2108_v24, 16 }
 0x105   : > { %1938 = vrot.lane.b32.xlu1 %v4376_v42, %s4558_s16  ;;  %1926 = vrot.lane.b32.xlu0 %v4373_v20, %s4556_s14  ;;  %v4384_v42 = vcombine.low %v2133_v60, %v2133_v60  ;;  %v2064_v20 = vcombine.high %v2062_v6, %v6576_v19  ;;  %v4385_v6 = vcombine.low %v2136_v41, %v2136_v41 }
 0x106   : > { %v4393_v59 = vcombine.low %v2365_v48, %v2365_v48  ;;  %v4394_v41 = vcombine.low %v2368_v15, %v2368_v15  ;;  %v6579_v15 = vpack.i.b16 %v5062_v13, %v5065_v14 }
 0x107   : > { %v2139_v12 = vpack.i.b16 %v2098_v37, %v2064_v20  ;;  %v2140_v9 = vshrl.u32 %v2064_v20, 16 }
 0x109   : > { %2151 = vrot.lane.b32.xlu1 %v4381_v40, %s4552_s10  ;;  %1934 = vrot.lane.b32.xlu0 %v4375_v52, %s4551_s9  ;;  %v2289_v52 = vcombine.high %v5297_v29, %v5303_v26  ;;  %v2337_v29 = vrot.slane %v2323_v21, %v4862_v33  ;;  %v350_v26 = vpack.i.b16 %v4998_v11, %v4992_v8 }
 0x10a   : > { %v4386_v60 = vcombine.low %v2139_v12, %v2139_v12  ;;  %v4395_v8 = vcombine.low %v2371_v43, %v2371_v43  ;;  %v2142_v11 = vpack.i.b16 %v2141_v50, %v2140_v9 }
 0x10b   : > { %v417_v23 = vsel %vm414_vm6, %v350_v26, %v5383_v5  ;;  %v2339_v37 = vcombine.high %v2337_v29, %v6576_v19  ;;  %v2376_v27 = vshrl.u32 %v2337_v29, 16 }
 0x10c   : > { %v420_v21 = vsel %vm418_vm7, %v417_v23, %v5397_v7 }
 0x10d   : > { %2159 = vrot.lane.b32.xlu1 %v4383_v2, %s4554_s12  ;;  %1942 = vrot.lane.b32.xlu0 %v4377_v63, %s4559_s17  ;;  %v2303_v63 = vrot.slane %v2289_v52, %v4862_v33  ;;  %v2147_v2 = vshrl.u32 %v2118_v28, 16  ;;  %v2382_v9 = vshrl.u32 %v2339_v37, 16 }
 0x10f   : > { %v2305_v20 = vcombine.high %v2303_v63, %v6576_v19  ;;  %v2148_v56 = vpack.i.b16 %v2147_v2, %v2146_v17  ;;  %v2375_v52 = vshrl.u32 %v2303_v63, 16  ;;  %v2374_v10 = vpack.i.b16 %v2337_v29, %v2303_v63 }
 0x111   : > { %2163 = vrot.lane.b32.xlu1 %v4384_v42, %s4555_s13  ;;  %2155 = vrot.lane.b32.xlu0 %v4382_v53, %s4553_s11  ;;  %v5457_v35 = vpop.permute.xlu1 %615  ;;  %v2342_v53 = vcombine.low %v5377_v16, %v5387_v25  ;;  %v2380_v12 = vpack.i.b16 %v2339_v37, %v2305_v20  ;;  %v423_v25 = vsel %vm421_vm8, %v420_v21, %v5393_v45  ;;  %v2381_v24 = vshrl.u32 %v2305_v20, 16 }
 0x112   : > { %v4389_v28 = vcombine.low %v2148_v56, %v2148_v56  ;;  %v2377_v26 = vpack.i.b16 %v2376_v27, %v2375_v52  ;;  %v4396_v2 = vcombine.low %v2374_v10, %v2374_v10  ;;  %v438_v37 = vsel %vm436_vm13, %v5427_v32, %v5439_v44 }
 0x113   : > { %v5461_v40 = vpop.permute.xlu0 %619  ;;  %v2349_v16 = vrot.slane %v2342_v53, %v4862_v33  ;;  %v4398_v50 = vcombine.low %v2380_v12, %v2380_v12  ;;  %v441_v52 = vsel %vm439_vm15, %v438_v37, %v5435_v54  ;;  %v6580_v12 = vpack.i.b16 %v5084_v47, %v5090_v38 }
 0x114   : > { %v4397_v14 = vcombine.low %v2377_v26, %v2377_v26 }
 0x115   : > { %2167 = vrot.lane.b32.xlu1 %v4385_v6, %s4556_s14  ;;  %2392 = vrot.lane.b32.xlu0 %v4393_v59, %s4552_s10  ;;  %v600_v62 = vpop.permute.xlu1 %599  ;;  %v4387_v6 = vcombine.low %v2142_v11, %v2142_v11  ;;  %v426_v59 = vsel %vm424_vm9, %v423_v25, %v5419_v49  ;;  %v2386_v45 = vpack.i.b16 %v2359_v34, %v2349_v16  ;;  %v2387_v23 = vshrl.u32 %v2349_v16, 16  ;;  %s4561_s10 = smov 2  }
 0x116   : > { %v429_v49 = vsel %vm427_vm10, %v426_v59, %v5409_v39 }
 0x117   : > { %v588_v42 = vpop.permute.xlu0 %587 }
 0x118   : > { %v623_v29 = vsel %vm414_vm6, %v6579_v15, %v588_v42  ;;  %v2383_v42 = vpack.i.b16 %v2382_v9, %v2381_v24 }
 0x119   : > { %2171 = vrot.lane.b32.xlu1 %v4386_v60, %s4557_s15  ;;  %2396 = vrot.lane.b32.xlu0 %v4394_v41, %s4553_s11  ;;  %v2388_v41 = vshrl.u32 %v2359_v34, 16  ;;  %s4562_s11 = smov 56  }
 0x11b   : > { %v5479_v5 = vpop.permute.xlu1 %888  ;;  %v604_v48 = vpop.permute.xlu0 %603  ;;  %v2389_v44 = vpack.i.b16 %v2388_v41, %v2387_v23 }
 0x11d   : > { %2179 = vrot.lane.b32.xlu1 %v4388_v57, %s4558_s16  ;;  %2400 = vrot.lane.b32.xlu0 %v4395_v8, %s4554_s12  ;;  %v4400_v8 = vcombine.low %v2386_v45, %v2386_v45  ;;  %v4401_v25 = vcombine.low %v2389_v44, %v2389_v44  ;;  %v1150_v45 = vpack.i.b16 %v5127_v46, %v5133_v36  ;;  %s4563_s12 = smov 110  }
 0x11f   : > { %v592_v1 = vpop.permute.xlu1 %591  ;;  %v877_v7 = vpop.permute.xlu0 %876 }
 0x120   : > { %v625_v63 = vsel %vm418_vm7, %v623_v29, %v592_v1  ;;  %v912_v10 = vsel %vm414_vm6, %v6580_v12, %v877_v7 }
 0x121   : > { %2183 = vrot.lane.b32.xlu1 %v4389_v28, %s4559_s17  ;;  %2175 = vrot.lane.b32.xlu0 %v4387_v6, %s4551_s9  ;;  %v4312_v6 = vld [vmem:[%s6550_s1 + $0x4] sm:$0xf]  ;;  %v442_v28 = vld [vmem:[%s6550_s1] sm:$0xf] }
 0x123   : > { %v608_v60 = vpop.permute.xlu1 %607  ;;  %v596_v43 = vpop.permute.xlu0 %595 }
 0x124   : > { %v627_v22 = vsel %vm421_vm8, %v625_v63, %v596_v43  ;;  %v4326_v43 = vld [vmem:[%s6550_s1 + $0x8] sm:$0xf] }
 0x125   : > { %v629_v13 = vsel %vm424_vm9, %v627_v22, %v600_v62  ;;  %2412 = vrot.lane.b32.xlu1 %v4398_v50, %s4557_s15  ;;  %2404 = vrot.lane.b32.xlu0 %v4396_v2, %s4555_s13  ;;  %v432_v62 = vsel %vm430_vm11, %v429_v49, %v5429_v31  ;;  %v2497_v31 = vld [vmem:[%s6551_s2] sm:$0xff]  ;;  %s4564_s13 = smov 20   ;;  %s4567_s15 = smov 38  }
 0x126   : > { %v631_v17 = vsel %vm427_vm10, %v629_v13, %v604_v48 }
 0x127   : > { %v881_v11 = vpop.permute.xlu1 %880  ;;  %v612_v20 = vpop.permute.xlu0 %611  ;;  %v633_v39 = vsel %vm430_vm11, %v631_v17, %v608_v60 }
 0x128   : > { %v637_v56 = vsel %vm436_vm13, %v612_v20, %v5457_v35  ;;  %v635_v57 = vsel %vm433_vm12, %v633_v39, %v612_v20  ;;  %v435_v35 = vsel %vm433_vm12, %v432_v62, %v5427_v32  ;;  %v914_v32 = vsel %vm418_vm7, %v912_v10, %v881_v11 }
 0x129   : > { %2420 = vrot.lane.b32.xlu1 %v4400_v8, %s4558_s16  ;;  %2408 = vrot.lane.b32.xlu0 %v4397_v14, %s4556_s14  ;;  %v639_v55 = vsel %vm439_vm15, %v637_v56, %v5461_v40  ;;  %v647_v53 = vsel %vm646_vm14, %v635_v57, 0  ;;  %v4399_v40 = vcombine.low %v2383_v42, %v2383_v42  ;;  %v695_v54 = vsel %vm646_vm14, %v435_v35, 0  ;;  %s4565_s14 = smov 74  }
 0x12a   : > { %4313 = vmatprep.subr.msk.bf16.mxu0 %vm646_vm14, %v639_v55  ;;  %v4338_v55 = vld [vmem:[%s6550_s1 + $0xc] sm:$0xf] }
 0x12b   : > { %v897_v48 = vpop.permute.xlu1 %896  ;;  %666 = vmatpush1.bf16.msra.mxu0 %v647_v53  ;;  %v885_v21 = vpop.permute.xlu0 %884  ;;  %v6581_v53 = vld [vmem:[#allocation4_spill] sm:$0xff] }
 0x12c   : > { %4315 = vmatprep.subr.msk.bf16.mxu0 %vm646_vm14, %v441_v52  ;;  %v916_v27 = vsel %vm421_vm8, %v914_v32, %v885_v21 }
 0x12d   : > { %2416 = vrot.lane.b32.xlu0 %v4399_v40, %s4551_s9  ;;  %2500 = vperm.xlu1 %4503, %v2497_v31   ;;  %v918_v47 = vsel %vm424_vm9, %v916_v27, %v5479_v5  ;;  %v6582_v31 = vpack.i.b16 %v5198_v30, %v6581_v53 }
 0x12e   : > { %4314 = vmatmul.mubr.msk.bf16.vlgmr.msra.gmra.mxu0 %vm642_vm0, %v4312_v6 }
 0x12f   : > { %v905_v34 = vpop.permute.xlu1 %904  ;;  %714 = vmatpush1.bf16.msra.mxu0 %v695_v54  ;;  %v893_v16 = vpop.permute.xlu0 %892  ;;  %731 = vmatprep.mubr.bf16.mxu0 %v6576_v19 }
 0x130   : > { %v920_v38 = vsel %vm427_vm10, %v918_v47, %v893_v16  ;;  %v4350_v47 = vld [vmem:[%s6550_s1 + $0x10] sm:$0xf] }
 0x131   : > { %2424 = vrot.lane.b32.xlu0 %v4401_v25, %s4559_s17  ;;  %v922_v24 = vsel %vm430_vm11, %v920_v38, %v897_v48  ;;  %s4568_s17 = smov 112  }
 0x133   : > { %v1181_v1 = vpop.permute.xlu1 %1180  ;;  %v901_v7 = vpop.permute.xlu0 %900 }
 0x134   : > { %v924_v59 = vsel %vm433_vm12, %v922_v24, %v901_v7  ;;  %v926_v15 = vsel %vm436_vm13, %v901_v7, %v905_v34  ;;  %v1216_v50 = vsel %vm414_vm6, %v1150_v45, %v1181_v1  ;;  %v6583_v24 = vld [vmem:[#allocation5_spill] sm:$0xff] }
 0x135   : > { %v934_v9 = vsel %vm646_vm14, %v924_v59, 0  ;;  %v6584_v59 = vld [vmem:[#allocation6_spill] sm:$0xff] }
 0x136   : > { %4316 = vmatmul.mubr.msk.bf16.vlgmr.msra.gmra.mxu0 %vm642_vm0, %v442_v28 }
 0x137   : > { %v1189_v29 = vpop.permute.xlu1 %1188  ;;  %v909_v5 = vpop.permute.xlu0 %908  ;;  %970 = vmatprep.mubr.bf16.mxu0 %v6576_v19 }
 0x138   : > { %v928_v26 = vsel %vm439_vm15, %v926_v15, %v909_v5  ;;  %v6585_v15 = vpack.i.b16 %v6583_v24, %v6584_v59 }
 0x139   : > { %4327 = vmatprep.subr.msk.bf16.mxu0 %vm646_vm14, %v928_v26 }
 0x13a   : > { %953 = vmatpush1.bf16.msra.mxu0 %v934_v9 }
 0x13b   : > { %v1193_v63 = vpop.permute.xlu1 %1192  ;;  %v1185_v60 = vpop.permute.xlu0 %1184 }
 0x13c   : > { %v1218_v49 = vsel %vm418_vm7, %v1216_v50, %v1185_v60 }
 0x13d   : > { %v1220_v46 = vsel %vm421_vm8, %v1218_v49, %v1189_v29 }
 0x13e   : > { %4328 = vmatmul.mubr.msk.bf16.vlgmr.msra.gmra.mxu0 %vm642_vm0, %v4326_v43  ;;  %v1222_v36 = vsel %vm424_vm9, %v1220_v46, %v1193_v63 }
 0x13f   : > { %v1197_v2 = vpop.permute.xlu1 %1196  ;;  %v1422_v22 = vpop.permute.xlu0 %1421  ;;  %1515 = vmatprep.mubr.bf16.mxu0 %v6576_v19 }
 0x140   : > { %v1224_v41 = vsel %vm427_vm10, %v1222_v36, %v1197_v2  ;;  %v1457_v44 = vsel %vm414_vm6, %v6582_v31, %v1422_v22 }
 0x143   : > { %v1201_v13 = vpop.permute.xlu1 %1200  ;;  %v1426_v14 = vpop.permute.xlu0 %1425 }
 0x144   : > { %v1226_v23 = vsel %vm430_vm11, %v1224_v41, %v1201_v13  ;;  %v1459_v35 = vsel %vm418_vm7, %v1457_v44, %v1426_v14 }
 0x147   : > { %v1209_v17 = vpop.permute.xlu1 %1208  ;;  %v1430_v42 = vpop.permute.xlu0 %1429 }
 0x148   : > { %v1461_v52 = vsel %vm421_vm8, %v1459_v35, %v1430_v42 }
 0x14b   : > { %v1213_v8 = vpop.permute.xlu1 %1212  ;;  %v1205_v11 = vpop.permute.xlu0 %1204 }
 0x14c   : > { %v1230_v20 = vsel %vm436_vm13, %v1205_v11, %v1209_v17  ;;  %v1228_v39 = vsel %vm433_vm12, %v1226_v23, %v1205_v11  ;;  %v1880_v17 = vpack.i.b16 %v5325_v3, %v5331_v58  ;;  %v4362_v23 = vld [vmem:[%s6550_s1 + $0x14] sm:$0xf] }
 0x14d   : > { %v1232_v62 = vsel %vm439_vm15, %v1230_v20, %v1213_v8  ;;  %v1238_v37 = vsel %vm646_vm14, %v1228_v39, 0 }
 0x14e   : > { %4339 = vmatprep.subr.msk.bf16.mxu1 %vm646_vm14, %v1232_v62 }
 0x14f   : > { %v1442_v56 = vpop.permute.xlu1 %1441  ;;  %1257 = vmatpush1.bf16.msra.mxu1 %v1238_v37  ;;  %v1434_v57 = vpop.permute.xlu0 %1433 }
 0x150   : > { %v1463_v40 = vsel %vm424_vm9, %v1461_v52, %v1434_v57 }
 0x152   : > { %4340 = vmatmul.mubr.msk.bf16.vlgmr.msra.gmra.mxu1 %vm642_vm0, %v4338_v55 }
 0x153   : > { %v1450_v48 = vpop.permute.xlu1 %1449  ;;  %v1438_v21 = vpop.permute.xlu0 %1437  ;;  %1756 = vmatprep.mubr.bf16.mxu1 %v6576_v19 }
 0x154   : > { %v1465_v6 = vsel %vm427_vm10, %v1463_v40, %v1438_v21  ;;  %v4378_v21 = vld [vmem:[%s6550_s1 + $0x18] sm:$0xf] }
 0x155   : > { %v1467_v30 = vsel %vm430_vm11, %v1465_v6, %v1442_v56 }
 0x157   : > { %v1663_v12 = vpop.permute.xlu1 %1662  ;;  %v1446_v10 = vpop.permute.xlu0 %1445 }
 0x158   : > { %v1469_v32 = vsel %vm433_vm12, %v1467_v30, %v1446_v10  ;;  %v1471_v27 = vsel %vm436_vm13, %v1446_v10, %v1450_v48  ;;  %v1698_v29 = vsel %vm414_vm6, %v6585_v15, %v1663_v12  ;;  %v6586_v10 = vpack.i.b16 %v5282_v0, %v5285_v51 }
 0x159   : > { %v1479_v25 = vsel %vm646_vm14, %v1469_v32, 0 }
 0x15b   : > { %v1671_v54 = vpop.permute.xlu1 %1670  ;;  %v1454_v34 = vpop.permute.xlu0 %1453 }
 0x15c   : > { %v1473_v16 = vsel %vm439_vm15, %v1471_v27, %v1454_v34 }
 0x15d   : > { %4351 = vmatprep.subr.msk.bf16.mxu0 %vm646_vm14, %v1473_v16 }
 0x15e   : > { %1498 = vmatpush1.bf16.msra.mxu0 %v1479_v25 }
 0x15f   : > { %v1675_v38 = vpop.permute.xlu1 %1674  ;;  %v1667_v1 = vpop.permute.xlu0 %1666 }
 0x160   : > { %v1700_v5 = vsel %vm418_vm7, %v1698_v29, %v1667_v1  ;;  %v4390_v29 = vld [vmem:[%s6550_s1 + $0x1c] sm:$0xf] }
 0x161   : > { %4352 = vmatmul.mubr.msk.bf16.vlgmr.msra.gmra.mxu0 %vm642_vm0, %v4350_v47  ;;  %v1702_v45 = vsel %vm421_vm8, %v1700_v5, %v1671_v54 }
 0x162   : > { %2004 = vmatprep.mubr.bf16.mxu0 %v6576_v19  ;;  %v1704_v63 = vsel %vm424_vm9, %v1702_v45, %v1675_v38 }
 0x163   : > { %v1679_v7 = vpop.permute.xlu1 %1678  ;;  %v1911_v28 = vpop.permute.xlu0 %1910 }
 0x164   : > { %v1706_v50 = vsel %vm427_vm10, %v1704_v63, %v1679_v7  ;;  %v1946_v8 = vsel %vm414_vm6, %v1880_v17, %v1911_v28 }
 0x167   : > { %v1683_v26 = vpop.permute.xlu1 %1682  ;;  %v1915_v9 = vpop.permute.xlu0 %1914 }
 0x168   : > { %v1708_v2 = vsel %vm430_vm11, %v1706_v50, %v1683_v26  ;;  %v1948_v11 = vsel %vm418_vm7, %v1946_v8, %v1915_v9 }
 0x16b   : > { %v1691_v60 = vpop.permute.xlu1 %1690  ;;  %v1919_v43 = vpop.permute.xlu0 %1918 }
 0x16c   : > { %v1950_v3 = vsel %vm421_vm8, %v1948_v11, %v1919_v43 }
 0x16f   : > { %v1695_v22 = vpop.permute.xlu1 %1694  ;;  %v1687_v49 = vpop.permute.xlu0 %1686 }
 0x170   : > { %v1710_v13 = vsel %vm433_vm12, %v1708_v2, %v1687_v49  ;;  %v1712_v14 = vsel %vm436_vm13, %v1687_v49, %v1691_v60 }
 0x171   : > { %v1714_v46 = vsel %vm439_vm15, %v1712_v14, %v1695_v22  ;;  %v1720_v36 = vsel %vm646_vm14, %v1710_v13, 0  ;;  %v4402_v14 = vld [vmem:[%s6550_s1 + $0x20] sm:$0xf] }
 0x172   : > { %4363 = vmatprep.subr.msk.bf16.mxu1 %vm646_vm14, %v1714_v46 }
 0x173   : > { %v1931_v42 = vpop.permute.xlu1 %1930  ;;  %1739 = vmatpush1.bf16.msra.mxu1 %v1720_v36  ;;  %v1923_v41 = vpop.permute.xlu0 %1922 }
 0x174   : > { %v1952_v58 = vsel %vm424_vm9, %v1950_v3, %v1923_v41 }
 0x176   : > { %4364 = vmatmul.mubr.msk.bf16.vlgmr.msra.gmra.mxu1 %vm642_vm0, %v4362_v23 }
 0x177   : > { %v1939_v20 = vpop.permute.xlu1 %1938  ;;  %v1927_v39 = vpop.permute.xlu0 %1926  ;;  %2245 = vmatprep.mubr.bf16.mxu1 %v6576_v19 }
 0x178   : > { %v1954_v62 = vsel %vm427_vm10, %v1952_v58, %v1927_v39 }
 0x179   : > { %v1956_v57 = vsel %vm430_vm11, %v1954_v62, %v1931_v42 }
 0x17b   : > { %v2152_v37 = vpop.permute.xlu1 %2151  ;;  %v1935_v56 = vpop.permute.xlu0 %1934 }
 0x17c   : > { %v1958_v55 = vsel %vm433_vm12, %v1956_v57, %v1935_v56  ;;  %v1960_v53 = vsel %vm436_vm13, %v1935_v56, %v1939_v20  ;;  %v2187_v30 = vsel %vm414_vm6, %v6586_v10, %v2152_v37 }
 0x17d   : > { %v1968_v48 = vsel %vm646_vm14, %v1958_v55, 0 }
 0x17f   : > { %v2160_v31 = vpop.permute.xlu1 %2159  ;;  %v1943_v44 = vpop.permute.xlu0 %1942 }
 0x180   : > { %v1962_v35 = vsel %vm439_vm15, %v1960_v53, %v1943_v44 }
 0x181   : > { %4379 = vmatprep.subr.msk.bf16.mxu0 %vm646_vm14, %v1962_v35 }
 0x182   : > { %1987 = vmatpush1.bf16.msra.mxu0 %v1968_v48 }
 0x183   : > { %v2164_v52 = vpop.permute.xlu1 %2163  ;;  %v2156_v40 = vpop.permute.xlu0 %2155 }
 0x184   : > { %v2189_v32 = vsel %vm418_vm7, %v2187_v30, %v2156_v40 }
 0x185   : > { %4380 = vmatmul.mubr.msk.bf16.vlgmr.msra.gmra.mxu0 %vm642_vm0, %v4378_v21  ;;  %v2191_v34 = vsel %vm421_vm8, %v2189_v32, %v2160_v31 }
 0x186   : > { %2486 = vmatprep.mubr.bf16.mxu0 %v6576_v19  ;;  %v2193_v16 = vsel %vm424_vm9, %v2191_v34, %v2164_v52 }
 0x187   : > { %v2168_v6 = vpop.permute.xlu1 %2167  ;;  %v2393_v12 = vpop.permute.xlu0 %2392 }
 0x188   : > { %v2195_v38 = vsel %vm427_vm10, %v2193_v16, %v2168_v6  ;;  %v2428_v5 = vsel %vm414_vm6, %v2362_v4, %v2393_v12 }
 0x18b   : > { %v2172_v27 = vpop.permute.xlu1 %2171  ;;  %v2397_v54 = vpop.permute.xlu0 %2396 }
 0x18c   : > { %v2197_v1 = vsel %vm430_vm11, %v2195_v38, %v2172_v27  ;;  %v2430_v26 = vsel %vm418_vm7, %v2428_v5, %v2397_v54 }
 0x18f   : > { %v2180_v25 = vpop.permute.xlu1 %2179  ;;  %v2401_v47 = vpop.permute.xlu0 %2400 }
 0x190   : > { %v2432_v45 = vsel %vm421_vm8, %v2430_v26, %v2401_v47 }
 0x193   : > { %v2184_v7 = vpop.permute.xlu1 %2183  ;;  %v2176_v28 = vpop.permute.xlu0 %2175 }
 0x194   : > { %v2199_v0 = vsel %vm433_vm12, %v2197_v1, %v2176_v28  ;;  %v2201_v51 = vsel %vm436_vm13, %v2176_v28, %v2180_v25 }
 0x195   : > { %v2203_v24 = vsel %vm439_vm15, %v2201_v51, %v2184_v7  ;;  %v2209_v59 = vsel %vm646_vm14, %v2199_v0, 0 }
 0x196   : > { %4391 = vmatprep.subr.msk.bf16.mxu1 %vm646_vm14, %v2203_v24 }
 0x197   : > { %2228 = vmatpush1.bf16.msra.mxu1 %v2209_v59  ;;  %v2405_v15 = vpop.permute.xlu0 %2404  ;;  %v2413_v63 = vpop.permute.xlu1 %2412 }
 0x198   : > { %v2434_v60 = vsel %vm424_vm9, %v2432_v45, %v2405_v15 }
 0x19a   : > { %4392 = vmatmul.mubr.msk.bf16.vlgmr.msra.gmra.mxu1 %vm642_vm0, %v4390_v29 }
 0x19b   : > { %v2409_v9 = vpop.permute.xlu0 %2408  ;;  %v2421_v22 = vpop.permute.xlu1 %2420 }
 0x19c   : > { %v2436_v43 = vsel %vm427_vm10, %v2434_v60, %v2409_v9 }
 0x19d   : > { %v2438_v2 = vsel %vm430_vm11, %v2436_v43, %v2413_v63 }
 0x19f   : > { %v2417_v50 = vpop.permute.xlu0 %2416 }
 0x1a0   : > { %v2440_v61 = vsel %vm433_vm12, %v2438_v2, %v2417_v50  ;;  %v2442_v18 = vsel %vm436_vm13, %v2417_v50, %v2421_v22 }
 0x1a1   : > { %v2450_v13 = vsel %vm646_vm14, %v2440_v61, 0 }
 0x1a3   : > { %v2425_v4 = vpop.permute.xlu0 %2424 }
 0x1a4   : > { %v2444_v49 = vsel %vm439_vm15, %v2442_v18, %v2425_v4  ;;  %v6565_v18 = vmov 0.0  }
 0x1a5   : > { %4403 = vmatprep.subr.msk.bf16.mxu0 %vm646_vm14, %v2444_v49  ;;  %4420 = vmatprep.subr.bf16.mxu1 %v6565_v18 }
 0x1a6   : > { %2469 = vmatpush1.bf16.msra.mxu0 %v2450_v13 }
 0x1a8   : > { %v2501_v15 = vpop.permute.xlu1 %2500 }
 0x1a9   : > { %4404 = vmatmul.mubr.msk.bf16.vlgmr.msra.gmra.mxu0 %vm642_vm0, %v4402_v14  ;;  %vm2901_vm0 = vcmask 261120  }
 0x1ee   : > { %v685_v46 = vpop.f32.mrf.mxu0 }
 0x1f0   : > { %v687_v36 = vpop.f32.mrf.mxu0 }
 0x1f2   : > { %v689_v17 = vpop.f32.mrf.mxu0 }
 0x1f3   : > { %v6587_v17 = vld [vmem:[#allocation2_spill] sm:$0xff] }
 0x1f4   : > { %v690_v42 = vpop.f32.mrf.mxu0 }
 0x1f5   : > { %v2744_v42 = vadd.s32 8, %v6587_v17 }
 0x1f6   : > { %v733_v41 = vpop.f32.mrf.mxu0 }
 0x1f7   : > { %v734_v23 = vadd.f32 %v733_v41, %v685_v46 }
 0x1f8   : > { %v735_v8 = vpop.f32.mrf.mxu0 }
 0x1f9   : > { %v736_v11 = vadd.f32 %v735_v8, %v687_v36  ;;  %v2749_v36 = vstv %s4406_s28 }
 0x1fa   : > { %v737_v20 = vpop.f32.mrf.mxu0 }
 0x1fc   : > { %v738_v39 = vpop.f32.mrf.mxu0 }
 0x1fe   : > { %v972_v3 = vpop.f32.mrf.mxu0 }
 0x1ff   : > { %v979_v58 = vadd.f32 %v972_v3, %v734_v23 }
 0x200   : > { %v974_v62 = vpop.f32.mrf.mxu0 }
 0x201   : > { %v980_v37 = vadd.f32 %v974_v62, %v736_v11  ;;  %v6588_v11 = vlaneseq  ;;  %v6589_v62 = vld [vmem:[#allocation3_spill] sm:$0xff] }
 0x202   : > { %v976_v56 = vpop.f32.mrf.mxu0 }
 0x203   : > { %v5676_v20 = vand.u32 127, %v6588_v11  ;;  %v2751_v56 = vadd.s32 %v2749_v36, %v2744_v42 }
 0x204   : > { %v977_v57 = vpop.f32.mrf.mxu0 }
 0x205   : > { %vm2758_vm2 = vcmp.ge.s32.totalorder %v5676_v20, 1  ;;  %vm2761_vm5 = vcmp.le.s32.totalorder %v5676_v20, 16  ;;  %vm2753_vm6 = vcmp.ge.s32.totalorder %v2751_v56, 0  ;;  %vm2755_vm7 = vcmp.lt.s32.totalorder %v2751_v56, 16 }
 0x206   : > { %vm2757_vm11 = vmand %vm2753_vm6, %vm2755_vm7  ;;  %vm4575_vm6 = vmmov 0   ;;  %vm4127_vm7 = vcmask 1043456  }
 0x207   : > { %vm5718_vm14 = vmand %vm2757_vm11, %vm2758_vm2 }
 0x208   : > { %vm5734_vm15 = vmand %vm5718_vm14, %vm2761_vm5 }
 0x212   : > { %v1276_v55 = vpop.f32.mrf.mxu1 }
 0x213   : > { %v1283_v53 = vadd.f32 %v1276_v55, %v979_v58  ;;  %v2750_v58 = vadd.s32 %v2749_v36, %v6587_v17 }
 0x214   : > { %v1278_v31 = vpop.f32.mrf.mxu1 }
 0x215   : > { %v1284_v44 = vadd.f32 %v1278_v31, %v980_v37  ;;  %vm2752_vm3 = vcmp.ge.s32.totalorder %v2750_v58, 0  ;;  %vm2754_vm4 = vcmp.lt.s32.totalorder %v2750_v58, 16 }
 0x216   : > { %v1280_v35 = vpop.f32.mrf.mxu1  ;;  %vm2756_vm8 = vmand %vm2752_vm3, %vm2754_vm4  ;;  %vm2910_vm3 = vcmask 654336   ;;  %vm2913_vm4 = vcmask 785408  }
 0x217   : > { %vm2759_vm10 = vmand %vm2756_vm8, %vm2758_vm2  ;;  %vm2907_vm2 = vcmask 523264  }
 0x218   : > { %v1281_v48 = vpop.f32.mrf.mxu1  ;;  %vm5708_vm12 = vmand %vm2759_vm10, %vm2761_vm5  ;;  %vm2916_vm5 = vcmask 916480  }
 0x221   : > { %v1517_v21 = vpop.f32.mrf.mxu0 }
 0x222   : > { %v1524_v52 = vadd.f32 %v1517_v21, %v1283_v53 }
 0x223   : > { %v1519_v40 = vpop.f32.mrf.mxu0 }
 0x224   : > { %v1525_v6 = vadd.f32 %v1519_v40, %v1284_v44 }
 0x225   : > { %v1521_v12 = vpop.f32.mrf.mxu0 }
 0x227   : > { %v1522_v10 = vpop.f32.mrf.mxu0 }
 0x236   : > { %v1758_v30 = vpop.f32.mrf.mxu1 }
 0x237   : > { %v1765_v0 = vadd.f32 %v1758_v30, %v1524_v52 }
 0x238   : > { %v1760_v32 = vpop.f32.mrf.mxu1 }
 0x239   : > { %v1766_v29 = vadd.f32 %v1760_v32, %v1525_v6 }
 0x23a   : > { %v1762_v27 = vpop.f32.mrf.mxu1 }
 0x23c   : > { %v1763_v54 = vpop.f32.mrf.mxu1 }
 0x245   : > { %v2006_v34 = vpop.f32.mrf.mxu0 }
 0x246   : > { %v2013_v51 = vadd.f32 %v2006_v34, %v1765_v0 }
 0x247   : > { %v2008_v16 = vpop.f32.mrf.mxu0 }
 0x248   : > { %v2014_v63 = vadd.f32 %v2008_v16, %v1766_v29 }
 0x249   : > { %v2010_v25 = vpop.f32.mrf.mxu0 }
 0x24b   : > { %v2011_v47 = vpop.f32.mrf.mxu0 }
 0x25a   : > { %v2247_v38 = vpop.f32.mrf.mxu1 }
 0x25b   : > { %v2254_v24 = vadd.f32 %v2247_v38, %v2013_v51 }
 0x25c   : > { %v2249_v1 = vpop.f32.mrf.mxu1 }
 0x25d   : > { %v2255_v50 = vadd.f32 %v2249_v1, %v2014_v63 }
 0x25e   : > { %v2251_v7 = vpop.f32.mrf.mxu1 }
 0x260   : > { %v2252_v28 = vpop.f32.mrf.mxu1 }
 0x269   : > { %v2488_v59 = vpop.f32.mrf.mxu0 }
 0x26a   : > { %v2495_v5 = vadd.f32 %v2488_v59, %v2254_v24 }
 0x26b   : > { %v2490_v26 = vpop.f32.mrf.mxu0 }
 0x26c   : > { %v2503_v9 = vadd.f32 %v2501_v15, %v2495_v5  ;;  %v2496_v2 = vadd.f32 %v2490_v26, %v2255_v50 }
 0x26d   : > { %v2492_v45 = vpop.f32.mrf.mxu0 }
 0x26e   : > { %v2505_v60 = vmax.f32 %v2503_v9, 0.0  ;;  %v2504_v22 = vadd.f32 %v2501_v15, %v2496_v2 }
 0x26f   : > { %v2493_v43 = vpop.f32.mrf.mxu0 }
 0x270   : > { %2511 = vrot.lane.b32.xlu1 %v2505_v60, %s4560_s7  ;;  %2527 = vrot.lane.b32.xlu0 %v2505_v60, %s4561_s10  ;;  %v2506_v61 = vmax.f32 %v2504_v22, 0.0 }
 0x274   : > { %2517 = vrot.lane.b32.xlu1 %v2505_v60, %s4562_s11  ;;  %2508 = vrot.lane.b32.xlu0 %v2505_v60, %s4563_s12  ;;  %s4292_s11 = sshll.u32 %s6618_s19, 1 }
 0x275   : > { %s256_s12 = sadd.s32 %s4292_s11, %s4642_s25 }
 0x278   : > { %2523 = vrot.lane.b32.xlu1 %v2505_v60, %s4564_s13  ;;  %2514 = vrot.lane.b32.xlu0 %v2505_v60, %s4565_s14  ;;  %s4293_s13 = sshll.u32 %s256_s12, 2 }
 0x27c   : > { %2520 = vrot.lane.b32.xlu0 %v2505_v60, %s4567_s15  ;;  %2529 = vrot.lane.b32.xlu1 %v2506_v61, %s4561_s10 }
 0x280   : > { %2534 = vrot.lane.b32.xlu0 %v2506_v61, %s4568_s17  ;;  %2537 = vrot.lane.b32.xlu1 %v2506_v61, %s4569_s26 }
 0x2e2   : > { %v2512_v4 = vpop.permute.xlu1 %2511  ;;  %v2528_v49 = vpop.permute.xlu0 %2527 }
 0x2e3   : > { %v2540_v46 = vcombine.low %v2505_v60, %v2512_v4  ;;  %v2541_v41 = vcombine.high %v2505_v60, %v2512_v4 }
 0x2e5   : > { %v2548_v37 = vrot.slane %v2540_v46, %v6589_v62  ;;  %v2555_v44 = vrot.slane %v2541_v41, %v6589_v62 }
 0x2e6   : > { %v2518_v13 = vpop.permute.xlu1 %2517  ;;  %v2509_v14 = vpop.permute.xlu0 %2508 }
 0x2ea   : > { %v2524_v23 = vpop.permute.xlu1 %2523  ;;  %v2515_v8 = vpop.permute.xlu0 %2514 }
 0x2eb   : > { %v2556_v39 = vcombine.low %v2509_v14, %v2515_v8  ;;  %v2557_v3 = vcombine.high %v2509_v14, %v2515_v8  ;;  %v2572_v57 = vcombine.low %v2518_v13, %v2524_v23  ;;  %v2573_v55 = vcombine.high %v2518_v13, %v2524_v23 }
 0x2ed   : > { %v2564_v53 = vrot.slane %v2556_v39, %v6589_v62  ;;  %v2571_v31 = vrot.slane %v2557_v3, %v6589_v62  ;;  %v2580_v10 = vrot.slane %v2572_v57, %v6589_v62  ;;  %v2587_v30 = vrot.slane %v2573_v55, %v6589_v62 }
 0x2ee   : > { %v2521_v35 = vpop.permute.xlu0 %2520  ;;  %v2530_v48 = vpop.permute.xlu1 %2529 }
 0x2ef   : > { %v2604_v21 = vcombine.low %v2548_v37, %v2564_v53  ;;  %v2605_v52 = vcombine.high %v2548_v37, %v2564_v53  ;;  %v2620_v40 = vcombine.low %v2555_v44, %v2571_v31  ;;  %v2621_v6 = vcombine.high %v2555_v44, %v2571_v31 }
 0x2f0   : > { %v2532_v12 = vsel %vm2531_vm1, %v2528_v49, %v2530_v48  ;;  %vm2904_vm1 = vcmask 392192  }
 0x2f1   : > { %v2612_v32 = vrot.slane %v2604_v21, %v4862_v33  ;;  %v2619_v27 = vrot.slane %v2605_v52, %v4862_v33  ;;  %v2588_v54 = vcombine.low %v2521_v35, %v2532_v12  ;;  %v2589_v34 = vcombine.high %v2521_v35, %v2532_v12 }
 0x2f2   : > { %v2535_v16 = vpop.permute.xlu0 %2534  ;;  %v2538_v25 = vpop.permute.xlu1 %2537  ;;  %v2628_v28 = vrot.slane %v2620_v40, %v4862_v33  ;;  %v2635_v0 = vrot.slane %v2621_v6, %v4862_v33 }
 0x2f3   : > { %v2676_v47 = vcombine.high %v2535_v16, %v6565_v18  ;;  %v2683_v38 = vrot.slane %v2535_v16, %v6589_v62  ;;  %v2691_v1 = vcombine.high %v2538_v25, %v6565_v18  ;;  %v2698_v7 = vrot.slane %v2538_v25, %v6589_v62 }
 0x2f4   : > { %v2596_v51 = vrot.slane %v2588_v54, %v6589_v62  ;;  %v2603_v24 = vrot.slane %v2589_v34, %v6589_v62 }
 0x2f5   : > { %v2690_v59 = vrot.slane %v2676_v47, %v6589_v62  ;;  %v2705_v15 = vrot.slane %v2691_v1, %v6589_v62  ;;  %v2706_v29 = vcombine.low %v2683_v38, %v2698_v7  ;;  %v2707_v5 = vcombine.high %v2683_v38, %v2698_v7 }
 0x2f6   : > { %v2636_v26 = vcombine.low %v2580_v10, %v2596_v51  ;;  %v2637_v9 = vcombine.high %v2580_v10, %v2596_v51  ;;  %v2652_v45 = vcombine.low %v2587_v30, %v2603_v24  ;;  %v2653_v63 = vcombine.high %v2587_v30, %v2603_v24 }
 0x2f7   : > { %v2714_v60 = vrot.slane %v2706_v29, %v4862_v33  ;;  %v2721_v43 = vrot.slane %v2707_v5, %v4862_v33  ;;  %v2722_v50 = vcombine.low %v2690_v59, %v2705_v15  ;;  %v2723_v2 = vcombine.high %v2690_v59, %v2705_v15 }
 0x2f8   : > { %v2644_v61 = vrot.slane %v2636_v26, %v4862_v33  ;;  %v2651_v4 = vrot.slane %v2637_v9, %v4862_v33  ;;  %v2660_v49 = vrot.slane %v2652_v45, %v4862_v33  ;;  %v2667_v13 = vrot.slane %v2653_v63, %v4862_v33 }
 0x2f9   : > { %v2730_v46 = vrot.slane %v2722_v50, %v4862_v33  ;;  %v2737_v36 = vrot.slane %v2723_v2, %v4862_v33  ;;  %v2738_v17 = vcombine.high %v2714_v60, %v6565_v18  ;;  %v2739_v42 = vcombine.high %v2721_v43, %v6565_v18 }
 0x2fa   : > { %v2668_v41 = vcombine.low %v2612_v32, %v2644_v61  ;;  %v2669_v23 = vcombine.high %v2612_v32, %v2644_v61  ;;  %v2670_v8 = vcombine.low %v2619_v27, %v2651_v4  ;;  %v2671_v11 = vcombine.high %v2619_v27, %v2651_v4 }
 0x2fb   : > { %v2672_v39 = vcombine.low %v2628_v28, %v2660_v49  ;;  %v2673_v3 = vcombine.high %v2628_v28, %v2660_v49  ;;  %v2674_v58 = vcombine.low %v2635_v0, %v2667_v13  ;;  %v2675_v37 = vcombine.high %v2635_v0, %v2667_v13 }
 0x2fc   : > { %v2770_v56 = vsel %vm5708_vm12, %v2669_v23, 0.0  ;;  %v2774_v57 = vsel %vm5708_vm12, %v2671_v11, 0.0  ;;  %v2768_v53 = vsel %vm5708_vm12, %v2668_v41, 0.0  ;;  %v2772_v31 = vsel %vm5708_vm12, %v2670_v8, 0.0 }
 0x2fd   : > { %v2776_v44 = vsel %vm5708_vm12, %v2672_v39, 0.0  ;;  %v2778_v35 = vsel %vm5708_vm12, %v2673_v3, 0.0  ;;  %v2780_v20 = vsel %vm5708_vm12, %v2674_v58, 0.0  ;;  %v2782_v48 = vsel %vm5708_vm12, %v2675_v37, 0.0 }
 0x2fe   : > { %v4409_v21 = vpack.c.bf16 %v2778_v35, %v2770_v56  ;;  %v4410_v52 = vpack.c.bf16 %v2782_v48, %v2774_v57  ;;  %v4407_v40 = vpack.c.bf16 %v2776_v44, %v2768_v53  ;;  %v4408_v6 = vpack.c.bf16 %v2780_v20, %v2772_v31 }
 0x2ff   : > { %v2740_v12 = vcombine.high %v2730_v46, %v6565_v18  ;;  %v2741_v10 = vcombine.high %v2737_v36, %v6565_v18  ;;  %v2769_v30 = vsel %vm5734_vm15, %v2714_v60, 0.0  ;;  %v2771_v32 = vsel %vm5734_vm15, %v2738_v17, 0.0 }
 0x300   : > { %v5757_v27 = vrot.slane %v4409_v21, %v6589_v62  ;;  %v5760_v54 = vrot.slane %v4410_v52, %v6589_v62  ;;  %v5763_v34 = vrot.slane %v4407_v40, %v6589_v62  ;;  %v5766_v16 = vrot.slane %v4408_v6, %v6589_v62 }
 0x301   : > { %v2773_v25 = vsel %vm5734_vm15, %v2721_v43, 0.0  ;;  %v2775_v47 = vsel %vm5734_vm15, %v2739_v42, 0.0  ;;  %v2777_v38 = vsel %vm5734_vm15, %v2730_v46, 0.0  ;;  %v5778_v28 = vpack.c.bf16 %v2769_v30, %v2768_v53 }
 0x302   : > { %v2842_v1 = vcombine.low %v5757_v27, %v5760_v54  ;;  %v2808_v7 = vcombine.low %v5763_v34, %v5766_v16  ;;  %v2781_v0 = vsel %vm5734_vm15, %v2737_v36, 0.0  ;;  %v5782_v51 = vpack.c.bf16 %v2771_v32, %v2770_v56 }
 0x303   : > { %v2779_v24 = vsel %vm5734_vm15, %v2740_v12, 0.0  ;;  %v5786_v59 = vpack.c.bf16 %v2773_v25, %v2772_v31  ;;  %3072 = vrot.lane.b32.xlu0 %v5778_v28, %s4551_s9  ;;  %v5790_v15 = vpack.c.bf16 %v2775_v47, %v2774_v57  ;;  %v5792_v29 = vpack.c.bf16 %v2777_v38, %v2776_v44 }
 0x304   : > { %v2783_v5 = vsel %vm5734_vm15, %v2741_v10, 0.0  ;;  %3074 = vrot.lane.b32.xlu1 %v5782_v51, %s4551_s9  ;;  %v5798_v26 = vpack.c.bf16 %v2779_v24, %v2778_v35  ;;  %v5800_v9 = vpack.c.bf16 %v2781_v0, %v2780_v20  ;;  %v5805_v63 = vrot.slane %v5778_v28, 1 }
 0x305   : > { %v5802_v45 = vpack.c.bf16 %v2783_v5, %v2782_v48  ;;  %v3220_v60 = vshll.u32 %v5778_v28, 16  ;;  %v3227_v43 = vshll.u32 %v5782_v51, 16  ;;  %v5812_v50 = vrot.slane %v5782_v51, 1 }
 0x306   : > { %v5815_v2 = vrot.slane %v5786_v59, 1  ;;  %v5818_v22 = vrot.slane %v5790_v15, 1  ;;  %v5821_v61 = vrot.slane %v5792_v29, 1  ;;  %v3218_v4 = vshrl.u32 %v5778_v28, 16 }
 0x307   : > { %3076 = vrot.lane.b32.xlu0 %v5786_v59, %s4551_s9  ;;  %v3222_v49 = vrot.slane %v3220_v60, 1  ;;  %v3229_v13 = vrot.slane %v3227_v43, 1  ;;  %v3234_v14 = vshll.u32 %v5786_v59, 16  ;;  %v5828_v46 = vrot.slane %v5798_v26, 1 }
 0x308   : > { %3078 = vrot.lane.b32.xlu1 %v5790_v15, %s4551_s9  ;;  %v5831_v36 = vrot.slane %v5800_v9, 1  ;;  %v5834_v17 = vrot.slane %v5802_v45, 1  ;;  %v3225_v42 = vshrl.u32 %v5782_v51, 16  ;;  %v3232_v23 = vshrl.u32 %v5786_v59, 16 }
 0x309   : > { %v5837_v41 = vor.u32 %v3222_v49, %v3218_v4  ;;  %v3236_v8 = vrot.slane %v3234_v14, 1  ;;  %v3239_v11 = vshrl.u32 %v5790_v15, 16  ;;  %v3241_v3 = vshll.u32 %v5790_v15, 16 }
 0x30a   : > { %v5843_v39 = vor.u32 %v3229_v13, %v3225_v42  ;;  %v3246_v58 = vshrl.u32 %v5792_v29, 16  ;;  %v3248_v37 = vshll.u32 %v5792_v29, 16  ;;  %v3253_v57 = vshrl.u32 %v5798_v26, 16 }
 0x30b   : > { %3080 = vrot.lane.b32.xlu0 %v5792_v29, %s4551_s9  ;;  %v5850_v56 = vor.u32 %v3236_v8, %v3232_v23  ;;  %v3255_v55 = vshll.u32 %v5798_v26, 16  ;;  %v3262_v53 = vshll.u32 %v5800_v9, 16  ;;  %v3243_v31 = vrot.slane %v3241_v3, 1 }
 0x30c   : > { %3082 = vrot.lane.b32.xlu1 %v5798_v26, %s4551_s9  ;;  %v3250_v44 = vrot.slane %v3248_v37, 1  ;;  %v3260_v35 = vshrl.u32 %v5800_v9, 16  ;;  %v3269_v20 = vshll.u32 %v5802_v45, 16  ;;  %v5858_v52 = vrot.slane %v2808_v7, %v4862_v33 }
 0x30d   : > { %v3257_v48 = vrot.slane %v3255_v55, 1  ;;  %v3264_v21 = vrot.slane %v3262_v53, 1  ;;  %v5861_v40 = vrot.slane %v2842_v1, %v4862_v33  ;;  %v5865_v6 = vor.u32 %v3243_v31, %v3239_v11 }
 0x30e   : > { %v3267_v12 = vshrl.u32 %v5802_v45, 16  ;;  %v3271_v10 = vrot.slane %v3269_v20, 1  ;;  %v2809_v30 = vcombine.high %v5763_v34, %v5766_v16  ;;  %v5872_v32 = vor.u32 %v3250_v44, %v3246_v58 }
 0x30f   : > { %3084 = vrot.lane.b32.xlu0 %v5800_v9, %s4551_s9  ;;  %v5874_v25 = vor.u32 %v3257_v48, %v3253_v57  ;;  %v5878_v47 = vcombine.high %v5858_v52, %v6576_v19  ;;  %v5882_v38 = vcombine.high %v5861_v40, %v6576_v19  ;;  %v5884_v1 = vor.u32 %v3264_v21, %v3260_v35 }
 0x310   : > { %3086 = vrot.lane.b32.xlu1 %v5802_v45, %s4551_s9  ;;  %v5886_v7 = vor.u32 %v3271_v10, %v3267_v12  ;;  %v5889_v34 = vrot.slane %v2809_v30, %v4862_v33  ;;  %v2843_v16 = vcombine.high %v5757_v27, %v5760_v54  ;;  %v3742_v0 = vcombine.low %v5812_v50, %v5828_v46 }
 0x311   : > { %v3750_v24 = vcombine.low %v5818_v22, %v5834_v17  ;;  %v2869_v5 = vshrl.u32 %v5878_v47, 16  ;;  %v2870_v60 = vshrl.u32 %v5882_v38, 16  ;;  %v3315_v43 = vcombine.low %v5843_v39, %v5874_v25 }
 0x312   : > { %v3323_v4 = vcombine.low %v5865_v6, %v5886_v7  ;;  %v5906_v27 = vrot.slane %v2843_v16, %v4862_v33  ;;  %v3708_v54 = vcombine.low %v5805_v63, %v5821_v61  ;;  %v3716_v49 = vcombine.low %v5815_v2, %v5831_v36 }
 0x313   : > { %2927 = vrot.lane.b32.xlu0 %v5778_v28, %s4548_s8  ;;  %v5914_v13 = vpack.i.b16 %v2870_v60, %v2869_v5  ;;  %v3281_v28 = vcombine.low %v5837_v41, %v5872_v32  ;;  %v3289_v14 = vcombine.low %v5850_v56, %v5884_v1  ;;  %v2863_v23 = vshrl.u32 %v5858_v52, 16 }
 0x314   : > { %2929 = vrot.lane.b32.xlu1 %v5782_v51, %s4548_s8  ;;  %v2874_v42 = vpack.i.b16 %v5906_v27, %v5889_v34  ;;  %v5924_v51 = vrot.slane %v3742_v0, %v6589_v62  ;;  %v5927_v8 = vrot.slane %v3750_v24, %v6589_v62  ;;  %v2864_v11 = vshrl.u32 %v5861_v40, 16 }
 0x315   : > { %v2868_v3 = vpack.i.b16 %v5882_v38, %v5878_v47  ;;  %v5935_v58 = vrot.slane %v3315_v43, %v6589_v62  ;;  %v5938_v37 = vrot.slane %v3323_v4, %v6589_v62  ;;  %v5943_v57 = vrot.slane %v3708_v54, %v6589_v62 }
 0x316   : > { %v5946_v55 = vrot.slane %v3716_v49, %v6589_v62  ;;  %v5948_v53 = vpack.i.b16 %v2864_v11, %v2863_v23  ;;  %v5951_v31 = vrot.slane %v3281_v28, %v6589_v62  ;;  %v3758_v44 = vcombine.low %v5924_v51, %v5927_v8 }
 0x317   : > { %2931 = vrot.lane.b32.xlu0 %v5786_v59, %s4548_s8  ;;  %v5954_v59 = vrot.slane %v3289_v14, %v6589_v62  ;;  %v2876_v30 = vshrl.u32 %v5906_v27, 16  ;;  %v5998_v16 = vcombine.high %v5889_v34, %v6576_v19  ;;  %v6002_v0 = vcombine.high %v5906_v27, %v6576_v19 }
 0x318   : > { %2933 = vrot.lane.b32.xlu1 %v5790_v15, %s4548_s8  ;;  %v3331_v15 = vcombine.low %v5935_v58, %v5938_v37  ;;  %v3724_v35 = vcombine.low %v5943_v57, %v5946_v55  ;;  %v5969_v48 = vrot.slane %v3758_v44, %v4862_v33 }
 0x319   : > { %v3297_v20 = vcombine.low %v5951_v31, %v5954_v59  ;;  %v2881_v5 = vshrl.u32 %v5998_v16, 16  ;;  %v2882_v43 = vshrl.u32 %v6002_v0, 16 }
 0x31a   : > { %v3774_v27 = vcombine.high %v5969_v48, %v6576_v19 }
 0x31b   : > { %2935 = vrot.lane.b32.xlu0 %v5792_v29, %s4548_s8  ;;  %v5974_v29 = vrot.slane %v3331_v15, %v4862_v33  ;;  %v5982_v21 = vrot.slane %v3297_v20, %v4862_v33  ;;  %v6014_v4 = vpack.i.b16 %v2882_v43, %v2881_v5 }
 0x31c   : > { %2937 = vrot.lane.b32.xlu1 %v5798_v26, %s4548_s8  ;;  %v5979_v26 = vrot.slane %v3724_v35, %v4862_v33  ;;  %v3786_v15 = vshrl.u32 %v3774_v27, 16 }
 0x31d   : > { %v3313_v54 = vcombine.high %v5982_v21, %v6576_v19 }
 0x31e   : > { %v3740_v47 = vcombine.high %v5979_v26, %v6576_v19 }
 0x31f   : > { %2939 = vrot.lane.b32.xlu0 %v5800_v9, %s4548_s8  ;;  %v3358_v35 = vshrl.u32 %v3313_v54, 16 }
 0x320   : > { %2941 = vrot.lane.b32.xlu1 %v5802_v45, %s4548_s8  ;;  %v2875_v45 = vshrl.u32 %v5889_v34, 16  ;;  %v3785_v20 = vshrl.u32 %v3740_v47, 16 }
 0x322   : > { %v6004_v24 = vpack.i.b16 %v2876_v30, %v2875_v45 }
 0x323   : > { %3974 = vrot.lane.b32.xlu0 %v5805_v63, %s4551_s9 }
 0x324   : > { %3976 = vrot.lane.b32.xlu1 %v5812_v50, %s4551_s9 }
 0x327   : > { %3978 = vrot.lane.b32.xlu0 %v5815_v2, %s4551_s9 }
 0x328   : > { %3980 = vrot.lane.b32.xlu1 %v5818_v22, %s4551_s9 }
 0x32b   : > { %3982 = vrot.lane.b32.xlu0 %v5821_v61, %s4551_s9 }
 0x32c   : > { %3984 = vrot.lane.b32.xlu1 %v5828_v46, %s4551_s9 }
 0x32f   : > { %3986 = vrot.lane.b32.xlu0 %v5831_v36, %s4551_s9 }
 0x330   : > { %3988 = vrot.lane.b32.xlu1 %v5834_v17, %s4551_s9 }
 0x333   : > { %3829 = vrot.lane.b32.xlu0 %v5805_v63, %s4548_s8  ;;  %v3780_v63 = vshrl.u32 %v5969_v48, 16 }
 0x334   : > { %3831 = vrot.lane.b32.xlu1 %v5812_v50, %s4548_s8  ;;  %v3332_v50 = vcombine.high %v5935_v58, %v5938_v37 }
 0x337   : > { %3833 = vrot.lane.b32.xlu0 %v5815_v2, %s4548_s8  ;;  %v3779_v2 = vshrl.u32 %v5979_v26, 16 }
 0x338   : > { %3835 = vrot.lane.b32.xlu1 %v5818_v22, %s4548_s8  ;;  %v3298_v22 = vcombine.high %v5951_v31, %v5954_v59 }
 0x33b   : > { %3837 = vrot.lane.b32.xlu0 %v5821_v61, %s4548_s8  ;;  %v3781_v61 = vpack.i.b16 %v3780_v63, %v3779_v2  ;;  %v3787_v63 = vpack.i.b16 %v3786_v15, %v3785_v20 }
 0x33c   : > { %3839 = vrot.lane.b32.xlu1 %v5828_v46, %s4548_s8  ;;  %v3346_v46 = vrot.slane %v3332_v50, %v4862_v33 }
 0x33e   : > { %v3365_v49 = vshrl.u32 %v3346_v46, 16 }
 0x33f   : > { %3841 = vrot.lane.b32.xlu0 %v5831_v36, %s4548_s8  ;;  %v3759_v36 = vcombine.high %v5924_v51, %v5927_v8  ;;  %v3348_v8 = vcombine.high %v3346_v46, %v6576_v19 }
 0x340   : > { %3843 = vrot.lane.b32.xlu1 %v5834_v17, %s4548_s8  ;;  %v3312_v17 = vrot.slane %v3298_v22, %v4862_v33 }
 0x341   : > { %v3371_v5 = vshrl.u32 %v3348_v8, 16 }
 0x342   : > { %v3364_v14 = vshrl.u32 %v3312_v17, 16  ;;  %v3314_v37 = vcombine.high %v3312_v17, %v6576_v19 }
 0x343   : > { %3547 = vrot.lane.b32.xlu0 %v5837_v41, %s4551_s9 }
 0x344   : > { %3549 = vrot.lane.b32.xlu1 %v5843_v39, %s4551_s9  ;;  %v3366_v51 = vpack.i.b16 %v3365_v49, %v3364_v14  ;;  %v3370_v2 = vshrl.u32 %v3314_v37, 16 }
 0x347   : > { %3551 = vrot.lane.b32.xlu0 %v5850_v56, %s4551_s9 }
 0x348   : > { %3553 = vrot.lane.b32.xlu1 %v5865_v6, %s4551_s9 }
 0x34b   : > { %3555 = vrot.lane.b32.xlu0 %v5872_v32, %s4551_s9 }
 0x34c   : > { %3557 = vrot.lane.b32.xlu1 %v5874_v25, %s4551_s9 }
 0x34f   : > { %3559 = vrot.lane.b32.xlu0 %v5884_v1, %s4551_s9 }
 0x350   : > { %3561 = vrot.lane.b32.xlu1 %v5886_v7, %s4551_s9  ;;  %s4571_s9 = smov 64  }
 0x353   : > { %3402 = vrot.lane.b32.xlu0 %v5837_v41, %s4548_s8  ;;  %v3725_v41 = vcombine.high %v5943_v57, %v5946_v55 }
 0x354   : > { %3404 = vrot.lane.b32.xlu1 %v5843_v39, %s4548_s8  ;;  %v3363_v39 = vpack.i.b16 %v3346_v46, %v3312_v17  ;;  %v3372_v17 = vpack.i.b16 %v3371_v5, %v3370_v2 }
 0x357   : > { %3406 = vrot.lane.b32.xlu0 %v5850_v56, %s4548_s8  ;;  %v3353_v56 = vshrl.u32 %v5974_v29, 16 }
 0x358   : > { %3408 = vrot.lane.b32.xlu1 %v5865_v6, %s4548_s8  ;;  %v3773_v6 = vrot.slane %v3759_v36, %v4862_v33 }
 0x35a   : > { %v3792_v28 = vshrl.u32 %v3773_v6, 16  ;;  %v3775_v58 = vcombine.high %v3773_v6, %v6576_v19 }
 0x35b   : > { %3410 = vrot.lane.b32.xlu0 %v5872_v32, %s4548_s8  ;;  %v3352_v32 = vshrl.u32 %v5982_v21, 16 }
 0x35c   : > { %3412 = vrot.lane.b32.xlu1 %v5874_v25, %s4548_s8  ;;  %v3739_v25 = vrot.slane %v3725_v41, %v4862_v33  ;;  %v3798_v50 = vshrl.u32 %v3775_v58, 16 }
 0x35e   : > { %v3790_v34 = vpack.i.b16 %v3773_v6, %v3739_v25  ;;  %v3741_v57 = vcombine.high %v3739_v25, %v6576_v19 }
 0x35f   : > { %3414 = vrot.lane.b32.xlu0 %v5884_v1, %s4548_s8  ;;  %v3354_v1 = vpack.i.b16 %v3353_v56, %v3352_v32 }
 0x360   : > { %3416 = vrot.lane.b32.xlu1 %v5886_v7, %s4548_s8  ;;  %s4572_s8 = smov 32   ;;  %v3347_v7 = vcombine.high %v5974_v29, %v6576_v19  ;;  %v3796_v44 = vpack.i.b16 %v3775_v58, %v3741_v57 }
 0x362   : > { %v3357_v38 = vpack.i.b16 %v3347_v7, %v3313_v54  ;;  %v3359_v31 = vshrl.u32 %v3347_v7, 16 }
 0x363   : > { %2888 = vrot.lane.b32.xlu0 %v5914_v13, %s4570_s18  ;;  %v3784_v13 = vpack.i.b16 %v3774_v27, %v3740_v47 }
 0x364   : > { %2890 = vrot.lane.b32.xlu1 %v2874_v42, %s4571_s9  ;;  %v3791_v42 = vshrl.u32 %v3739_v25, 16  ;;  %v3360_v30 = vpack.i.b16 %v3359_v31, %v3358_v35 }
 0x367   : > { %3800 = vrot.lane.b32.xlu0 %v3781_v61, %s4558_s16  ;;  %v3797_v61 = vshrl.u32 %v3741_v57, 16 }
 0x368   : > { %2884 = vrot.lane.b32.xlu1 %v5948_v53, %s4558_s16  ;;  %v3369_v53 = vpack.i.b16 %v3348_v8, %v3314_v37 }
 0x369   : > { %v3799_v56 = vpack.i.b16 %v3798_v50, %v3797_v61 }
 0x36b   : > { %3379 = vrot.lane.b32.xlu0 %v3363_v39, %s4571_s9 }
 0x36c   : > { %2886 = vrot.lane.b32.xlu1 %v2868_v3, %s4572_s8  ;;  %v3793_v3 = vpack.i.b16 %v3792_v28, %v3791_v42 }
 0x36f   : > { %3373 = vrot.lane.b32.xlu0 %v3354_v1, %s4558_s16 }
 0x370   : > { %3806 = vrot.lane.b32.xlu1 %v3790_v34, %s4571_s9 }
 0x373   : > { %3375 = vrot.lane.b32.xlu0 %v3357_v38, %s4572_s8 }
 0x374   : > { %3802 = vrot.lane.b32.xlu1 %v3784_v13, %s4572_s8 }
 0x375   : > { %v3073_v23 = vpop.permute.xlu0 %3072 }
 0x376   : > { %v3075_v11 = vpop.permute.xlu1 %3074 }
 0x377   : > { %3381 = vrot.lane.b32.xlu0 %v3366_v51, %s4573_s29 }
 0x378   : > { %3808 = vrot.lane.b32.xlu1 %v3793_v3, %s4573_s29 }
 0x379   : > { %v3077_v55 = vpop.permute.xlu0 %3076 }
 0x37a   : > { %v3079_v59 = vpop.permute.xlu1 %3078 }
 0x37b   : > { %3383 = vrot.lane.b32.xlu0 %v3369_v53, %s4574_s30 }
 0x37c   : > { %3810 = vrot.lane.b32.xlu1 %v3796_v44, %s4574_s30 }
 0x37d   : > { %v3081_v45 = vpop.permute.xlu0 %3080 }
 0x37e   : > { %v3083_v43 = vpop.permute.xlu1 %3082  ;;  %v3096_v22 = vcombine.low %v3073_v23, %v3081_v45 }
 0x37f   : > { %3377 = vrot.lane.b32.xlu0 %v3360_v30, %s4570_s18  ;;  %v3130_v46 = vcombine.low %v3075_v11, %v3083_v43 }
 0x380   : > { %3804 = vrot.lane.b32.xlu1 %v3787_v63, %s4570_s18  ;;  %v3103_v32 = vrot.slane %v3096_v22, %v6589_v62 }
 0x381   : > { %v3085_v36 = vpop.permute.xlu0 %3084  ;;  %v3137_v1 = vrot.slane %v3130_v46, %v6589_v62 }
 0x382   : > { %v3104_v41 = vcombine.low %v3077_v55, %v3085_v36  ;;  %v3087_v39 = vpop.permute.xlu1 %3086 }
 0x383   : > { %v3138_v6 = vcombine.low %v3079_v59, %v3087_v39  ;;  %3385 = vrot.lane.b32.xlu0 %v3372_v17, %s4568_s17 }
 0x384   : > { %v3111_v25 = vrot.slane %v3104_v41, %v6589_v62  ;;  %3812 = vrot.lane.b32.xlu1 %v3799_v56, %s4568_s17 }
 0x385   : > { %v3145_v7 = vrot.slane %v3138_v6, %v6589_v62  ;;  %v2928_v34 = vpop.permute.xlu0 %2927 }
 0x386   : > { %v3112_v27 = vcombine.low %v3103_v32, %v3111_v25  ;;  %v3113_v54 = vcombine.high %v3103_v32, %v3111_v25  ;;  %v2930_v47 = vpop.permute.xlu1 %2929 }
 0x387   : > { %v3146_v38 = vcombine.low %v3137_v1, %v3145_v7  ;;  %v3147_v49 = vcombine.high %v3137_v1, %v3145_v7 }
 0x388   : > { %v6131_v13 = vrot.slane %v3112_v27, %v4862_v33  ;;  %v6134_v28 = vrot.slane %v3113_v54, %v4862_v33 }
 0x389   : > { %v6137_v14 = vrot.slane %v3146_v38, %v4862_v33  ;;  %v6140_v42 = vrot.slane %v3147_v49, %v4862_v33  ;;  %v2932_v23 = vpop.permute.xlu0 %2931 }
 0x38a   : > { %v2934_v51 = vpop.permute.xlu1 %2933 }
 0x38b   : > { %v3178_v8 = vpack.i.b16 %v6140_v42, %v6134_v28 }
 0x38d   : > { %v2936_v3 = vpop.permute.xlu0 %2935  ;;  %3194 = vrot.lane.b32.xlu1 %v3178_v8, %s4571_s9 }
 0x38e   : > { %v2938_v58 = vpop.permute.xlu1 %2937  ;;  %v2951_v37 = vcombine.low %v2928_v34, %v2936_v3 }
 0x38f   : > { %v2985_v57 = vcombine.low %v2930_v47, %v2938_v58 }
 0x390   : > { %v2958_v44 = vrot.slane %v2951_v37, %v6589_v62 }
 0x391   : > { %v2940_v55 = vpop.permute.xlu0 %2939  ;;  %v2992_v35 = vrot.slane %v2985_v57, %v6589_v62 }
 0x392   : > { %v2959_v53 = vcombine.low %v2932_v23, %v2940_v55  ;;  %v2942_v31 = vpop.permute.xlu1 %2941 }
 0x393   : > { %v2993_v59 = vcombine.low %v2934_v51, %v2942_v31 }
 0x394   : > { %v2966_v15 = vrot.slane %v2959_v53, %v6589_v62 }
 0x395   : > { %v3000_v20 = vrot.slane %v2993_v59, %v6589_v62  ;;  %v3975_v45 = vpop.permute.xlu0 %3974 }
 0x396   : > { %v2967_v30 = vcombine.low %v2958_v44, %v2966_v15  ;;  %v2968_v5 = vcombine.high %v2958_v44, %v2966_v15  ;;  %v3977_v43 = vpop.permute.xlu1 %3976 }
 0x397   : > { %v3001_v63 = vcombine.low %v2992_v35, %v3000_v20  ;;  %v3002_v50 = vcombine.high %v2992_v35, %v3000_v20 }
 0x398   : > { %v6152_v2 = vrot.slane %v2967_v30, %v4862_v33  ;;  %v6155_v22 = vrot.slane %v2968_v5, %v4862_v33 }
 0x399   : > { %v6158_v61 = vrot.slane %v3001_v63, %v4862_v33  ;;  %v6161_v46 = vrot.slane %v3002_v50, %v4862_v33  ;;  %v3979_v36 = vpop.permute.xlu0 %3978  ;;  %v3167_v63 = vshrl.u32 %v6131_v13, 16  ;;  %v3168_v50 = vshrl.u32 %v6137_v14, 16 }
 0x39a   : > { %v3981_v17 = vpop.permute.xlu1 %3980  ;;  %v6165_v41 = vcombine.high %v6155_v22, %v6576_v19 }
 0x39b   : > { %v3033_v39 = vpack.i.b16 %v6161_v46, %v6155_v22  ;;  %v6171_v56 = vcombine.high %v6161_v46, %v6576_v19 }
 0x39c   : > { %v3040_v6 = vshrl.u32 %v6165_v41, 16 }
 0x39d   : > { %v3983_v25 = vpop.permute.xlu0 %3982  ;;  %3049 = vrot.lane.b32.xlu0 %v3033_v39, %s4571_s9  ;;  %v3041_v34 = vshrl.u32 %v6171_v56, 16 }
 0x39e   : > { %v3985_v1 = vpop.permute.xlu1 %3984  ;;  %v3998_v27 = vcombine.low %v3975_v45, %v3983_v25  ;;  %v6207_v25 = vcombine.high %v6131_v13, %v6576_v19 }
 0x39f   : > { %v6180_v54 = vpack.i.b16 %v3041_v34, %v3040_v6  ;;  %v4032_v47 = vcombine.low %v3977_v43, %v3985_v1  ;;  %v3169_v6 = vpack.i.b16 %v3168_v50, %v3167_v63  ;;  %v6211_v1 = vcombine.high %v6137_v14, %v6576_v19 }
 0x3a0   : > { %v4005_v8 = vrot.slane %v3998_v27, %v6589_v62 }
 0x3a1   : > { %v3987_v38 = vpop.permute.xlu0 %3986  ;;  %v4039_v58 = vrot.slane %v4032_v47, %v6589_v62 }
 0x3a2   : > { %v4006_v49 = vcombine.low %v3979_v36, %v3987_v38  ;;  %v3989_v23 = vpop.permute.xlu1 %3988 }
 0x3a3   : > { %v4040_v51 = vcombine.low %v3981_v17, %v3989_v23 }
 0x3a4   : > { %v4013_v3 = vrot.slane %v4006_v49, %v6589_v62 }
 0x3a5   : > { %v4047_v37 = vrot.slane %v4040_v51, %v6589_v62  ;;  %v3830_v57 = vpop.permute.xlu0 %3829  ;;  %v3172_v51 = vpack.i.b16 %v6211_v1, %v6207_v25 }
 0x3a6   : > { %v4014_v55 = vcombine.low %v4005_v8, %v4013_v3  ;;  %v4015_v53 = vcombine.high %v4005_v8, %v4013_v3  ;;  %v3832_v31 = vpop.permute.xlu1 %3831  ;;  %v3179_v8 = vshrl.u32 %v6134_v28, 16  ;;  %v3180_v3 = vshrl.u32 %v6140_v42, 16 }
 0x3a7   : > { %v4048_v59 = vcombine.low %v4039_v58, %v4047_v37  ;;  %v4049_v44 = vcombine.high %v4039_v58, %v4047_v37 }
 0x3a8   : > { %v6187_v15 = vrot.slane %v4014_v55, %v4862_v33  ;;  %v6190_v35 = vrot.slane %v4015_v53, %v4862_v33  ;;  %v3181_v50 = vpack.i.b16 %v3180_v3, %v3179_v8 }
 0x3a9   : > { %v6193_v20 = vrot.slane %v4048_v59, %v4862_v33  ;;  %v6196_v45 = vrot.slane %v4049_v44, %v4862_v33  ;;  %v3834_v30 = vpop.permute.xlu0 %3833 }
 0x3aa   : > { %v3836_v5 = vpop.permute.xlu1 %3835 }
 0x3ab   : > { %v4080_v43 = vpack.i.b16 %v6196_v45, %v6190_v35 }
 0x3ad   : > { %v3838_v17 = vpop.permute.xlu0 %3837  ;;  %4096 = vrot.lane.b32.xlu1 %v4080_v43, %s4571_s9 }
 0x3ae   : > { %v3840_v39 = vpop.permute.xlu1 %3839  ;;  %v3853_v34 = vcombine.low %v3830_v57, %v3838_v17 }
 0x3af   : > { %v3887_v27 = vcombine.low %v3832_v31, %v3840_v39 }
 0x3b0   : > { %v3860_v58 = vrot.slane %v3853_v34, %v6589_v62 }
 0x3b1   : > { %v3842_v47 = vpop.permute.xlu0 %3841  ;;  %3188 = vrot.lane.b32.xlu1 %v3169_v6, %s4558_s16  ;;  %v3894_v57 = vrot.slane %v3887_v27, %v6589_v62 }
 0x3b2   : > { %v3861_v38 = vcombine.low %v3834_v30, %v3842_v47  ;;  %v3844_v49 = vpop.permute.xlu1 %3843  ;;  %v6225_v30 = vcombine.high %v6134_v28, %v6576_v19  ;;  %v3034_v47 = vshrl.u32 %v6155_v22, 16  ;;  %v6258_v22 = vcombine.high %v6152_v2, %v6576_v19 }
 0x3b3   : > { %v3895_v23 = vcombine.low %v3836_v5, %v3844_v49  ;;  %v6229_v5 = vcombine.high %v6140_v42, %v6576_v19  ;;  %v3035_v49 = vshrl.u32 %v6161_v46, 16  ;;  %v6262_v46 = vcombine.high %v6158_v61, %v6576_v19 }
 0x3b4   : > { %v3868_v37 = vrot.slane %v3861_v38, %v6589_v62 }
 0x3b5   : > { %v3902_v55 = vrot.slane %v3895_v23, %v6589_v62  ;;  %v3548_v53 = vpop.permute.xlu0 %3547  ;;  %3190 = vrot.lane.b32.xlu1 %v3172_v51, %s4572_s8  ;;  %v3184_v27 = vpack.i.b16 %v6229_v5, %v6225_v30  ;;  %v3022_v23 = vshrl.u32 %v6152_v2, 16  ;;  %v3023_v51 = vshrl.u32 %v6158_v61, 16 }
 0x3b6   : > { %v3869_v31 = vcombine.low %v3860_v58, %v3868_v37  ;;  %v3870_v59 = vcombine.high %v3860_v58, %v3868_v37  ;;  %v3550_v44 = vpop.permute.xlu1 %3549  ;;  %v3036_v37 = vpack.i.b16 %v3035_v49, %v3034_v47  ;;  %v6274_v47 = vcombine.high %v6190_v35, %v6576_v19 }
 0x3b7   : > { %v3903_v43 = vcombine.low %v3894_v57, %v3902_v55  ;;  %v3904_v63 = vcombine.high %v3894_v57, %v3902_v55  ;;  %v3024_v57 = vpack.i.b16 %v3023_v51, %v3022_v23  ;;  %v4030_v55 = vcombine.high %v6187_v15, %v6576_v19 }
 0x3b8   : > { %v6232_v17 = vrot.slane %v3869_v31, %v4862_v33  ;;  %v6235_v39 = vrot.slane %v3870_v59, %v4862_v33  ;;  %v4064_v31 = vcombine.high %v6193_v20, %v6576_v19  ;;  %v6278_v49 = vcombine.high %v6196_v45, %v6576_v19 }
 0x3b9   : > { %v6238_v6 = vrot.slane %v3903_v43, %v4862_v33  ;;  %v6241_v34 = vrot.slane %v3904_v63, %v4862_v33  ;;  %v3552_v28 = vpop.permute.xlu0 %3551  ;;  %3196 = vrot.lane.b32.xlu1 %v3181_v50, %s4573_s29  ;;  %v4069_v23 = vshrl.u32 %v6187_v15, 16  ;;  %v4070_v51 = vshrl.u32 %v6193_v20, 16 }
 0x3ba   : > { %v3554_v42 = vpop.permute.xlu1 %3553  ;;  %v3924_v8 = vshrl.u32 %v6232_v17, 16  ;;  %v4075_v11 = vshrl.u32 %v4030_v55, 16 }
 0x3bb   : > { %v3935_v38 = vpack.i.b16 %v6241_v34, %v6235_v39 }
 0x3bd   : > { %v3556_v3 = vpop.permute.xlu0 %3555  ;;  %3198 = vrot.lane.b32.xlu1 %v3184_v27, %s4574_s30  ;;  %3951 = vrot.lane.b32.xlu0 %v3935_v38, %s4571_s9  ;;  %v3027_v38 = vpack.i.b16 %v6262_v46, %v6258_v22 }
 0x3be   : > { %v3558_v58 = vpop.permute.xlu1 %3557  ;;  %v3571_v59 = vcombine.low %v3548_v53, %v3556_v3 }
 0x3bf   : > { %v3605_v43 = vcombine.low %v3550_v44, %v3558_v58  ;;  %v4074_v44 = vpack.i.b16 %v4064_v31, %v4030_v55 }
 0x3c1   : > { %v3560_v63 = vpop.permute.xlu0 %3559  ;;  %3051 = vrot.lane.b32.xlu1 %v3036_v37, %s4573_s29  ;;  %3043 = vrot.lane.b32.xlu0 %v3024_v57, %s4558_s16  ;;  %v6289_v58 = vrot.slane %v3605_v43, %v6589_v62  ;;  %v3174_v43 = vshrl.u32 %v6211_v1, 16 }
 0x3c2   : > { %v3579_v50 = vcombine.low %v3552_v28, %v3560_v63  ;;  %v3562_v27 = vpop.permute.xlu1 %3561  ;;  %v6283_v28 = vrot.slane %v3571_v59, %v6589_v62  ;;  %v4086_v59 = vpack.i.b16 %v6278_v49, %v6274_v47 }
 0x3c3   : > { %v3613_v53 = vcombine.low %v3554_v42, %v3562_v27 }
 0x3c4   : > { %v6286_v3 = vrot.slane %v3579_v50, %v6589_v62  ;;  %v3173_v50 = vshrl.u32 %v6207_v25, 16 }
 0x3c5   : > { %v6292_v37 = vrot.slane %v3613_v53, %v6589_v62  ;;  %v3403_v57 = vpop.permute.xlu0 %3402  ;;  %4092 = vrot.lane.b32.xlu1 %v4074_v44, %s4572_s8  ;;  %3045 = vrot.lane.b32.xlu0 %v3027_v38, %s4572_s8  ;;  %v4071_v53 = vpack.i.b16 %v4070_v51, %v4069_v23  ;;  %v3925_v44 = vshrl.u32 %v6238_v6, 16  ;;  %v4076_v23 = vshrl.u32 %v4064_v31, 16 }
 0x3c6   : > { %v3587_v42 = vcombine.low %v6283_v28, %v6286_v3  ;;  %v3405_v63 = vpop.permute.xlu1 %3404  ;;  %v3175_v1 = vpack.i.b16 %v3174_v43, %v3173_v50  ;;  %v3885_v51 = vcombine.high %v6232_v17, %v6576_v19  ;;  %v4081_v50 = vshrl.u32 %v6190_v35, 16 }
 0x3c7   : > { %v3621_v27 = vcombine.low %v6289_v58, %v6292_v37  ;;  %v3926_v7 = vpack.i.b16 %v3925_v44, %v3924_v8  ;;  %v4082_v8 = vshrl.u32 %v6196_v45, 16  ;;  %v4077_v55 = vpack.i.b16 %v4076_v23, %v4075_v11 }
 0x3c8   : > { %v6307_v38 = vrot.slane %v3587_v42, %v4862_v33  ;;  %v3919_v42 = vcombine.high %v6238_v6, %v6576_v19  ;;  %v3930_v43 = vshrl.u32 %v3885_v51, 16  ;;  %v4088_v35 = vshrl.u32 %v6278_v49, 16 }
 0x3c9   : > { %v6310_v36 = vrot.slane %v3621_v27, %v4862_v33  ;;  %v3407_v32 = vpop.permute.xlu0 %3406  ;;  %4100 = vrot.lane.b32.xlu1 %v4086_v59, %s4574_s30  ;;  %4090 = vrot.lane.b32.xlu0 %v4071_v53, %s4558_s16  ;;  %v4083_v9 = vpack.i.b16 %v4082_v8, %v4081_v50  ;;  %v3936_v11 = vshrl.u32 %v6235_v39, 16  ;;  %v3937_v23 = vshrl.u32 %v6241_v34, 16 }
 0x3ca   : > { %v3409_v25 = vpop.permute.xlu1 %3408  ;;  %v3929_v31 = vpack.i.b16 %v3919_v42, %v3885_v51  ;;  %v3931_v53 = vshrl.u32 %v3919_v42, 16  ;;  %v3886_v51 = vcombine.high %v6235_v39, %v6576_v19  ;;  %v3920_v42 = vcombine.high %v6241_v34, %v6576_v19 }
 0x3cb   : > { %v6596_v39 = vpack.i.b16 %v5969_v48, %v5979_v26 }
 0x3cc   : > { %v3932_v45 = vpack.i.b16 %v3931_v53, %v3930_v43  ;;  %v3941_v43 = vpack.i.b16 %v3920_v42, %v3886_v51  ;;  %v3028_v53 = vshrl.u32 %v6258_v22, 16 }
 0x3cd   : > { %v3411_v18 = vpop.permute.xlu0 %3410  ;;  %3192 = vrot.lane.b32.xlu1 %v3175_v1, %s4570_s18  ;;  %3945 = vrot.lane.b32.xlu0 %v3926_v7, %s4558_s16  ;;  %v4087_v7 = vshrl.u32 %v6274_v47, 16 }
 0x3ce   : > { %v3413_v59 = vpop.permute.xlu1 %3412  ;;  %v3426_v44 = vcombine.low %v3403_v57, %v3411_v18 }
 0x3cf   : > { %v3460_v60 = vcombine.low %v3405_v63, %v3413_v59  ;;  %v4089_v50 = vpack.i.b16 %v4088_v35, %v4087_v7 }
 0x3d0   : > { %v3433_v18 = vrot.slane %v3426_v44, %v6589_v62  ;;  %v3029_v44 = vshrl.u32 %v6262_v46, 16  ;;  %v3186_v46 = vshrl.u32 %v6229_v5, 16 }
 0x3d1   : > { %v3415_v10 = vpop.permute.xlu0 %3414  ;;  %4094 = vrot.lane.b32.xlu1 %v4077_v55, %s4570_s18  ;;  %3947 = vrot.lane.b32.xlu0 %v3929_v31, %s4572_s8  ;;  %v3467_v63 = vrot.slane %v3460_v60, %v6589_v62  ;;  %v3938_v60 = vpack.i.b16 %v3937_v23, %v3936_v11 }
 0x3d2   : > { %v3434_v27 = vcombine.low %v3407_v32, %v3415_v10  ;;  %v3417_v1 = vpop.permute.xlu1 %3416 }
 0x3d3   : > { %v3468_v12 = vcombine.low %v3409_v25, %v3417_v1  ;;  %v6597_v1 = vpack.i.b16 %v5861_v40, %v5858_v52  ;;  %v3030_v52 = vpack.i.b16 %v3029_v44, %v3028_v53  ;;  %v3185_v40 = vshrl.u32 %v6225_v30, 16 }
 0x3d4   : > { %v3441_v57 = vrot.slane %v3434_v27, %v6589_v62  ;;  %v3942_v30 = vshrl.u32 %v3886_v51, 16 }
 0x3d5   : > { %v3475_v10 = vrot.slane %v3468_v12, %v6589_v62  ;;  %v2889_v32 = vpop.permute.xlu0 %2888  ;;  %3949 = vrot.lane.b32.xlu1 %v3932_v45, %s4570_s18  ;;  %4098 = vrot.lane.b32.xlu0 %v4083_v9, %s4573_s29 }
 0x3d6   : > { %v3442_v47 = vcombine.low %v3433_v18, %v3441_v57  ;;  %v3443_v49 = vcombine.high %v3433_v18, %v3441_v57  ;;  %v2891_v25 = vpop.permute.xlu1 %2890 }
 0x3d7   : > { %v3476_v59 = vcombine.low %v3467_v63, %v3475_v10  ;;  %v3477_v27 = vcombine.high %v3467_v63, %v3475_v10 }
 0x3d8   : > { %v6341_v62 = vrot.slane %v3442_v47, %v4862_v33  ;;  %v3457_v12 = vrot.slane %v3443_v49, %v4862_v33  ;;  %v3588_v49 = vcombine.high %v6283_v28, %v6286_v3 }
 0x3d9   : > { %v6345_v9 = vrot.slane %v3476_v59, %v4862_v33  ;;  %v3491_v8 = vrot.slane %v3477_v27, %v4862_v33  ;;  %v3801_v55 = vpop.permute.xlu0 %3800  ;;  %4102 = vrot.lane.b32.xlu1 %v4089_v50, %s4568_s17  ;;  %3953 = vrot.lane.b32.xlu0 %v3938_v60, %s4573_s29  ;;  %v3622_v59 = vcombine.high %v6289_v58, %v6292_v37  ;;  %v3943_v60 = vshrl.u32 %v3920_v42, 16 }
 0x3da   : > { %v3816_v34 = vsel %vm436_vm13, %v6596_v39, %v3801_v55  ;;  %v2885_v31 = vpop.permute.xlu1 %2884  ;;  %v3497_v45 = vshrl.u32 %v6341_v62, 16  ;;  %v3458_v57 = vcombine.high %v6341_v62, %v6576_v19  ;;  %v6598_v27 = vpack.i.b16 %v5974_v29, %v5982_v21 }
 0x3db   : > { %v2900_v7 = vsel %vm436_vm13, %v6597_v1, %v2885_v31  ;;  %v3508_v35 = vpack.i.b16 %v3491_v8, %v3457_v12  ;;  %v3498_v11 = vshrl.u32 %v6345_v9, 16  ;;  %v3496_v26 = vpack.i.b16 %v6345_v9, %v6341_v62 }
 0x3dc   : > { %v3492_v63 = vcombine.high %v6345_v9, %v6576_v19  ;;  %v3187_v39 = vpack.i.b16 %v3186_v46, %v3185_v40  ;;  %v3509_v31 = vshrl.u32 %v3457_v12, 16  ;;  %v3510_v51 = vshrl.u32 %v3491_v8, 16 }
 0x3dd   : > { %3524 = vrot.lane.b32.xlu1 %v3508_v35, %s4571_s9  ;;  %v6363_v48 = vpop.permute.xlu0 %3379  ;;  %3955 = vrot.lane.b32.xlu0 %v3941_v43, %s4574_s30  ;;  %v3499_v18 = vpack.i.b16 %v3498_v11, %v3497_v45  ;;  %v3602_v28 = vrot.slane %v3588_v49, %v4862_v33  ;;  %v3636_v3 = vrot.slane %v3622_v59, %v4862_v33  ;;  %v3642_v33 = vshrl.u32 %v6307_v38, 16 }
 0x3de   : > { %v2887_v22 = vpop.permute.xlu1 %2886  ;;  %v3502_v55 = vpack.i.b16 %v3492_v63, %v3458_v57  ;;  %v3944_v21 = vpack.i.b16 %v3943_v60, %v3942_v30  ;;  %v3511_v42 = vpack.i.b16 %v3510_v51, %v3509_v31  ;;  %v3459_v43 = vcombine.high %v3457_v12, %v6576_v19 }
 0x3df   : > { %v2903_v23 = vsel %vm2901_vm0, %v2900_v7, %v2887_v22  ;;  %v3493_v53 = vcombine.high %v3491_v8, %v6576_v19  ;;  %v3653_v7 = vpack.i.b16 %v3636_v3, %v3602_v28  ;;  %v3503_v45 = vshrl.u32 %v3458_v57, 16 }
 0x3e0   : > { %v2906_v10 = vsel %vm2904_vm1, %v2903_v23, %v2889_v32  ;;  %v3504_v11 = vshrl.u32 %v3492_v63, 16  ;;  %v3643_v22 = vshrl.u32 %v6310_v36, 16  ;;  %v3515_v23 = vshrl.u32 %v3459_v43, 16 }
 0x3e1   : > { %3518 = vrot.lane.b32.xlu1 %v3499_v18, %s4558_s16  ;;  %v3374_v47 = vpop.permute.xlu0 %3373  ;;  %3047 = vrot.lane.b32.xlu0 %v3030_v52, %s4570_s18  ;;  %v6379_v5 = vsel %vm2907_vm2, %v2906_v10, %v2891_v25  ;;  %v3514_v35 = vpack.i.b16 %v3493_v53, %v3459_v43  ;;  %v3637_v52 = vcombine.high %v6310_v36, %v6576_v19  ;;  %v3516_v18 = vshrl.u32 %v3493_v53, 16 }
 0x3e2   : > { %v3389_v32 = vsel %vm436_vm13, %v6598_v27, %v3374_v47  ;;  %v3807_v50 = vpop.permute.xlu1 %3806  ;;  %v3505_v40 = vpack.i.b16 %v3504_v11, %v3503_v45  ;;  %v3644_v46 = vpack.i.b16 %v3643_v22, %v3642_v33  ;;  %v3654_v47 = vshrl.u32 %v3602_v28, 16 }
 0x3e3   : > { %v3655_v30 = vshrl.u32 %v3636_v3, 16  ;;  %v3517_v27 = vpack.i.b16 %v3516_v18, %v3515_v23  ;;  %v3649_v53 = vshrl.u32 %v3637_v52, 16  ;;  %v6602_v45 = vpack.i.b16 %v6137_v14, %v6131_v13 }
 0x3e5   : > { %3520 = vrot.lane.b32.xlu1 %v3502_v55, %s4572_s8  ;;  %3200 = vrot.lane.b32.xlu0 %v3187_v39, %s4568_s17  ;;  %v3376_v25 = vpop.permute.xlu0 %3375 }
 0x3e6   : > { %v3391_v58 = vsel %vm2901_vm0, %v3389_v32, %v3376_v25  ;;  %v3803_v29 = vpop.permute.xlu1 %3802 }
 0x3e7   : > { %v3818_v37 = vsel %vm2901_vm0, %v3816_v34, %v3803_v29  ;;  %v3603_v34 = vcombine.high %v6307_v38, %v6576_v19 }
 0x3e9   : > { %3526 = vrot.lane.b32.xlu1 %v3511_v42, %s4573_s29  ;;  %3957 = vrot.lane.b32.xlu0 %v3944_v21, %s4568_s17  ;;  %v3382_v44 = vpop.permute.xlu0 %3381  ;;  %v3647_v32 = vpack.i.b16 %v3637_v52, %v3603_v34  ;;  %v3604_v21 = vcombine.high %v3602_v28, %v6576_v19  ;;  %v3648_v43 = vshrl.u32 %v3603_v34, 16  ;;  %v4141_v28 = vld [vmem:[%s6553_s4] sm:$0xff] }
 0x3ea   : > { %v3809_v1 = vpop.permute.xlu1 %3808 }
 0x3ed   : > { %3528 = vrot.lane.b32.xlu1 %v3514_v35, %s4574_s30  ;;  %3669 = vrot.lane.b32.xlu0 %v3653_v7, %s4571_s9  ;;  %v3384_v12 = vpop.permute.xlu0 %3383  ;;  %v6600_v7 = vmov 0.0  }
 0x3ee   : > { %v3811_v8 = vpop.permute.xlu1 %3810  ;;  %4430 = vmatprep.mubr.msk.bf16.mxu1 %vm4575_vm6, %v6600_v7 }
 0x3f1   : > { %3522 = vrot.lane.b32.xlu1 %v3505_v40, %s4570_s18  ;;  %3663 = vrot.lane.b32.xlu0 %v3644_v46, %s4558_s16  ;;  %v3378_v57 = vpop.permute.xlu0 %3377 }
 0x3f2   : > { %v3393_v63 = vsel %vm2904_vm1, %v3391_v58, %v3378_v57  ;;  %v3805_v10 = vpop.permute.xlu1 %3804 }
 0x3f3   : > { %v3395_v49 = vsel %vm2907_vm2, %v3393_v63, %v6363_v48  ;;  %v3820_v59 = vsel %vm2904_vm1, %v3818_v37, %v3805_v10  ;;  %v3638_v37 = vcombine.high %v3636_v3, %v6576_v19  ;;  %v3650_v19 = vpack.i.b16 %v3649_v53, %v3648_v43 }
 0x3f4   : > { %v3822_v60 = vsel %vm2907_vm2, %v3820_v59, %v3807_v50  ;;  %v3397_v55 = vsel %vm2910_vm3, %v3395_v49, %v3382_v44  ;;  %v3656_v50 = vpack.i.b16 %v3655_v30, %v3654_v47  ;;  %v6599_v44 = vpack.i.b16 %v6002_v0, %v5998_v16 }
 0x3f5   : > { %3530 = vrot.lane.b32.xlu1 %v3517_v27, %s4568_s17  ;;  %3665 = vrot.lane.b32.xlu0 %v3647_v32, %s4572_s8  ;;  %v3399_v39 = vsel %vm2913_vm4, %v3397_v55, %v3384_v12  ;;  %v3386_v31 = vpop.permute.xlu0 %3385  ;;  %v3824_v51 = vsel %vm2910_vm3, %v3822_v60, %v3809_v1  ;;  %v3659_v42 = vpack.i.b16 %v3638_v37, %v3604_v21  ;;  %v3660_v3 = vshrl.u32 %v3604_v21, 16 }
 0x3f6   : > { %v6420_v25 = vsel %vm2916_vm5, %v3399_v39, %v3386_v31  ;;  %v3826_v48 = vsel %vm2913_vm4, %v3824_v51, %v3811_v8  ;;  %v3813_v58 = vpop.permute.xlu1 %3812  ;;  %v3661_v1 = vshrl.u32 %v3638_v37, 16  ;;  %v6601_v16 = vpack.i.b16 %v6171_v56, %v6165_v41 }
 0x3f7   : > { %v6424_v29 = vsel %vm2916_vm5, %v3826_v48, %v3813_v58  ;;  %v6604_v10 = vpack.i.b16 %v6193_v20, %v6187_v15  ;;  %v6605_v53 = vpack.i.b16 %v6238_v6, %v6232_v17 }
 0x3f9   : > { %2892 = vrot.lane.b32.xlu1 %v6004_v24, %s4573_s29  ;;  %3671 = vrot.lane.b32.xlu0 %v3656_v50, %s4573_s29  ;;  %v3662_v24 = vpack.i.b16 %v3661_v1, %v3660_v3 }
 0x3fd   : > { %2894 = vrot.lane.b32.xlu1 %v6599_v44, %s4574_s30  ;;  %3673 = vrot.lane.b32.xlu0 %v3659_v42, %s4574_s30 }
 0x3ff   : > { %v3195_v0 = vpop.permute.xlu1 %3194 }
 0x401   : > { %4144 = vperm.xlu1 %4503, %v4141_v28   ;;  %3667 = vrot.lane.b32.xlu0 %v3650_v19, %s4570_s18 }
 0x405   : > { %3675 = vrot.lane.b32.xlu0 %v3662_v24, %s4568_s17 }
 0x409   : > { %3053 = vrot.lane.b32.xlu0 %v6601_v16, %s4574_s30  ;;  %v4122_v16 = vrot.slane %v6420_v25, 4 }
 0x40d   : > { %3055 = vrot.lane.b32.xlu0 %v6180_v54, %s4568_s17 }
 0x40f   : > { %v3050_v8 = vpop.permute.xlu0 %3049 }
 0x411   : > { %2896 = vrot.lane.b32.xlu0 %v6014_v4, %s4568_s17  ;;  %v6603_v4 = vpack.i.b16 %v6158_v61, %v6152_v2  ;;  %s258_s17 = scalar_lea.vmem %s6554_s5, %s4293_s13 }
 0x41f   : > { %v4097_v33 = vpop.permute.xlu1 %4096 }
 0x423   : > { %v3189_v35 = vpop.permute.xlu1 %3188 }
 0x424   : > { %v3204_v11 = vsel %vm436_vm13, %v6602_v45, %v3189_v35 }
 0x427   : > { %v3191_v22 = vpop.permute.xlu1 %3190 }
 0x428   : > { %v3206_v12 = vsel %vm2901_vm0, %v3204_v11, %v3191_v22 }
 0x42b   : > { %v3197_v41 = vpop.permute.xlu1 %3196 }
 0x42f   : > { %v3199_v56 = vpop.permute.xlu1 %3198  ;;  %v3952_v34 = vpop.permute.xlu0 %3951 }
 0x433   : > { %v3052_v52 = vpop.permute.xlu1 %3051  ;;  %v3044_v54 = vpop.permute.xlu0 %3043 }
 0x434   : > { %v3059_v40 = vsel %vm436_vm13, %v6603_v4, %v3044_v54 }
 0x437   : > { %v4093_v46 = vpop.permute.xlu1 %4092  ;;  %v3046_v23 = vpop.permute.xlu0 %3045 }
 0x438   : > { %v3061_v13 = vsel %vm2901_vm0, %v3059_v40, %v3046_v23 }
 0x43b   : > { %v4101_v14 = vpop.permute.xlu1 %4100  ;;  %v4091_v18 = vpop.permute.xlu0 %4090 }
 0x43c   : > { %v4106_v47 = vsel %vm436_vm13, %v6604_v10, %v4091_v18  ;;  %v6606_v18 = vpack.i.b16 %v6310_v36, %v6307_v38 }
 0x43d   : > { %v4108_v59 = vsel %vm2901_vm0, %v4106_v47, %v4093_v46 }
 0x43f   : > { %v3193_v57 = vpop.permute.xlu1 %3192  ;;  %v3946_v63 = vpop.permute.xlu0 %3945 }
 0x440   : > { %v3208_v30 = vsel %vm2904_vm1, %v3206_v12, %v3193_v57  ;;  %v3961_v44 = vsel %vm436_vm13, %v6605_v53, %v3946_v63 }
 0x441   : > { %v3210_v49 = vsel %vm2907_vm2, %v3208_v30, %v3195_v0 }
 0x442   : > { %v3212_v2 = vsel %vm2910_vm3, %v3210_v49, %v3197_v41 }
 0x443   : > { %v4095_v61 = vpop.permute.xlu1 %4094  ;;  %v3948_v27 = vpop.permute.xlu0 %3947  ;;  %v3214_v32 = vsel %vm2913_vm4, %v3212_v2, %v3199_v56 }
 0x444   : > { %v4110_v60 = vsel %vm2904_vm1, %v4108_v59, %v4095_v61  ;;  %v3963_v19 = vsel %vm2901_vm0, %v3961_v44, %v3948_v27 }
 0x445   : > { %v4112_v39 = vsel %vm2907_vm2, %v4110_v60, %v4097_v33 }
 0x447   : > { %v3950_v55 = vpop.permute.xlu1 %3949  ;;  %v4099_v15 = vpop.permute.xlu0 %4098 }
 0x448   : > { %v4114_v20 = vsel %vm2910_vm3, %v4112_v39, %v4099_v15  ;;  %v3965_v1 = vsel %vm2904_vm1, %v3963_v19, %v3950_v55 }
 0x449   : > { %v4116_v51 = vsel %vm2913_vm4, %v4114_v20, %v4101_v14  ;;  %v3967_v35 = vsel %vm2907_vm2, %v3965_v1, %v3952_v34 }
 0x44b   : > { %v4103_v31 = vpop.permute.xlu1 %4102  ;;  %v3954_v48 = vpop.permute.xlu0 %3953 }
 0x44c   : > { %v4118_v58 = vsel %vm2916_vm5, %v4116_v51, %v4103_v31  ;;  %v3969_v45 = vsel %vm2910_vm3, %v3967_v35, %v3954_v48 }
 0x44d   : > { %v4150_v50 = vsel %vm4127_vm7, %v4118_v58, 0 }
 0x44e   : > { %4421 = vmatpush3.bf16.msra.mxu1 %v4150_v50 }
 0x44f   : > { %v3525_v21 = vpop.permute.xlu1 %3524  ;;  %v3956_v37 = vpop.permute.xlu0 %3955  ;;  %4422 = vmatprep.subr.bf16.mxu1 %v6600_v7 }
 0x450   : > { %v3971_v11 = vsel %vm2913_vm4, %v3969_v45, %v3956_v37  ;;  %v4140_v37 = vld [vmem:[%s6552_s3] sm:$0xf] }
 0x453   : > { %v3519_v42 = vpop.permute.xlu1 %3518  ;;  %v3048_v43 = vpop.permute.xlu0 %3047 }
 0x454   : > { %v3063_v28 = vsel %vm2904_vm1, %v3061_v13, %v3048_v43  ;;  %v3534_v46 = vsel %vm436_vm13, %v3496_v26, %v3519_v42 }
 0x455   : > { %v3065_v3 = vsel %vm2907_vm2, %v3063_v28, %v3050_v8 }
 0x456   : > { %v3067_v24 = vsel %vm2910_vm3, %v3065_v3, %v3052_v52 }
 0x457   : > { %v3201_v0 = vpop.permute.xlu0 %3200  ;;  %v3521_v17 = vpop.permute.xlu1 %3520 }
 0x458   : > { %v3216_v33 = vsel %vm2916_vm5, %v3214_v32, %v3201_v0  ;;  %v3536_v23 = vsel %vm2901_vm0, %v3534_v46, %v3521_v17 }
 0x459   : > { %v4132_v6 = vsel %vm4127_vm7, %v3216_v33, %v4122_v16 }
 0x45b   : > { %v3958_v22 = vpop.permute.xlu0 %3957  ;;  %v3527_v41 = vpop.permute.xlu1 %3526 }
 0x45c   : > { %v3973_v12 = vsel %vm2916_vm5, %v3971_v11, %v3958_v22 }
 0x45d   : > { %v4126_v8 = vrot.slane %v3973_v12, 4 }
 0x45f   : > { %v3670_v56 = vpop.permute.xlu0 %3669  ;;  %v4138_v25 = vsel %vm4127_vm7, %v6424_v29, %v4126_v8  ;;  %v3529_v52 = vpop.permute.xlu1 %3528 }
 0x460   : > { %4423 = vmatpush3.bf16.msra.mxu1 %v4138_v25 }
 0x461   : > { %4424 = vmatprep.subr.bf16.mxu1 %v6600_v7 }
 0x463   : > { %v3664_v34 = vpop.permute.xlu0 %3663  ;;  %v3523_v4 = vpop.permute.xlu1 %3522 }
 0x464   : > { %v3538_v13 = vsel %vm2904_vm1, %v3536_v23, %v3523_v4  ;;  %v3679_v57 = vsel %vm436_vm13, %v6606_v18, %v3664_v34 }
 0x465   : > { %v3540_v29 = vsel %vm2907_vm2, %v3538_v13, %v3525_v21 }
 0x466   : > { %v3542_v47 = vsel %vm2910_vm3, %v3540_v29, %v3527_v41 }
 0x467   : > { %v3666_v54 = vpop.permute.xlu0 %3665  ;;  %v3531_v62 = vpop.permute.xlu1 %3530  ;;  %v3544_v49 = vsel %vm2913_vm4, %v3542_v47, %v3529_v52 }
 0x468   : > { %v3681_v63 = vsel %vm2901_vm0, %v3679_v57, %v3666_v54  ;;  %v3546_v59 = vsel %vm2916_vm5, %v3544_v49, %v3531_v62 }
 0x46b   : > { %v3672_v40 = vpop.permute.xlu0 %3671  ;;  %v2893_v27 = vpop.permute.xlu1 %2892 }
 0x46c   : > { %v2912_v31 = vsel %vm2910_vm3, %v6379_v5, %v2893_v27 }
 0x46f   : > { %v3674_v14 = vpop.permute.xlu0 %3673  ;;  %v2895_v15 = vpop.permute.xlu1 %2894 }
 0x470   : > { %v2915_v51 = vsel %vm2913_vm4, %v2912_v31, %v2895_v15 }
 0x473   : > { %v3668_v10 = vpop.permute.xlu0 %3667 }
 0x474   : > { %v3683_v9 = vsel %vm2904_vm1, %v3681_v63, %v3668_v10 }
 0x475   : > { %v3685_v26 = vsel %vm2907_vm2, %v3683_v9, %v3670_v56 }
 0x476   : > { %v3687_v30 = vsel %vm2910_vm3, %v3685_v26, %v3672_v40 }
 0x477   : > { %v3689_v2 = vsel %vm2913_vm4, %v3687_v30, %v3674_v14  ;;  %v3676_v61 = vpop.permute.xlu0 %3675 }
 0x478   : > { %v3691_v36 = vsel %vm2916_vm5, %v3689_v2, %v3676_v61 }
 0x479   : > { %v4124_v38 = vrot.slane %v3691_v36, 4 }
 0x47b   : > { %v3054_v32 = vpop.permute.xlu0 %3053  ;;  %v4135_v60 = vsel %vm4127_vm7, %v3546_v59, %v4124_v38 }
 0x47c   : > { %4425 = vmatpush3.bf16.msra.mxu1 %v4135_v60  ;;  %v3069_v55 = vsel %vm2913_vm4, %v3067_v24, %v3054_v32 }
 0x47d   : > { %4426 = vmatprep.subr.bf16.mxu1 %v6600_v7 }
 0x47f   : > { %v3056_v39 = vpop.permute.xlu0 %3055 }
 0x480   : > { %v3071_v20 = vsel %vm2916_vm5, %v3069_v55, %v3056_v39  ;;  %4427 = vmatpush3.bf16.msra.mxu1 %v4132_v6 }
 0x481   : > { %4428 = vmatprep.subr.bf16.mxu1 %v6600_v7  ;;  %v4120_v48 = vrot.slane %v3071_v20, 4  ;;  %v4145_v7 = vpop.permute.xlu1 %4144 }
 0x483   : > { %v2897_v58 = vpop.permute.xlu0 %2896 }
 0x484   : > { %v2918_v50 = vsel %vm2916_vm5, %v2915_v51, %v2897_v58 }
 0x485   : > { %v4129_v21 = vsel %vm4127_vm7, %v2918_v50, %v4120_v48 }
 0x486   : > { %4429 = vmatpush3.bf16.msra.mxu1 %v4129_v21 }
 0x489   : > { %4431 = vmatmul.mubr.msk.bf16.vlgmr.msra.gmra.mxu1 %vm424_vm9, %v4140_v37 }
 0x549   : > { %v4186_v42 = vpop.f32.mrf.mxu1 }
 0x54a   : > { %v4187_v5 = vadd.f32 %v4186_v42, %v4145_v7 }
 0x54b   : > { %v4432_v43 = vpop.f32.mrf.mxu1 }
 0x54c   : > { %v4192_v53 = vmax.f32 %v4187_v5, 0.0 }
 0x54d   : > { %v4189_v44 = vpop.f32.mrf.mxu1 }
 0x54e   : > { %v4193_v28 = vpack.c.bf16 %v4192_v53, %v4192_v53 }
 0x54f   : > { %v4433_v19 = vpop.f32.mrf.mxu1 }
 0x550   : > { %4194 = vst [vmem:[%s258_s17] sm:$0xf] %v4193_v28 }
 0x551 PF: > { %s15_s22 = sadd.s32 1, %s4545_s22   ;;  %s6607_s18 = smov %s4537_s20 }
 0x552   : > { %p12_p7 = scmp.ge.s32.totalorder %s15_s22, 6   ;;  %s6608_s19 = smov %s4541_s21 }
 0x553   : > { %s6609_s20 = smov %s6612_s23  ;;  %s6610_s21 = smov %s6616_s24 }
 0x554   :  { %14 = sbr.rel (!%p12_p7) target bundleno = 3 (0x3), region = 78 }

</bundles_post_ra>
